<compile_context>
chip_gen: v7x
topology: tpu7x:2x2x1
jax: 0.10.0
libtpu: 0.0.40
codegen_flags: <defaults>
</compile_context>

<pallas_src>
import collections

import jax
import jax.numpy as jnp
import numpy as np
from jax.experimental import pallas as pl
from jax.experimental.pallas import tpu as pltpu

Block = collections.namedtuple("Block", ["scope", "unit_fn", "args"])


def _round_up(x, m):
    return ((x + m - 1) // m) * m


def resolve_units(blocks, output_stride=None):
    """Mirrors StackBlocksDense.__init__ stride/rate (atrous) bookkeeping."""
    current_stride = 1
    rate = 1
    units = []
    for block in blocks:
        for unit in block.args:
            if output_stride is not None and current_stride > output_stride:
                raise ValueError("The target output_stride cannot be reached.")
            if output_stride is not None and current_stride == output_stride:
                units.append(dict(unit, stride=1, rate=rate))
                rate *= unit.get("stride", 1)
            else:
                units.append(dict(unit, rate=1))
                current_stride *= unit.get("stride", 1)
    if output_stride is not None and current_stride != output_stride:
        raise ValueError("The target output_stride cannot be reached.")
    return units


# ---------------------------------------------------------------------------
# Fused Xception-unit Pallas kernel
# ---------------------------------------------------------------------------
def make_unit_kernel(H, W, rate, stride, chans, has_sc, mxu_dtype):
    """n separable convs (depthwise+pointwise folded into one im2col MXU
    matmul each) + 1x1 shortcut conv + residual add, with in-kernel SAME
    padding and in-kernel stride-s subsampling.  Intermediate activations
    never leave VMEM."""
    n_convs = len(chans) - 1
    r, s = rate, stride
    c0 = chans[0]
    Ho, Wo = -(-H // s), -(-W // s)            # ceil(H/s), ceil(W/s)
    rtop = r                                   # top halo rows
    lpad = max(8, _round_up(r, 8))             # sublane-aligned interior start
    Hp = H + 2 * r
    Wpa = _round_up(lpad + W + r, 8)
    cmax = max(chans[:-1])
    pad_shape = (Hp, Wpa, cmax)

    def kernel(*refs):
        x_ref = refs[0]
        w_refs = refs[1:1 + n_convs]
        pos = 1 + n_convs
        sc_ref = refs[pos] if has_sc else None
        pos += 1 if has_sc else 0
        o_ref = refs[pos]
        pad_ref = refs[pos + 1]

        # Zero the halo scratch ONCE per grid step (one unmasked full-slab
        # store); interiors are fully overwritten before every window read,
        # so the halo stays zero for the whole unit.
        pad_ref[...] = jnp.zeros(pad_shape, jnp.float32)

        x = x_ref[0].astype(jnp.float32)                    # (H, W, c0)
        cur = x
        out = None
        xs = None
        for i in range(n_convs):
            ci, co = chans[i], chans[i + 1]
            last = (i == n_convs - 1)
            strided = last and s > 1

            # Interior write starts at a sublane-aligned column (lpad % 8 == 0).
            pad_ref[rtop:rtop + H, lpad:lpad + W, 0:ci] = cur

            if i == 0:
                # Shortcut operand = original x, subsampled at strided
                # positions (read back from the padded scratch before it is
                # overwritten by the next conv's interior).
                if s > 1:
                    xs = pad_ref[pl.ds(rtop, Ho, stride=s),
                                 pl.ds(lpad, Wo, stride=s), 0:c0]
                    xs = xs.reshape(Ho * Wo, c0)
                else:
                    xs = x.reshape(H * W, c0)

            # im2col: 9 shifted/dilated windows concatenated on the lane dim,
            # then ONE MXU matmul with K = 9*ci (f32 accumulation, bf16
            # operands on the bf16 path).
            oh, ow = (Ho, Wo) if strided else (H, W)
            wins = []
            for t in range(9):
                ki, kj = divmod(t, 3)
                rs0 = ki * r
                cs0 = lpad - r + kj * r
                if strided:
                    win = pad_ref[pl.ds(rs0, Ho, stride=s),
                                  pl.ds(cs0, Wo, stride=s), 0:ci]
                else:
                    win = pad_ref[rs0:rs0 + H, cs0:cs0 + W, 0:ci]
                wins.append(win)
            lhs = jnp.concatenate(wins, axis=-1).reshape(oh * ow, 9 * ci)
            acc = jnp.dot(lhs.astype(mxu_dtype), w_refs[i][...],
                          preferred_element_type=jnp.float32)
            if not last:
                cur = jnp.maximum(acc, 0.0).reshape(H, W, co)   # f32 ReLU (VPU)
            else:
                out = acc                                       # (Ho*Wo, c_out)

        if has_sc:
            short = jnp.dot(xs.astype(mxu_dtype), sc_ref[...],
                            preferred_element_type=jnp.float32)
        else:
            short = xs                                          # identity (f32)
        o_ref[0] = (out + short).astype(o_ref.dtype)

    geom = dict(Hp=Hp, Wpa=Wpa, cmax=cmax, Ho=Ho, Wo=Wo)
    return kernel, geom


def xception_unit(x, params, depth_list, stride, rate):
    """One fused Xception module.  x: [N, H, W, Cin] NHWC (f32 or bf16)."""
    N, H, W, c0 = x.shape
    chans = [c0] + list(depth_list)
    c_out = chans[-1]
    n_convs = len(depth_list)
    has_sc = (stride != 1) or (c0 != c_out)
    if not has_sc:
        # Identity shortcut is only valid for stride 1 with matching channels.
        assert stride == 1 and c0 == c_out
    mxu_dtype = x.dtype      # bf16 on the fast path, f32 on the check path

    # Host-side fold: dw[tap, ci] * pw[ci, co] stacked to (9*ci, co), cast to
    # the MXU operand dtype (stored in HBM at that precision).
    wstk = []
    for i in range(n_convs):
        dw9 = params[f"dw{i}"].reshape(9, chans[i])          # (9, ci)
        pw = params[f"pw{i}"]                                # (ci, co)
        w = (dw9[:, :, None] * pw[None, :, :]).reshape(9 * chans[i],
                                                       chans[i + 1])
        wstk.append(w.astype(mxu_dtype))

    kernel, g = make_unit_kernel(H, W, rate, stride, chans, has_sc, mxu_dtype)
    Ho, Wo, Mo = g["Ho"], g["Wo"], g["Ho"] * g["Wo"]

    inputs = [x] + wstk
    in_specs = [pl.BlockSpec((1, H, W, c0), lambda n: (n, 0, 0, 0))]
    for i in range(n_convs):
        in_specs.append(
            pl.BlockSpec((9 * chans[i], chans[i + 1]), lambda n: (0, 0)))
    if has_sc:
        inputs.append(params["sc"].astype(mxu_dtype))
        in_specs.append(pl.BlockSpec((c0, c_out), lambda n: (0, 0)))

    out = pl.pallas_call(
        kernel,
        out_shape=jax.ShapeDtypeStruct((N, Mo, c_out), x.dtype),
        grid=(N,),
        in_specs=in_specs,
        out_specs=pl.BlockSpec((1, Mo, c_out), lambda n: (n, 0, 0)),
        scratch_shapes=[pltpu.VMEM((g["Hp"], g["Wpa"], g["cmax"]),
                                   jnp.float32)],
        compiler_params=pltpu.CompilerParams(
            dimension_semantics=("parallel",)),
    )(*inputs)
    return out.reshape(N, Ho, Wo, c_out)


def stack_blocks_dense_forward(x_nchw, units, all_params, dtype=jnp.bfloat16):
    """Full StackBlocksDense forward.  NCHW in / NCHW out."""
    x = jnp.transpose(x_nchw, (0, 2, 3, 1)).astype(dtype)   # NCHW -> NHWC
    for u, p in zip(units, all_params):
        x = xception_unit(x, p, u["depth_list"], u["stride"], u["rate"])
    return jnp.transpose(x, (0, 3, 1, 2))                   # NHWC -> NCHW


# ---------------------------------------------------------------------------
# Pure-JAX reference (correctness check only)
# ---------------------------------------------------------------------------
def ref_unit(x, params, depth_list, stride, rate):
    res = x
    for i, _ in enumerate(depth_list):
        cin = res.shape[-1]
        y = jax.lax.conv_general_dilated(
            res, params[f"dw{i}"].reshape(3, 3, 1, cin),
            window_strides=(1, 1), padding=((rate, rate), (rate, rate)),
            rhs_dilation=(rate, rate),
            dimension_numbers=("NHWC", "HWIO", "NHWC"),
            feature_group_count=cin)
        y = jnp.einsum("nhwc,cd->nhwd", y, params[f"pw{i}"])
        if i < len(depth_list) - 1:
            y = jnp.maximum(y, 0.0)
        res = y
    if stride > 1:
        res = res[:, ::stride, ::stride, :]
        xs = x[:, ::stride, ::stride, :]
    else:
        xs = x
    if "sc" in params:
        xs = jnp.einsum("nhwc,cd->nhwd", xs, params["sc"])
    return res + xs


# ---------------------------------------------------------------------------
# Parameter init
# ---------------------------------------------------------------------------
def init_unit_params(key, cin, depth_list, stride):
    params = {}
    keys = jax.random.split(key, 2 * len(depth_list) + 1)
    c = cin
    for i, d in enumerate(depth_list):
        params[f"dw{i}"] = 0.1 * jax.random.normal(keys[2 * i], (3, 3, c),
                                                   jnp.float32)
        params[f"pw{i}"] = 0.1 * jax.random.normal(keys[2 * i + 1], (c, d),
                                                   jnp.float32)
        c = d
    if stride != 1 or cin != depth_list[-1]:
        params["sc"] = 0.1 * jax.random.normal(keys[-1], (cin, depth_list[-1]),
                                               jnp.float32)
    return params


# ---------------------------------------------------------------------------
if __name__ == "__main__":
    key = jax.random.PRNGKey(0)

    # Blocks with nominal unit strides 2, 2, 1.  output_stride=2 forces the
    # later units to stride 1 with atrous rate 2 (dense feature extraction),
    # exactly as in StackBlocksDense.__init__.
    blocks = [
        Block("block1", "xception_module",
              [{"depth_list": [16, 16, 16], "stride": 2}]),
        Block("block2", "xception_module",
              [{"depth_list": [32, 32, 32], "stride": 2}]),
        Block("block3", "xception_module",
              [{"depth_list": [32, 32, 32], "stride": 1}]),
    ]
    output_stride = 2
    units = resolve_units(blocks, output_stride)

    cin = 8
    all_params = []
    c = cin
    for u in units:
        key, sub = jax.random.split(key)
        all_params.append(init_unit_params(sub, c, u["depth_list"], u["stride"]))
        c = u["depth_list"][-1]

    key, sub = jax.random.split(key)
    x_nchw = jax.random.normal(sub, (2, cin, 16, 16), jnp.float32)  # NCHW

    # f32 reference
    y_ref = jnp.transpose(x_nchw, (0, 2, 3, 1))
    for u, p in zip(units, all_params):
        y_ref = ref_unit(y_ref, p, u["depth_list"], u["stride"], u["rate"])
    ref_nchw = np.asarray(jnp.transpose(y_ref, (0, 3, 1, 2)))

    # Kernel, f32 path: tight correctness check.
    out_f32 = jax.block_until_ready(
        stack_blocks_dense_forward(x_nchw, units, all_params,
                                   dtype=jnp.float32))
    np.testing.assert_allclose(np.asarray(out_f32), ref_nchw,
                               rtol=1e-3, atol=1e-3)

    # Kernel, bf16 fast path (bf16 MXU operands + bf16 inter-unit storage):
    # loose sanity check against the f32 reference.
    out_bf16 = jax.block_until_ready(
        stack_blocks_dense_forward(x_nchw, units, all_params,
                                   dtype=jnp.bfloat16))
    np.testing.assert_allclose(np.asarray(out_bf16.astype(jnp.float32)),
                               ref_nchw, rtol=1e-1, atol=5e-2)

    # TODO(synk): the exact Xception unit_fn internals (BN params, ReLU
    # placement) are not visible in the reference file; a canonical
    # 3x separable-conv module with conv/identity shortcut is implemented.
    print("KERNEL_OK")
</pallas_src>

<mosaic_0001>
module attributes {stable_mosaic.version = 11 : i64} {
  func.func @kernel(%arg0: i32, %arg1: memref<1x16x16x8xf32, #tpu.memory_space<vmem>>, %arg2: memref<72x16xf32, #tpu.memory_space<vmem>>, %arg3: memref<144x16xf32, #tpu.memory_space<vmem>>, %arg4: memref<144x16xf32, #tpu.memory_space<vmem>>, %arg5: memref<8x16xf32, #tpu.memory_space<vmem>>, %arg6: memref<1x64x16xf32, #tpu.memory_space<vmem>>, %arg7: memref<18x32x16xf32, #tpu.memory_space<vmem>>) attributes {dimension_semantics = [#tpu.dimension_semantics<parallel>], iteration_bounds = array<i64: 2>, scalar_prefetch = 0 : i64, scratch_operands = 1 : i64, tpu.core_type = #tpu.core_type<tc>, window_params = [{transform_indices = @transform_0, window_bounds = array<i64: 1, 16, 16, 8>}, {pipeline_mode = #tpu.pipeline_mode<synchronous>, transform_indices = @transform_1, window_bounds = array<i64: 72, 16>}, {pipeline_mode = #tpu.pipeline_mode<synchronous>, transform_indices = @transform_2, window_bounds = array<i64: 144, 16>}, {pipeline_mode = #tpu.pipeline_mode<synchronous>, transform_indices = @transform_3, window_bounds = array<i64: 144, 16>}, {pipeline_mode = #tpu.pipeline_mode<synchronous>, transform_indices = @transform_4, window_bounds = array<i64: 8, 16>}, {transform_indices = @transform_5, window_bounds = array<i64: 1, 64, 16>}]} {
    %cst = arith.constant 0.000000e+00 : f32
    %0 = vector.broadcast %cst : f32 to vector<18x32x16xf32>
    %c0 = arith.constant 0 : index
    %c0_0 = arith.constant 0 : index
    %c0_1 = arith.constant 0 : index
    %1 = vector.load %arg7[%c0, %c0_0, %c0_1] : memref<18x32x16xf32, #tpu.memory_space<vmem>>, vector<18x32x16xf32>
    tpu.vector_store %arg7[%c0, %c0_0, %c0_1], %0 {strides = array<i32>} : memref<18x32x16xf32, #tpu.memory_space<vmem>>, vector<18x32x16xf32>,
    %c0_2 = arith.constant 0 : index
    %c0_3 = arith.constant 0 : index
    %c0_4 = arith.constant 0 : index
    %c0_5 = arith.constant 0 : index
    %2 = vector.load %arg1[%c0_2, %c0_3, %c0_4, %c0_5] : memref<1x16x16x8xf32, #tpu.memory_space<vmem>>, vector<1x16x16x8xf32>
    %3 = vector.shape_cast %2 : vector<1x16x16x8xf32> to vector<16x16x8xf32>
    %c1 = arith.constant 1 : index
    %c8 = arith.constant 8 : index
    %c0_6 = arith.constant 0 : index
    %4 = vector.load %arg7[%c1, %c8, %c0_6] : memref<18x32x16xf32, #tpu.memory_space<vmem>>, vector<16x16x8xf32>
    tpu.vector_store %arg7[%c1, %c8, %c0_6], %3 {strides = array<i32>} : memref<18x32x16xf32, #tpu.memory_space<vmem>>, vector<16x16x8xf32>,
    %c1_7 = arith.constant 1 : index
    %c8_8 = arith.constant 8 : index
    %c0_9 = arith.constant 0 : index
    %5 = tpu.strided_load %arg7[%c1_7, %c8_8, %c0_9] {strides = array<i32: 2, 2, 1>} : memref<18x32x16xf32, #tpu.memory_space<vmem>>, vector<8x8x8xf32>
    %6 = vector.shape_cast %5 : vector<8x8x8xf32> to vector<64x8xf32>
    %c0_10 = arith.constant 0 : index
    %c7 = arith.constant 7 : index
    %c0_11 = arith.constant 0 : index
    %7 = vector.load %arg7[%c0_10, %c7, %c0_11] : memref<18x32x16xf32, #tpu.memory_space<vmem>>, vector<16x16x8xf32>
    %c0_12 = arith.constant 0 : index
    %c8_13 = arith.constant 8 : index
    %c0_14 = arith.constant 0 : index
    %8 = vector.load %arg7[%c0_12, %c8_13, %c0_14] : memref<18x32x16xf32, #tpu.memory_space<vmem>>, vector<16x16x8xf32>
    %c0_15 = arith.constant 0 : index
    %c9 = arith.constant 9 : index
    %c0_16 = arith.constant 0 : index
    %9 = vector.load %arg7[%c0_15, %c9, %c0_16] : memref<18x32x16xf32, #tpu.memory_space<vmem>>, vector<16x16x8xf32>
    %c1_17 = arith.constant 1 : index
    %c7_18 = arith.constant 7 : index
    %c0_19 = arith.constant 0 : index
    %10 = vector.load %arg7[%c1_17, %c7_18, %c0_19] : memref<18x32x16xf32, #tpu.memory_space<vmem>>, vector<16x16x8xf32>
    %c1_20 = arith.constant 1 : index
    %c8_21 = arith.constant 8 : index
    %c0_22 = arith.constant 0 : index
    %11 = vector.load %arg7[%c1_20, %c8_21, %c0_22] : memref<18x32x16xf32, #tpu.memory_space<vmem>>, vector<16x16x8xf32>
    %c1_23 = arith.constant 1 : index
    %c9_24 = arith.constant 9 : index
    %c0_25 = arith.constant 0 : index
    %12 = vector.load %arg7[%c1_23, %c9_24, %c0_25] : memref<18x32x16xf32, #tpu.memory_space<vmem>>, vector<16x16x8xf32>
    %c2 = arith.constant 2 : index
    %c7_26 = arith.constant 7 : index
    %c0_27 = arith.constant 0 : index
    %13 = vector.load %arg7[%c2, %c7_26, %c0_27] : memref<18x32x16xf32, #tpu.memory_space<vmem>>, vector<16x16x8xf32>
    %c2_28 = arith.constant 2 : index
    %c8_29 = arith.constant 8 : index
    %c0_30 = arith.constant 0 : index
    %14 = vector.load %arg7[%c2_28, %c8_29, %c0_30] : memref<18x32x16xf32, #tpu.memory_space<vmem>>, vector<16x16x8xf32>
    %c2_31 = arith.constant 2 : index
    %c9_32 = arith.constant 9 : index
    %c0_33 = arith.constant 0 : index
    %15 = vector.load %arg7[%c2_31, %c9_32, %c0_33] : memref<18x32x16xf32, #tpu.memory_space<vmem>>, vector<16x16x8xf32>
    %16 = tpu.concatenate %7, %8, %9, %10, %11, %12, %13, %14, %15 in 2 : vector<16x16x8xf32>, vector<16x16x8xf32>, vector<16x16x8xf32>, vector<16x16x8xf32>, vector<16x16x8xf32>, vector<16x16x8xf32>, vector<16x16x8xf32>, vector<16x16x8xf32>, vector<16x16x8xf32> -> vector<16x16x72xf32>
    %17 = vector.shape_cast %16 : vector<16x16x72xf32> to vector<256x72xf32>
    %c0_34 = arith.constant 0 : index
    %c0_35 = arith.constant 0 : index
    %18 = vector.load %arg2[%c0_34, %c0_35] : memref<72x16xf32, #tpu.memory_space<vmem>>, vector<72x16xf32>
    %cst_36 = arith.constant dense<0.000000e+00> : vector<256x16xf32>
    %19 = tpu.matmul %17, %18, %cst_36 {dimension_numbers = #tpu.dot_dimension_numbers<[1], [0], [0], [1], [0, 0, 1, 1], [], []>} : vector<256x72xf32>, vector<72x16xf32>, vector<256x16xf32> -> vector<256x16xf32>
    %cst_37 = arith.constant 0.000000e+00 : f32
    %20 = vector.broadcast %cst_37 : f32 to vector<256x16xf32>
    %21 = arith.maximumf %19, %20 : vector<256x16xf32>
    %22 = vector.shape_cast %21 : vector<256x16xf32> to vector<16x16x16xf32>
    %c1_38 = arith.constant 1 : index
    %c8_39 = arith.constant 8 : index
    %c0_40 = arith.constant 0 : index
    %23 = vector.load %arg7[%c1_38, %c8_39, %c0_40] : memref<18x32x16xf32, #tpu.memory_space<vmem>>, vector<16x16x16xf32>
    tpu.vector_store %arg7[%c1_38, %c8_39, %c0_40], %22 {strides = array<i32>} : memref<18x32x16xf32, #tpu.memory_space<vmem>>, vector<16x16x16xf32>,
    %c0_41 = arith.constant 0 : index
    %c7_42 = arith.constant 7 : index
    %c0_43 = arith.constant 0 : index
    %24 = vector.load %arg7[%c0_41, %c7_42, %c0_43] : memref<18x32x16xf32, #tpu.memory_space<vmem>>, vector<16x16x16xf32>
    %c0_44 = arith.constant 0 : index
    %c8_45 = arith.constant 8 : index
    %c0_46 = arith.constant 0 : index
    %25 = vector.load %arg7[%c0_44, %c8_45, %c0_46] : memref<18x32x16xf32, #tpu.memory_space<vmem>>, vector<16x16x16xf32>
    %c0_47 = arith.constant 0 : index
    %c9_48 = arith.constant 9 : index
    %c0_49 = arith.constant 0 : index
    %26 = vector.load %arg7[%c0_47, %c9_48, %c0_49] : memref<18x32x16xf32, #tpu.memory_space<vmem>>, vector<16x16x16xf32>
    %c1_50 = arith.constant 1 : index
    %c7_51 = arith.constant 7 : index
    %c0_52 = arith.constant 0 : index
    %27 = vector.load %arg7[%c1_50, %c7_51, %c0_52] : memref<18x32x16xf32, #tpu.memory_space<vmem>>, vector<16x16x16xf32>
    %c1_53 = arith.constant 1 : index
    %c8_54 = arith.constant 8 : index
    %c0_55 = arith.constant 0 : index
    %28 = vector.load %arg7[%c1_53, %c8_54, %c0_55] : memref<18x32x16xf32, #tpu.memory_space<vmem>>, vector<16x16x16xf32>
    %c1_56 = arith.constant 1 : index
    %c9_57 = arith.constant 9 : index
    %c0_58 = arith.constant 0 : index
    %29 = vector.load %arg7[%c1_56, %c9_57, %c0_58] : memref<18x32x16xf32, #tpu.memory_space<vmem>>, vector<16x16x16xf32>
    %c2_59 = arith.constant 2 : index
    %c7_60 = arith.constant 7 : index
    %c0_61 = arith.constant 0 : index
    %30 = vector.load %arg7[%c2_59, %c7_60, %c0_61] : memref<18x32x16xf32, #tpu.memory_space<vmem>>, vector<16x16x16xf32>
    %c2_62 = arith.constant 2 : index
    %c8_63 = arith.constant 8 : index
    %c0_64 = arith.constant 0 : index
    %31 = vector.load %arg7[%c2_62, %c8_63, %c0_64] : memref<18x32x16xf32, #tpu.memory_space<vmem>>, vector<16x16x16xf32>
    %c2_65 = arith.constant 2 : index
    %c9_66 = arith.constant 9 : index
    %c0_67 = arith.constant 0 : index
    %32 = vector.load %arg7[%c2_65, %c9_66, %c0_67] : memref<18x32x16xf32, #tpu.memory_space<vmem>>, vector<16x16x16xf32>
    %33 = tpu.concatenate %24, %25, %26, %27, %28, %29, %30, %31, %32 in 2 : vector<16x16x16xf32>, vector<16x16x16xf32>, vector<16x16x16xf32>, vector<16x16x16xf32>, vector<16x16x16xf32>, vector<16x16x16xf32>, vector<16x16x16xf32>, vector<16x16x16xf32>, vector<16x16x16xf32> -> vector<16x16x144xf32>
    %34 = vector.shape_cast %33 : vector<16x16x144xf32> to vector<256x144xf32>
    %c0_68 = arith.constant 0 : index
    %c0_69 = arith.constant 0 : index
    %35 = vector.load %arg3[%c0_68, %c0_69] : memref<144x16xf32, #tpu.memory_space<vmem>>, vector<144x16xf32>
    %cst_70 = arith.constant dense<0.000000e+00> : vector<256x16xf32>
    %36 = tpu.matmul %34, %35, %cst_70 {dimension_numbers = #tpu.dot_dimension_numbers<[1], [0], [0], [1], [0, 0, 1, 1], [], []>} : vector<256x144xf32>, vector<144x16xf32>, vector<256x16xf32> -> vector<256x16xf32>
    %cst_71 = arith.constant 0.000000e+00 : f32
    %37 = vector.broadcast %cst_71 : f32 to vector<256x16xf32>
    %38 = arith.maximumf %36, %37 : vector<256x16xf32>
    %39 = vector.shape_cast %38 : vector<256x16xf32> to vector<16x16x16xf32>
    %c1_72 = arith.constant 1 : index
    %c8_73 = arith.constant 8 : index
    %c0_74 = arith.constant 0 : index
    %40 = vector.load %arg7[%c1_72, %c8_73, %c0_74] : memref<18x32x16xf32, #tpu.memory_space<vmem>>, vector<16x16x16xf32>
    tpu.vector_store %arg7[%c1_72, %c8_73, %c0_74], %39 {strides = array<i32>} : memref<18x32x16xf32, #tpu.memory_space<vmem>>, vector<16x16x16xf32>,
    %c0_75 = arith.constant 0 : index
    %c7_76 = arith.constant 7 : index
    %c0_77 = arith.constant 0 : index
    %41 = tpu.strided_load %arg7[%c0_75, %c7_76, %c0_77] {strides = array<i32: 2, 2, 1>} : memref<18x32x16xf32, #tpu.memory_space<vmem>>, vector<8x8x16xf32>
    %c0_78 = arith.constant 0 : index
    %c8_79 = arith.constant 8 : index
    %c0_80 = arith.constant 0 : index
    %42 = tpu.strided_load %arg7[%c0_78, %c8_79, %c0_80] {strides = array<i32: 2, 2, 1>} : memref<18x32x16xf32, #tpu.memory_space<vmem>>, vector<8x8x16xf32>
    %c0_81 = arith.constant 0 : index
    %c9_82 = arith.constant 9 : index
    %c0_83 = arith.constant 0 : index
    %43 = tpu.strided_load %arg7[%c0_81, %c9_82, %c0_83] {strides = array<i32: 2, 2, 1>} : memref<18x32x16xf32, #tpu.memory_space<vmem>>, vector<8x8x16xf32>
    %c1_84 = arith.constant 1 : index
    %c7_85 = arith.constant 7 : index
    %c0_86 = arith.constant 0 : index
    %44 = tpu.strided_load %arg7[%c1_84, %c7_85, %c0_86] {strides = array<i32: 2, 2, 1>} : memref<18x32x16xf32, #tpu.memory_space<vmem>>, vector<8x8x16xf32>
    %c1_87 = arith.constant 1 : index
    %c8_88 = arith.constant 8 : index
    %c0_89 = arith.constant 0 : index
    %45 = tpu.strided_load %arg7[%c1_87, %c8_88, %c0_89] {strides = array<i32: 2, 2, 1>} : memref<18x32x16xf32, #tpu.memory_space<vmem>>, vector<8x8x16xf32>
    %c1_90 = arith.constant 1 : index
    %c9_91 = arith.constant 9 : index
    %c0_92 = arith.constant 0 : index
    %46 = tpu.strided_load %arg7[%c1_90, %c9_91, %c0_92] {strides = array<i32: 2, 2, 1>} : memref<18x32x16xf32, #tpu.memory_space<vmem>>, vector<8x8x16xf32>
    %c2_93 = arith.constant 2 : index
    %c7_94 = arith.constant 7 : index
    %c0_95 = arith.constant 0 : index
    %47 = tpu.strided_load %arg7[%c2_93, %c7_94, %c0_95] {strides = array<i32: 2, 2, 1>} : memref<18x32x16xf32, #tpu.memory_space<vmem>>, vector<8x8x16xf32>
    %c2_96 = arith.constant 2 : index
    %c8_97 = arith.constant 8 : index
    %c0_98 = arith.constant 0 : index
    %48 = tpu.strided_load %arg7[%c2_96, %c8_97, %c0_98] {strides = array<i32: 2, 2, 1>} : memref<18x32x16xf32, #tpu.memory_space<vmem>>, vector<8x8x16xf32>
    %c2_99 = arith.constant 2 : index
    %c9_100 = arith.constant 9 : index
    %c0_101 = arith.constant 0 : index
    %49 = tpu.strided_load %arg7[%c2_99, %c9_100, %c0_101] {strides = array<i32: 2, 2, 1>} : memref<18x32x16xf32, #tpu.memory_space<vmem>>, vector<8x8x16xf32>
    %50 = tpu.concatenate %41, %42, %43, %44, %45, %46, %47, %48, %49 in 2 : vector<8x8x16xf32>, vector<8x8x16xf32>, vector<8x8x16xf32>, vector<8x8x16xf32>, vector<8x8x16xf32>, vector<8x8x16xf32>, vector<8x8x16xf32>, vector<8x8x16xf32>, vector<8x8x16xf32> -> vector<8x8x144xf32>
    %51 = vector.shape_cast %50 : vector<8x8x144xf32> to vector<64x144xf32>
    %c0_102 = arith.constant 0 : index
    %c0_103 = arith.constant 0 : index
    %52 = vector.load %arg4[%c0_102, %c0_103] : memref<144x16xf32, #tpu.memory_space<vmem>>, vector<144x16xf32>
    %cst_104 = arith.constant dense<0.000000e+00> : vector<64x16xf32>
    %53 = tpu.matmul %51, %52, %cst_104 {dimension_numbers = #tpu.dot_dimension_numbers<[1], [0], [0], [1], [0, 0, 1, 1], [], []>} : vector<64x144xf32>, vector<144x16xf32>, vector<64x16xf32> -> vector<64x16xf32>
    %c0_105 = arith.constant 0 : index
    %c0_106 = arith.constant 0 : index
    %54 = vector.load %arg5[%c0_105, %c0_106] : memref<8x16xf32, #tpu.memory_space<vmem>>, vector<8x16xf32>
    %cst_107 = arith.constant dense<0.000000e+00> : vector<64x16xf32>
    %55 = tpu.matmul %6, %54, %cst_107 {dimension_numbers = #tpu.dot_dimension_numbers<[1], [0], [0], [1], [0, 0, 1, 1], [], []>} : vector<64x8xf32>, vector<8x16xf32>, vector<64x16xf32> -> vector<64x16xf32>
    %56 = arith.addf %53, %55 : vector<64x16xf32>
    %c0_108 = arith.constant 0 : index
    %c0_109 = arith.constant 0 : index
    %c0_110 = arith.constant 0 : index
    %57 = vector.load %arg6[%c0_108, %c0_109, %c0_110] : memref<1x64x16xf32, #tpu.memory_space<vmem>>, vector<1x64x16xf32>
    %58 = vector.shape_cast %57 : vector<1x64x16xf32> to vector<64x16xf32>
    %59 = vector.shape_cast %56 : vector<64x16xf32> to vector<1x64x16xf32>
    tpu.vector_store %arg6[%c0_108, %c0_109, %c0_110], %59 {strides = array<i32>} : memref<1x64x16xf32, #tpu.memory_space<vmem>>, vector<1x64x16xf32>,
    return
  }
  func.func @transform_0(%arg0: i32) -> (i32, i32, i32, i32) {
    %c0_i32 = arith.constant 0 : i32
    %c0_i32_0 = arith.constant 0 : i32
    %c0_i32_1 = arith.constant 0 : i32
    %c0_i32_2 = arith.constant 0 : i32
    return %arg0, %c0_i32, %c0_i32_0, %c0_i32_1 : i32, i32, i32, i32
  }
  func.func @transform_1(%arg0: i32) -> (i32, i32) {
    %c0_i32 = arith.constant 0 : i32
    %c0_i32_0 = arith.constant 0 : i32
    %c0_i32_1 = arith.constant 0 : i32
    return %c0_i32, %c0_i32_0 : i32, i32
  }
  func.func @transform_2(%arg0: i32) -> (i32, i32) {
    %c0_i32 = arith.constant 0 : i32
    %c0_i32_0 = arith.constant 0 : i32
    %c0_i32_1 = arith.constant 0 : i32
    return %c0_i32, %c0_i32_0 : i32, i32
  }
  func.func @transform_3(%arg0: i32) -> (i32, i32) {
    %c0_i32 = arith.constant 0 : i32
    %c0_i32_0 = arith.constant 0 : i32
    %c0_i32_1 = arith.constant 0 : i32
    return %c0_i32, %c0_i32_0 : i32, i32
  }
  func.func @transform_4(%arg0: i32) -> (i32, i32) {
    %c0_i32 = arith.constant 0 : i32
    %c0_i32_0 = arith.constant 0 : i32
    %c0_i32_1 = arith.constant 0 : i32
    return %c0_i32, %c0_i32_0 : i32, i32
  }
  func.func @transform_5(%arg0: i32) -> (i32, i32, i32) {
    %c0_i32 = arith.constant 0 : i32
    %c0_i32_0 = arith.constant 0 : i32
    %c0_i32_1 = arith.constant 0 : i32
    return %arg0, %c0_i32, %c0_i32_0 : i32, i32, i32
  }
}

</mosaic_0001>

<bundles_post_ra>
// kernel: tpu_custom_call.1
= control target key start
LH: loop header
LB: loop body
LE: loop exit
PB: predicated region body
PF: predicated region fallthrough
CT: control target
= control target key end

     0   :  { %s6021_s18 = smov 0   ;;  %s8422_s0 = inlined_call_operand.vmem [shape: f32[2,16,16,8], index: 0, kind: input, shape index: {}]   ;;  %s8423_s1 = inlined_call_operand.vmem [shape: f32[72,16], index: 1, kind: input, shape index: {}]   ;;  %s8424_s2 = inlined_call_operand.vmem [shape: f32[144,16], index: 2, kind: input, shape index: {}]   ;;  %s8425_s3 = inlined_call_operand.vmem [shape: f32[144,16], index: 3, kind: input, shape index: {}]   ;;  %s8426_s4 = inlined_call_operand.vmem [shape: f32[8,16], index: 4, kind: input, shape index: {}]   ;;  %s8427_s5 = inlined_call_operand.vmem [shape: f32[2,64,16], index: 5, kind: output, shape index: {}]  }
   0x1 LB: > { %s4968_s19 = sadd.s32 4294967295, %s5976_s18   ;;  %p4972_p0 = scmp.ge.s32.totalorder %s5976_s18, 1  ;;  %s5976_s18 = sphi %s6021_s18, %s15_s18  }
   0x2   : > { %p187_p1 = scmp.lt.s32.totalorder %s5976_s18, 3 }
   0x4   : > { %p188_p2 = pnand %p4972_p0, %p187_p1 }
   0x6   : > { %191 = sbr.rel (%p188_p2) target bundleno = 1598 (0x63e), region = 40 }
   0xd   : > { %vm225_vm0 = vcmask 130048   ;;  %p6031_p3 = scmp.lt.s32.totalorder %s4968_s19, 1  ;;  %v5978_v0 = vmov 0.0   ;;  %vm331_vm1 = vcmask 64512   ;;  %s5979_s25 = smov 8   ;;  %vm1757_vm2 = vcmask 195584  }
   0xe   : > { %227 = vst.msk [vmem:[#allocation2 + $0x8] sm:$0xff] %vm225_vm0, %v5978_v0  ;;  %226 = vst.msk [vmem:[#allocation2] sm:$0xff] %vm225_vm0, %v5978_v0  ;;  %s5980_s26 = smov 16   ;;  %s5981_s6 = smov 24   ;;  %vm1790_vm3 = vcmask 261120   ;;  %vm1823_vm4 = vcmask 326656  }
   0xf   : > { %228 = vst.msk [vmem:[#allocation2 + $0x10] sm:$0xff] %vm225_vm0, %v5978_v0  ;;  %229 = vst.msk [vmem:[#allocation2 + $0x18] sm:$0xff] %vm225_vm0, %v5978_v0  ;;  %s8497_s19 = smov (!%p6031_p3, %s4968_s19), 1  ;;  %s5982_s11 = smov 32   ;;  %vm1856_vm5 = vcmask 392192   ;;  %vm1889_vm6 = vcmask 457728  }
  0x10   : > { %230 = vst.msk [vmem:[#allocation2 + $0x20] sm:$0xff] %vm225_vm0, %v5978_v0  ;;  %231 = vst.msk [vmem:[#allocation2 + $0x28] sm:$0xff] %vm225_vm0, %v5978_v0  ;;  %s5059_s21 = sshll.u32 %s8497_s19, 8  ;;  %s5983_s16 = smov 40   ;;  %vm1922_vm7 = vcmask 523264   ;;  %vm1964_vm8 = vcmask 588800  }
  0x11   : > { %232 = vst.msk [vmem:[#allocation2 + $0x30] sm:$0xff] %vm225_vm0, %v5978_v0  ;;  %233 = vst.msk [vmem:[#allocation2 + $0x38] sm:$0xff] %vm225_vm0, %v5978_v0  ;;  %s6189_s24 = scalar_lea.vmem %s8422_s0, %s5059_s21  ;;  %s5984_s23 = smov 48   ;;  %vm3662_vm9 = vcmask 654336   ;;  %vm3695_vm10 = vcmask 785408   ;;  %vm3728_vm11 = vcmask 916480  }
  0x12   : > { %234 = vst.msk [vmem:[#allocation2 + $0x40] sm:$0xff] %vm225_vm0, %v5978_v0  ;;  %235 = vst.msk [vmem:[#allocation2 + $0x48] sm:$0xff] %vm225_vm0, %v5978_v0  ;;  %v298_v1 = vld [vmem:[%s6189_s24] sm:$0xff]  ;;  %v300_v2 = vld [vmem:[%s6189_s24 + $0x10] sm:$0xff]  ;;  %s5985_s28 = smov 56   ;;  %s5986_s29 = smov 64  }
  0x13   : > { %236 = vst.msk [vmem:[#allocation2 + $0x50] sm:$0xff] %vm225_vm0, %v5978_v0  ;;  %237 = vst.msk [vmem:[#allocation2 + $0x58] sm:$0xff] %vm225_vm0, %v5978_v0  ;;  %v299_v3 = vld [vmem:[%s6189_s24 + $0x8] sm:$0xff]  ;;  %v302_v4 = vld [vmem:[%s6189_s24 + $0x20] sm:$0xff]  ;;  %s5988_s30 = smov 80   ;;  %s5989_s7 = smov 112  }
  0x14   : > { %238 = vst.msk [vmem:[#allocation2 + $0x60] sm:$0xff] %vm225_vm0, %v5978_v0  ;;  %239 = vst.msk [vmem:[#allocation2 + $0x68] sm:$0xff] %vm225_vm0, %v5978_v0  ;;  %v301_v5 = vld [vmem:[%s6189_s24 + $0x18] sm:$0xff]  ;;  %v304_v6 = vld [vmem:[%s6189_s24 + $0x30] sm:$0xff]  ;;  %s5990_s8 = smov 96  }
  0x15   : > { %240 = vst.msk [vmem:[#allocation2 + $0x70] sm:$0xff] %vm225_vm0, %v5978_v0  ;;  %241 = vst.msk [vmem:[#allocation2 + $0x78] sm:$0xff] %vm225_vm0, %v5978_v0  ;;  %v412_v7 = vld [vmem:[#allocation2 + $0x8] sm:$0xff]  ;;  %v306_v10 = vld [vmem:[%s6189_s24 + $0x40] sm:$0xff] }
  0x16   : > { %242 = vst.msk [vmem:[#allocation2 + $0x80] sm:$0xff] %vm225_vm0, %v5978_v0  ;;  %243 = vst.msk [vmem:[#allocation2 + $0x88] sm:$0xff] %vm225_vm0, %v5978_v0  ;;  %v413_v8 = vld [vmem:[#allocation2 + $0x10] sm:$0xff]  ;;  %v303_v9 = vld [vmem:[%s6189_s24 + $0x28] sm:$0xff]  ;;  %701 = vrot.lane.b32.xlu0 %v412_v7, %s5979_s25 }
  0x17   : > { %244 = vst.msk [vmem:[#allocation2 + $0x90] sm:$0xff] %vm225_vm0, %v5978_v0  ;;  %245 = vst.msk [vmem:[#allocation2 + $0x98] sm:$0xff] %vm225_vm0, %v5978_v0  ;;  %v305_v11 = vld [vmem:[%s6189_s24 + $0x38] sm:$0xff]  ;;  %v308_v12 = vld [vmem:[%s6189_s24 + $0x50] sm:$0xff] }
  0x18   : > { %246 = vst.msk [vmem:[#allocation2 + $0xa0] sm:$0xff] %vm225_vm0, %v5978_v0  ;;  %247 = vst.msk [vmem:[#allocation2 + $0xa8] sm:$0xff] %vm225_vm0, %v5978_v0  ;;  %v307_v13 = vld [vmem:[%s6189_s24 + $0x48] sm:$0xff]  ;;  %v310_v14 = vld [vmem:[%s6189_s24 + $0x60] sm:$0xff] }
  0x19   : > { %248 = vst.msk [vmem:[#allocation2 + $0xb0] sm:$0xff] %vm225_vm0, %v5978_v0  ;;  %249 = vst.msk [vmem:[#allocation2 + $0xb8] sm:$0xff] %vm225_vm0, %v5978_v0  ;;  %v309_v15 = vld [vmem:[%s6189_s24 + $0x58] sm:$0xff]  ;;  %v312_v16 = vld [vmem:[%s6189_s24 + $0x70] sm:$0xff] }
  0x1a   : > { %250 = vst.msk [vmem:[#allocation2 + $0xc0] sm:$0xff] %vm225_vm0, %v5978_v0  ;;  %251 = vst.msk [vmem:[#allocation2 + $0xc8] sm:$0xff] %vm225_vm0, %v5978_v0  ;;  %v311_v17 = vld [vmem:[%s6189_s24 + $0x68] sm:$0xff]  ;;  %v314_v18 = vld [vmem:[%s6189_s24 + $0x80] sm:$0xff]  ;;  %703 = vrot.lane.b32.xlu0 %v413_v8, %s5979_s25 }
  0x1b   : > { %252 = vst.msk [vmem:[#allocation2 + $0xd0] sm:$0xff] %vm225_vm0, %v5978_v0  ;;  %253 = vst.msk [vmem:[#allocation2 + $0xd8] sm:$0xff] %vm225_vm0, %v5978_v0  ;;  %v313_v19 = vld [vmem:[%s6189_s24 + $0x78] sm:$0xff]  ;;  %v316_v20 = vld [vmem:[%s6189_s24 + $0x90] sm:$0xff] }
  0x1c   : > { %254 = vst.msk [vmem:[#allocation2 + $0xe0] sm:$0xff] %vm225_vm0, %v5978_v0  ;;  %255 = vst.msk [vmem:[#allocation2 + $0xe8] sm:$0xff] %vm225_vm0, %v5978_v0  ;;  %v315_v21 = vld [vmem:[%s6189_s24 + $0x88] sm:$0xff]  ;;  %v318_v22 = vld [vmem:[%s6189_s24 + $0xa0] sm:$0xff] }
  0x1d   : > { %256 = vst.msk [vmem:[#allocation2 + $0xf0] sm:$0xff] %vm225_vm0, %v5978_v0  ;;  %257 = vst.msk [vmem:[#allocation2 + $0xf8] sm:$0xff] %vm225_vm0, %v5978_v0  ;;  %v317_v23 = vld [vmem:[%s6189_s24 + $0x98] sm:$0xff]  ;;  %v320_v24 = vld [vmem:[%s6189_s24 + $0xb0] sm:$0xff] }
  0x1e   : > { %258 = vst.msk [vmem:[#allocation2 + $0x100] sm:$0xff] %vm225_vm0, %v5978_v0  ;;  %259 = vst.msk [vmem:[#allocation2 + $0x108] sm:$0xff] %vm225_vm0, %v5978_v0  ;;  %v319_v32 = vld [vmem:[%s6189_s24 + $0xa8] sm:$0xff]  ;;  %v322_v33 = vld [vmem:[%s6189_s24 + $0xc0] sm:$0xff] }
  0x1f   : > { %260 = vst.msk [vmem:[#allocation2 + $0x110] sm:$0xff] %vm225_vm0, %v5978_v0  ;;  %261 = vst.msk [vmem:[#allocation2 + $0x118] sm:$0xff] %vm225_vm0, %v5978_v0  ;;  %v321_v34 = vld [vmem:[%s6189_s24 + $0xb8] sm:$0xff]  ;;  %v324_v35 = vld [vmem:[%s6189_s24 + $0xd0] sm:$0xff] }
  0x20   : > { %262 = vst.msk [vmem:[#allocation2 + $0x120] sm:$0xff] %vm225_vm0, %v5978_v0  ;;  %263 = vst.msk [vmem:[#allocation2 + $0x128] sm:$0xff] %vm225_vm0, %v5978_v0  ;;  %v323_v36 = vld [vmem:[%s6189_s24 + $0xc8] sm:$0xff]  ;;  %v326_v37 = vld [vmem:[%s6189_s24 + $0xe0] sm:$0xff] }
  0x21   : > { %264 = vst.msk [vmem:[#allocation2 + $0x130] sm:$0xff] %vm225_vm0, %v5978_v0  ;;  %265 = vst.msk [vmem:[#allocation2 + $0x138] sm:$0xff] %vm225_vm0, %v5978_v0  ;;  %v325_v38 = vld [vmem:[%s6189_s24 + $0xd8] sm:$0xff]  ;;  %v327_v39 = vld [vmem:[%s6189_s24 + $0xe8] sm:$0xff] }
  0x22   : > { %266 = vst.msk [vmem:[#allocation2 + $0x140] sm:$0xff] %vm225_vm0, %v5978_v0  ;;  %267 = vst.msk [vmem:[#allocation2 + $0x148] sm:$0xff] %vm225_vm0, %v5978_v0  ;;  %v444_v62 = vld [vmem:[#allocation2 + $0x9] sm:$0xff] }
  0x23   : > { %268 = vst.msk [vmem:[#allocation2 + $0x150] sm:$0xff] %vm225_vm0, %v5978_v0  ;;  %269 = vst.msk [vmem:[#allocation2 + $0x158] sm:$0xff] %vm225_vm0, %v5978_v0 }
  0x24   : > { %270 = vst.msk [vmem:[#allocation2 + $0x160] sm:$0xff] %vm225_vm0, %v5978_v0  ;;  %271 = vst.msk [vmem:[#allocation2 + $0x168] sm:$0xff] %vm225_vm0, %v5978_v0 }
  0x25   : > { %272 = vst.msk [vmem:[#allocation2 + $0x170] sm:$0xff] %vm225_vm0, %v5978_v0  ;;  %273 = vst.msk [vmem:[#allocation2 + $0x178] sm:$0xff] %vm225_vm0, %v5978_v0 }
  0x26   : > { %274 = vst.msk [vmem:[#allocation2 + $0x180] sm:$0xff] %vm225_vm0, %v5978_v0  ;;  %275 = vst.msk [vmem:[#allocation2 + $0x188] sm:$0xff] %vm225_vm0, %v5978_v0 }
  0x27   : > { %276 = vst.msk [vmem:[#allocation2 + $0x190] sm:$0xff] %vm225_vm0, %v5978_v0  ;;  %277 = vst.msk [vmem:[#allocation2 + $0x198] sm:$0xff] %vm225_vm0, %v5978_v0 }
  0x28   : > { %278 = vst.msk [vmem:[#allocation2 + $0x1a0] sm:$0xff] %vm225_vm0, %v5978_v0  ;;  %279 = vst.msk [vmem:[#allocation2 + $0x1a8] sm:$0xff] %vm225_vm0, %v5978_v0 }
  0x29   : > { %280 = vst.msk [vmem:[#allocation2 + $0x1b0] sm:$0xff] %vm225_vm0, %v5978_v0  ;;  %281 = vst.msk [vmem:[#allocation2 + $0x1b8] sm:$0xff] %vm225_vm0, %v5978_v0 }
  0x2a   : > { %282 = vst.msk [vmem:[#allocation2 + $0x1c0] sm:$0xff] %vm225_vm0, %v5978_v0  ;;  %283 = vst.msk [vmem:[#allocation2 + $0x1c8] sm:$0xff] %vm225_vm0, %v5978_v0 }
  0x2b   : > { %284 = vst.msk [vmem:[#allocation2 + $0x1d0] sm:$0xff] %vm225_vm0, %v5978_v0  ;;  %285 = vst.msk [vmem:[#allocation2 + $0x1d8] sm:$0xff] %vm225_vm0, %v5978_v0 }
  0x2c   : > { %286 = vst.msk [vmem:[#allocation2 + $0x1e0] sm:$0xff] %vm225_vm0, %v5978_v0  ;;  %287 = vst.msk [vmem:[#allocation2 + $0x1e8] sm:$0xff] %vm225_vm0, %v5978_v0 }
  0x2d   : > { %288 = vst.msk [vmem:[#allocation2 + $0x1f0] sm:$0xff] %vm225_vm0, %v5978_v0  ;;  %289 = vst.msk [vmem:[#allocation2 + $0x1f8] sm:$0xff] %vm225_vm0, %v5978_v0 }
  0x2e   : > { %290 = vst.msk [vmem:[#allocation2 + $0x200] sm:$0xff] %vm225_vm0, %v5978_v0  ;;  %291 = vst.msk [vmem:[#allocation2 + $0x208] sm:$0xff] %vm225_vm0, %v5978_v0 }
  0x2f   : > { %292 = vst.msk [vmem:[#allocation2 + $0x210] sm:$0xff] %vm225_vm0, %v5978_v0  ;;  %293 = vst.msk [vmem:[#allocation2 + $0x218] sm:$0xff] %vm225_vm0, %v5978_v0 }
  0x30   : > { %294 = vst.msk [vmem:[#allocation2 + $0x220] sm:$0xff] %vm225_vm0, %v5978_v0  ;;  %295 = vst.msk [vmem:[#allocation2 + $0x228] sm:$0xff] %vm225_vm0, %v5978_v0 }
  0x31   : > { %296 = vst.msk [vmem:[#allocation2 + $0x230] sm:$0xff] %vm225_vm0, %v5978_v0  ;;  %297 = vst.msk [vmem:[#allocation2 + $0x238] sm:$0xff] %vm225_vm0, %v5978_v0 }
  0x32   : > { %332 = vst.msk [vmem:[#allocation2 + $0x28] sm:$0xff] %vm331_vm1, %v298_v1  ;;  %334 = vst.msk [vmem:[#allocation2 + $0x48] sm:$0xff] %vm331_vm1, %v300_v2  ;;  %v445_v1 = vld [vmem:[#allocation2 + $0x11] sm:$0xff] }
  0x33   : > { %333 = vst.msk [vmem:[#allocation2 + $0x30] sm:$0xff] %vm331_vm1, %v299_v3  ;;  %336 = vst.msk [vmem:[#allocation2 + $0x68] sm:$0xff] %vm331_vm1, %v302_v4 }
  0x34   : > { %335 = vst.msk [vmem:[#allocation2 + $0x50] sm:$0xff] %vm331_vm1, %v301_v5  ;;  %338 = vst.msk [vmem:[#allocation2 + $0x88] sm:$0xff] %vm331_vm1, %v304_v6 }
  0x35   : > { %337 = vst.msk [vmem:[#allocation2 + $0x70] sm:$0xff] %vm331_vm1, %v303_v9  ;;  %340 = vst.msk [vmem:[#allocation2 + $0xa8] sm:$0xff] %vm331_vm1, %v306_v10 }
  0x36   : > { %339 = vst.msk [vmem:[#allocation2 + $0x90] sm:$0xff] %vm331_vm1, %v305_v11  ;;  %342 = vst.msk [vmem:[#allocation2 + $0xc8] sm:$0xff] %vm331_vm1, %v308_v12 }
  0x37   : > { %341 = vst.msk [vmem:[#allocation2 + $0xb0] sm:$0xff] %vm331_vm1, %v307_v13  ;;  %344 = vst.msk [vmem:[#allocation2 + $0xe8] sm:$0xff] %vm331_vm1, %v310_v14 }
  0x38   : > { %343 = vst.msk [vmem:[#allocation2 + $0xd0] sm:$0xff] %vm331_vm1, %v309_v15  ;;  %346 = vst.msk [vmem:[#allocation2 + $0x108] sm:$0xff] %vm331_vm1, %v312_v16 }
  0x39   : > { %345 = vst.msk [vmem:[#allocation2 + $0xf0] sm:$0xff] %vm331_vm1, %v311_v17  ;;  %348 = vst.msk [vmem:[#allocation2 + $0x128] sm:$0xff] %vm331_vm1, %v314_v18  ;;  %v6234_v25 = vld [vmem:[#allocation2 + $0x28] sm:$0xff] }
  0x3a   : > { %347 = vst.msk [vmem:[#allocation2 + $0x110] sm:$0xff] %vm331_vm1, %v313_v19  ;;  %350 = vst.msk [vmem:[#allocation2 + $0x148] sm:$0xff] %vm331_vm1, %v316_v20  ;;  %v6236_v26 = vld [vmem:[#allocation2 + $0x48] sm:$0xff]  ;;  %705 = vrot.lane.b32.xlu1 %v6234_v25, %s5979_s25  ;;  %v6243_v27 = vld [vmem:[#allocation2 + $0x30] sm:$0xff] }
  0x3b   : > { %349 = vst.msk [vmem:[#allocation2 + $0x130] sm:$0xff] %vm331_vm1, %v315_v21  ;;  %352 = vst.msk [vmem:[#allocation2 + $0x168] sm:$0xff] %vm331_vm1, %v318_v22  ;;  %709 = vrot.lane.b32.xlu0 %v6236_v26, %s5979_s25  ;;  %v6247_v28 = vld [vmem:[#allocation2 + $0x68] sm:$0xff]  ;;  %v6251_v29 = vld [vmem:[#allocation2 + $0x50] sm:$0xff] }
  0x3c   : > { %351 = vst.msk [vmem:[#allocation2 + $0x150] sm:$0xff] %vm331_vm1, %v317_v23  ;;  %354 = vst.msk [vmem:[#allocation2 + $0x188] sm:$0xff] %vm331_vm1, %v320_v24  ;;  %v6255_v30 = vld [vmem:[#allocation2 + $0x88] sm:$0xff]  ;;  %v6257_v31 = vld [vmem:[#allocation2 + $0x70] sm:$0xff] }
  0x3d   : > { %353 = vst.msk [vmem:[#allocation2 + $0x170] sm:$0xff] %vm331_vm1, %v319_v32  ;;  %356 = vst.msk [vmem:[#allocation2 + $0x1a8] sm:$0xff] %vm331_vm1, %v322_v33  ;;  %v6277_v40 = vld [vmem:[#allocation2 + $0xa8] sm:$0xff]  ;;  %v6283_v41 = vld [vmem:[#allocation2 + $0x90] sm:$0xff] }
  0x3e   : > { %707 = vrot.lane.b32.xlu1 %v6243_v27, %s5979_s25  ;;  %355 = vst.msk [vmem:[#allocation2 + $0x190] sm:$0xff] %vm331_vm1, %v321_v34  ;;  %358 = vst.msk [vmem:[#allocation2 + $0x1c8] sm:$0xff] %vm331_vm1, %v324_v35  ;;  %v6287_v42 = vld [vmem:[#allocation2 + $0xc8] sm:$0xff]  ;;  %v6291_v43 = vld [vmem:[#allocation2 + $0xb0] sm:$0xff] }
  0x3f   : > { %713 = vrot.lane.b32.xlu0 %v6247_v28, %s5979_s25  ;;  %357 = vst.msk [vmem:[#allocation2 + $0x1b0] sm:$0xff] %vm331_vm1, %v323_v36  ;;  %360 = vst.msk [vmem:[#allocation2 + $0x1e8] sm:$0xff] %vm331_vm1, %v326_v37  ;;  %v6295_v44 = vld [vmem:[#allocation2 + $0xe8] sm:$0xff]  ;;  %v6299_v45 = vld [vmem:[#allocation2 + $0xd0] sm:$0xff] }
  0x40   : > { %359 = vst.msk [vmem:[#allocation2 + $0x1d0] sm:$0xff] %vm331_vm1, %v325_v38  ;;  %361 = vst.msk [vmem:[#allocation2 + $0x1f0] sm:$0xff] %vm331_vm1, %v327_v39  ;;  %v6303_v46 = vld [vmem:[#allocation2 + $0x108] sm:$0xff]  ;;  %v6307_v47 = vld [vmem:[#allocation2 + $0xf0] sm:$0xff] }
  0x41   : > { %v430_v48 = vld [vmem:[#allocation2 + $0x128] sm:$0xff]  ;;  %v6313_v49 = vld [vmem:[#allocation2 + $0x110] sm:$0xff]  ;;  %v1955_v20 = vld [vmem:[%s8423_s1] sm:$0xff] }
  0x42   : > { %711 = vrot.lane.b32.xlu1 %v6251_v29, %s5979_s25  ;;  %v432_v50 = vld [vmem:[#allocation2 + $0x148] sm:$0xff]  ;;  %v431_v51 = vld [vmem:[#allocation2 + $0x130] sm:$0xff]  ;;  %v1958_v32 = vld [vmem:[%s8423_s1 + $0x18] sm:$0xff] }
  0x43   : > { %717 = vrot.lane.b32.xlu0 %v6255_v30, %s5979_s25  ;;  %v434_v52 = vld [vmem:[#allocation2 + $0x168] sm:$0xff]  ;;  %v433_v53 = vld [vmem:[#allocation2 + $0x150] sm:$0xff]  ;;  %v1959_v34 = vld [vmem:[%s8423_s1 + $0x20] sm:$0xff] }
  0x44   : > { %v436_v54 = vld [vmem:[#allocation2 + $0x188] sm:$0xff]  ;;  %v435_v55 = vld [vmem:[#allocation2 + $0x170] sm:$0xff]  ;;  %v1962_v39 = vld [vmem:[%s8423_s1 + $0x38] sm:$0xff] }
  0x45   : > { %v438_v56 = vld [vmem:[#allocation2 + $0x1a8] sm:$0xff]  ;;  %v437_v57 = vld [vmem:[#allocation2 + $0x190] sm:$0xff] }
  0x46   : > { %715 = vrot.lane.b32.xlu1 %v6257_v31, %s5979_s25  ;;  %v440_v58 = vld [vmem:[#allocation2 + $0x1c8] sm:$0xff]  ;;  %v439_v59 = vld [vmem:[#allocation2 + $0x1b0] sm:$0xff] }
  0x47   : > { %721 = vrot.lane.b32.xlu0 %v6277_v40, %s5979_s25  ;;  %v442_v60 = vld [vmem:[#allocation2 + $0x1e8] sm:$0xff]  ;;  %v441_v61 = vld [vmem:[#allocation2 + $0x1d0] sm:$0xff] }
  0x48   : > { %v443_v63 = vld [vmem:[#allocation2 + $0x1f0] sm:$0xff]  ;;  %v6396_v18 = vld [vmem:[#allocation2 + $0x27] sm:$0xff] }
  0x49   : > { %v446_v0 = vld [vmem:[#allocation2 + $0x29] sm:$0xff]  ;;  %v6336_v3 = vld [vmem:[#allocation2 + $0x31] sm:$0xff] }
  0x4a   : > { %719 = vrot.lane.b32.xlu1 %v6283_v41, %s5979_s25  ;;  %v6333_v2 = vld [vmem:[#allocation2 + $0x49] sm:$0xff]  ;;  %v6344_v5 = vld [vmem:[#allocation2 + $0x51] sm:$0xff] }
  0x4b   : > { %725 = vrot.lane.b32.xlu0 %v6287_v42, %s5979_s25  ;;  %v6340_v4 = vld [vmem:[#allocation2 + $0x69] sm:$0xff]  ;;  %v6352_v7 = vld [vmem:[#allocation2 + $0x71] sm:$0xff] }
  0x4c   : > { %v6348_v6 = vld [vmem:[#allocation2 + $0x89] sm:$0xff]  ;;  %v6360_v9 = vld [vmem:[#allocation2 + $0x91] sm:$0xff] }
  0x4d   : > { %v6356_v8 = vld [vmem:[#allocation2 + $0xa9] sm:$0xff]  ;;  %v6368_v11 = vld [vmem:[#allocation2 + $0xb1] sm:$0xff] }
  0x4e   : > { %723 = vrot.lane.b32.xlu1 %v6291_v43, %s5979_s25  ;;  %v6364_v10 = vld [vmem:[#allocation2 + $0xc9] sm:$0xff]  ;;  %v6376_v13 = vld [vmem:[#allocation2 + $0xd1] sm:$0xff] }
  0x4f   : > { %729 = vrot.lane.b32.xlu0 %v6295_v44, %s5979_s25  ;;  %v6372_v12 = vld [vmem:[#allocation2 + $0xe9] sm:$0xff]  ;;  %v6384_v15 = vld [vmem:[#allocation2 + $0xf1] sm:$0xff] }
  0x50   : > { %v6380_v14 = vld [vmem:[#allocation2 + $0x109] sm:$0xff]  ;;  %v6392_v17 = vld [vmem:[#allocation2 + $0x111] sm:$0xff] }
  0x51   : > { %v6388_v16 = vld [vmem:[#allocation2 + $0x129] sm:$0xff]  ;;  %v6400_v19 = vld [vmem:[#allocation2 + $0x131] sm:$0xff] }
  0x52   : > { %727 = vrot.lane.b32.xlu1 %v6299_v45, %s5979_s25  ;;  %v1956_v21 = vld [vmem:[%s8423_s1 + $0x8] sm:$0xff]  ;;  %v1957_v24 = vld [vmem:[%s8423_s1 + $0x10] sm:$0xff] }
  0x53   : > { %733 = vrot.lane.b32.xlu0 %v6303_v46, %s5979_s25  ;;  %v5191_v22 = vpack.c.bf16 %v1956_v21, %v1955_v20  ;;  %v6412_v23 = vld [vmem:[#allocation2 + $0x2f] sm:$0xff]  ;;  %v5195_v33 = vpack.c.bf16 %v1958_v32, %v1957_v24  ;;  %v6431_v37 = vld [vmem:[#allocation2 + $0x47] sm:$0xff] }
  0x54   : > { %v1960_v35 = vld [vmem:[%s8423_s1 + $0x28] sm:$0xff]  ;;  %v1961_v38 = vld [vmem:[%s8423_s1 + $0x30] sm:$0xff] }
  0x55   : > { %5192 = vmatprep.subr.bf16.mxu0 %v5191_v22  ;;  %v5199_v36 = vpack.c.bf16 %v1960_v35, %v1959_v34  ;;  %v6560_v35 = vld [vmem:[#allocation2 + $0x8f] sm:$0xff] }
  0x56   : > { %731 = vrot.lane.b32.xlu1 %v6307_v47, %s5979_s25  ;;  %5194 = vmatpush3.bf16.msra.mxu0 %v5191_v22 }
  0x57   : > { %737 = vrot.lane.b32.xlu0 %v430_v48, %s5979_s25  ;;  %5196 = vmatprep.subr.bf16.mxu0 %v5195_v33  ;;  %v5203_v48 = vpack.c.bf16 %v1962_v39, %v1961_v38 }
  0x5a   : > { %735 = vrot.lane.b32.xlu1 %v6313_v49, %s5979_s25  ;;  %5198 = vmatpush3.bf16.msra.mxu0 %v5195_v33 }
  0x5b   : > { %741 = vrot.lane.b32.xlu0 %v432_v50, %s5979_s25  ;;  %5200 = vmatprep.subr.bf16.mxu0 %v5199_v36  ;;  %v6445_v50 = vld [vmem:[#allocation2 + $0x4f] sm:$0xff] }
  0x5e   : > { %739 = vrot.lane.b32.xlu1 %v431_v51, %s5979_s25  ;;  %5202 = vmatpush3.bf16.msra.mxu0 %v5199_v36 }
  0x5f   : > { %745 = vrot.lane.b32.xlu0 %v434_v52, %s5979_s25  ;;  %5204 = vmatprep.subr.bf16.mxu0 %v5203_v48  ;;  %v1963_v52 = vld [vmem:[%s8423_s1 + $0x40] sm:$0xff] }
  0x62   : > { %743 = vrot.lane.b32.xlu1 %v433_v53, %s5979_s25  ;;  %5206 = vmatpush3.bf16.msra.mxu0 %v5203_v48 }
  0x63   : > { %749 = vrot.lane.b32.xlu0 %v436_v54, %s5979_s25  ;;  %5127 = vmatprep.subr.mxu0 %v1963_v52 }
  0x66   : > { %747 = vrot.lane.b32.xlu1 %v435_v55, %s5979_s25  ;;  %5128 = vmatpush3.msra.mxu0 %v1963_v52 }
  0x67   : > { %753 = vrot.lane.b32.xlu0 %v438_v56, %s5979_s25 }
  0x6a   : > { %751 = vrot.lane.b32.xlu1 %v437_v57, %s5979_s25 }
  0x6b   : > { %757 = vrot.lane.b32.xlu0 %v440_v58, %s5979_s25 }
  0x6e   : > { %755 = vrot.lane.b32.xlu1 %v439_v59, %s5979_s25 }
  0x6f   : > { %761 = vrot.lane.b32.xlu0 %v442_v60, %s5979_s25 }
  0x72   : > { %759 = vrot.lane.b32.xlu1 %v441_v61, %s5979_s25 }
  0x73   : > { %829 = vrot.lane.b32.xlu0 %v444_v62, %s5980_s26 }
  0x76   : > { %763 = vrot.lane.b32.xlu1 %v443_v63, %s5979_s25  ;;  %v6504_v63 = vld [vmem:[#allocation2 + $0x6f] sm:$0xff] }
  0x77   : > { %833 = vrot.lane.b32.xlu0 %v446_v0, %s5980_s26 }
  0x7a   : > { %831 = vrot.lane.b32.xlu1 %v445_v1, %s5980_s26 }
  0x7b   : > { %837 = vrot.lane.b32.xlu0 %v6333_v2, %s5980_s26 }
  0x7e   : > { %835 = vrot.lane.b32.xlu1 %v6336_v3, %s5980_s26 }
  0x7f   : > { %841 = vrot.lane.b32.xlu0 %v6340_v4, %s5980_s26 }
  0x82   : > { %839 = vrot.lane.b32.xlu1 %v6344_v5, %s5980_s26 }
  0x83   : > { %845 = vrot.lane.b32.xlu0 %v6348_v6, %s5980_s26 }
  0x86   : > { %843 = vrot.lane.b32.xlu1 %v6352_v7, %s5980_s26 }
  0x87   : > { %849 = vrot.lane.b32.xlu0 %v6356_v8, %s5980_s26 }
  0x8a   : > { %847 = vrot.lane.b32.xlu1 %v6360_v9, %s5980_s26 }
  0x8b   : > { %853 = vrot.lane.b32.xlu0 %v6364_v10, %s5980_s26 }
  0x8e   : > { %851 = vrot.lane.b32.xlu1 %v6368_v11, %s5980_s26 }
  0x8f   : > { %857 = vrot.lane.b32.xlu0 %v6372_v12, %s5980_s26 }
  0x92   : > { %855 = vrot.lane.b32.xlu1 %v6376_v13, %s5980_s26 }
  0x93   : > { %861 = vrot.lane.b32.xlu0 %v6380_v14, %s5980_s26 }
  0x96   : > { %859 = vrot.lane.b32.xlu1 %v6384_v15, %s5980_s26 }
  0x97   : > { %865 = vrot.lane.b32.xlu0 %v6388_v16, %s5980_s26 }
  0x9a   : > { %863 = vrot.lane.b32.xlu1 %v6392_v17, %s5980_s26 }
  0x9b   : > { %957 = vrot.lane.b32.xlu0 %v6396_v18, %s5981_s6 }
  0x9e   : > { %867 = vrot.lane.b32.xlu1 %v6400_v19, %s5980_s26 }
  0x9f   : > { %1085 = vrot.lane.b32.xlu0 %v6234_v25, %s5982_s11  ;;  %v6433_v25 = vpop.permute.xlu0 %701 }
  0xa2   : > { %959 = vrot.lane.b32.xlu1 %v6412_v23, %s5981_s6 }
  0xa3   : > { %1213 = vrot.lane.b32.xlu0 %v446_v0, %s5983_s16  ;;  %v6447_v51 = vpop.permute.xlu0 %703 }
  0xa6   : > { %1087 = vrot.lane.b32.xlu1 %v6243_v27, %s5982_s11 }
  0xa7   : > { %1341 = vrot.lane.b32.xlu0 %v6431_v37, %s5984_s23 }
  0xaa   : > { %1215 = vrot.lane.b32.xlu1 %v6336_v3, %s5983_s16 }
  0xab   : > { %1343 = vrot.lane.b32.xlu0 %v6445_v50, %s5984_s23 }
  0xac   : > { %v6453_v27 = vpop.permute.xlu1 %705 }
  0xad   : > { %v6458_v53 = vpop.permute.xlu0 %709 }
  0xae   : > { %961 = vrot.lane.b32.xlu1 %v6431_v37, %s5981_s6 }
  0xaf   : > { %963 = vrot.lane.b32.xlu0 %v6445_v50, %s5981_s6 }
  0xb0   : > { %v6464_v54 = vpop.permute.xlu1 %707 }
  0xb1   : > { %v6466_v55 = vpop.permute.xlu0 %713 }
  0xb2   : > { %1469 = vrot.lane.b32.xlu1 %v6236_v26, %s5985_s28 }
  0xb3   : > { %1471 = vrot.lane.b32.xlu0 %v6251_v29, %s5985_s28 }
  0xb4   : > { %v6472_v56 = vpop.permute.xlu1 %711 }
  0xb5   : > { %v6474_v57 = vpop.permute.xlu0 %717 }
  0xb6   : > { %1089 = vrot.lane.b32.xlu1 %v6236_v26, %s5982_s11  ;;  %v6494_v26 = vld [vmem:[#allocation2 + $0x67] sm:$0xff] }
  0xb7   : > { %1091 = vrot.lane.b32.xlu0 %v6251_v29, %s5982_s11 }
  0xb8   : > { %v6480_v58 = vpop.permute.xlu1 %715 }
  0xb9   : > { %v6482_v59 = vpop.permute.xlu0 %721 }
  0xba   : > { %1597 = vrot.lane.b32.xlu1 %v6333_v2, %s5986_s29 }
  0xbb   : > { %1599 = vrot.lane.b32.xlu0 %v6344_v5, %s5986_s29 }
  0xbc   : > { %v6488_v60 = vpop.permute.xlu1 %719 }
  0xbd   : > { %v6490_v61 = vpop.permute.xlu0 %725 }
  0xbe   : > { %8432 = vst [vmem:[#allocation3_spill] sm:$0xff] %v6490_v61  ;;  %1217 = vrot.lane.b32.xlu1 %v6333_v2, %s5983_s16 }
  0xbf   : > { %1345 = vrot.lane.b32.xlu0 %v6494_v26, %s5984_s23 }
  0xc0   : > { %v6498_v29 = vpop.permute.xlu1 %723 }
  0xc1   : > { %v6500_v62 = vpop.permute.xlu0 %729 }
  0xc2   : > { %8433 = vst [vmem:[#allocation4_spill] sm:$0xff] %v6500_v62  ;;  %1219 = vrot.lane.b32.xlu1 %v6344_v5, %s5983_s16 }
  0xc3   : > { %1347 = vrot.lane.b32.xlu0 %v6504_v63, %s5984_s23 }
  0xc4   : > { %v6508_v0 = vpop.permute.xlu1 %727 }
  0xc5   : > { %8434 = vst [vmem:[#allocation5_spill] sm:$0xff] %v6508_v0  ;;  %v6510_v1 = vpop.permute.xlu0 %733  ;;  %v6698_v0 = vld [vmem:[#allocation2 + $0xef] sm:$0xff] }
  0xc6   : > { %8435 = vst [vmem:[#allocation6_spill] sm:$0xff] %v6510_v1  ;;  %965 = vrot.lane.b32.xlu1 %v6494_v26, %s5981_s6 }
  0xc7   : > { %967 = vrot.lane.b32.xlu0 %v6504_v63, %s5981_s6 }
  0xc8   : > { %v6516_v2 = vpop.permute.xlu1 %731 }
  0xc9   : > { %8436 = vst [vmem:[#allocation7_spill] sm:$0xff] %v6516_v2  ;;  %v6518_v3 = vpop.permute.xlu0 %737 }
  0xca   : > { %8437 = vst [vmem:[#allocation8_spill] sm:$0xff] %v6518_v3  ;;  %1473 = vrot.lane.b32.xlu1 %v6247_v28, %s5985_s28 }
  0xcb   : > { %1475 = vrot.lane.b32.xlu0 %v6257_v31, %s5985_s28 }
  0xcc   : > { %v6524_v5 = vpop.permute.xlu1 %735 }
  0xcd   : > { %8438 = vst [vmem:[#allocation9_spill] sm:$0xff] %v6524_v5  ;;  %v6526_v20 = vpop.permute.xlu0 %741  ;;  %v6664_v5 = vld [vmem:[#allocation2 + $0xcf] sm:$0xff] }
  0xce   : > { %8439 = vst [vmem:[#allocation10_spill] sm:$0xff] %v6526_v20  ;;  %1093 = vrot.lane.b32.xlu1 %v6247_v28, %s5982_s11  ;;  %v6546_v28 = vld [vmem:[#allocation2 + $0x87] sm:$0xff]  ;;  %8462 = vst [vmem:[#allocation33_spill] sm:$0xff] %v6664_v5 }
  0xcf   : > { %1095 = vrot.lane.b32.xlu0 %v6257_v31, %s5982_s11 }
  0xd0   : > { %v6532_v21 = vpop.permute.xlu1 %739 }
  0xd1   : > { %8440 = vst [vmem:[#allocation11_spill] sm:$0xff] %v6532_v21  ;;  %v6534_v22 = vpop.permute.xlu0 %745  ;;  %v6650_v21 = vld [vmem:[#allocation2 + $0xc7] sm:$0xff] }
  0xd2   : > { %8441 = vst [vmem:[#allocation12_spill] sm:$0xff] %v6534_v22  ;;  %1601 = vrot.lane.b32.xlu1 %v6340_v4, %s5986_s29  ;;  %8458 = vst [vmem:[#allocation29_spill] sm:$0xff] %v6650_v21 }
  0xd3   : > { %1603 = vrot.lane.b32.xlu0 %v6352_v7, %s5986_s29 }
  0xd4   : > { %v6540_v24 = vpop.permute.xlu1 %743 }
  0xd5   : > { %8442 = vst [vmem:[#allocation13_spill] sm:$0xff] %v6540_v24  ;;  %v6542_v32 = vpop.permute.xlu0 %749 }
  0xd6   : > { %8443 = vst [vmem:[#allocation14_spill] sm:$0xff] %v6542_v32  ;;  %1221 = vrot.lane.b32.xlu1 %v6340_v4, %s5983_s16 }
  0xd7   : > { %1349 = vrot.lane.b32.xlu0 %v6546_v28, %s5984_s23 }
  0xd8   : > { %v6550_v31 = vpop.permute.xlu1 %747 }
  0xd9   : > { %8444 = vst [vmem:[#allocation15_spill] sm:$0xff] %v6550_v31  ;;  %v6552_v33 = vpop.permute.xlu0 %753 }
  0xda   : > { %8445 = vst [vmem:[#allocation16_spill] sm:$0xff] %v6552_v33  ;;  %1223 = vrot.lane.b32.xlu1 %v6352_v7, %s5983_s16 }
  0xdb   : > { %1477 = vrot.lane.b32.xlu0 %v6255_v30, %s5985_s28 }
  0xdc   : > { %v6558_v34 = vpop.permute.xlu1 %751 }
  0xdd   : > { %8446 = vst [vmem:[#allocation17_spill] sm:$0xff] %v6558_v34  ;;  %v6562_v4 = vpop.permute.xlu0 %757 }
  0xde   : > { %8447 = vst [vmem:[#allocation18_spill] sm:$0xff] %v6562_v4  ;;  %1351 = vrot.lane.b32.xlu1 %v6560_v35, %s5984_s23  ;;  %v6598_v4 = vld [vmem:[#allocation2 + $0xa7] sm:$0xff] }
  0xdf   : > { %1605 = vrot.lane.b32.xlu0 %v6348_v6, %s5986_s29 }
  0xe0   : > { %v6568_v36 = vpop.permute.xlu1 %755 }
  0xe1   : > { %8448 = vst [vmem:[#allocation19_spill] sm:$0xff] %v6568_v36  ;;  %v6570_v38 = vpop.permute.xlu0 %761  ;;  %v6612_v36 = vld [vmem:[#allocation2 + $0xaf] sm:$0xff] }
  0xe2   : > { %8449 = vst [vmem:[#allocation20_spill] sm:$0xff] %v6570_v38  ;;  %1479 = vrot.lane.b32.xlu1 %v6283_v41, %s5985_s28  ;;  %8452 = vst [vmem:[#allocation23_spill] sm:$0xff] %v6612_v36 }
  0xe3   : > { %969 = vrot.lane.b32.xlu0 %v6546_v28, %s5981_s6 }
  0xe4   : > { %v6576_v7 = vpop.permute.xlu1 %759 }
  0xe5   : > { %8450 = vst [vmem:[#allocation21_spill] sm:$0xff] %v6576_v7  ;;  %v6578_v39 = vpop.permute.xlu0 %829 }
  0xe6   : > { %1607 = vrot.lane.b32.xlu1 %v6360_v9, %s5986_s29 }
  0xe7   : > { %1097 = vrot.lane.b32.xlu0 %v6255_v30, %s5982_s11 }
  0xe8   : > { %v6584_v48 = vpop.permute.xlu1 %763 }
  0xe9   : > { %8451 = vst [vmem:[#allocation22_spill] sm:$0xff] %v6584_v48  ;;  %v6586_v52 = vpop.permute.xlu0 %833 }
  0xea   : > { %971 = vrot.lane.b32.xlu1 %v6560_v35, %s5981_s6 }
  0xeb   : > { %1225 = vrot.lane.b32.xlu0 %v6348_v6, %s5983_s16 }
  0xec   : > { %v6592_v38 = vpop.permute.xlu1 %831 }
  0xed   : > { %v6594_v7 = vpop.permute.xlu0 %837 }
  0xee   : > { %1099 = vrot.lane.b32.xlu1 %v6283_v41, %s5982_s11 }
  0xef   : > { %1353 = vrot.lane.b32.xlu0 %v6598_v4, %s5984_s23 }
  0xf0   : > { %v6602_v30 = vpop.permute.xlu1 %835 }
  0xf1   : > { %v6604_v48 = vpop.permute.xlu0 %841 }
  0xf2   : > { %1227 = vrot.lane.b32.xlu1 %v6360_v9, %s5983_s16 }
  0xf3   : > { %1481 = vrot.lane.b32.xlu0 %v6277_v40, %s5985_s28 }
  0xf4   : > { %v6610_v6 = vpop.permute.xlu1 %839 }
  0xf5   : > { %v6614_v41 = vpop.permute.xlu0 %845 }
  0xf6   : > { %1355 = vrot.lane.b32.xlu1 %v6612_v36, %s5984_s23 }
  0xf7   : > { %1609 = vrot.lane.b32.xlu0 %v6356_v8, %s5986_s29 }
  0xf8   : > { %v6620_v33 = vpop.permute.xlu1 %843 }
  0xf9   : > { %v6622_v34 = vpop.permute.xlu0 %849 }
  0xfa   : > { %1483 = vrot.lane.b32.xlu1 %v6291_v43, %s5985_s28 }
  0xfb   : > { %973 = vrot.lane.b32.xlu0 %v6598_v4, %s5981_s6 }
  0xfc   : > { %v6628_v9 = vpop.permute.xlu1 %847 }
  0xfd   : > { %v6630_v32 = vpop.permute.xlu0 %853 }
  0xfe   : > { %8453 = vst [vmem:[#allocation24_spill] sm:$0xff] %v6630_v32  ;;  %1611 = vrot.lane.b32.xlu1 %v6368_v11, %s5986_s29 }
  0xff   : > { %1101 = vrot.lane.b32.xlu0 %v6277_v40, %s5982_s11 }
 0x100   : > { %v6636_v31 = vpop.permute.xlu1 %851 }
 0x101   : > { %8454 = vst [vmem:[#allocation25_spill] sm:$0xff] %v6636_v31  ;;  %v6638_v22 = vpop.permute.xlu0 %857 }
 0x102   : > { %8455 = vst [vmem:[#allocation26_spill] sm:$0xff] %v6638_v22  ;;  %975 = vrot.lane.b32.xlu1 %v6612_v36, %s5981_s6  ;;  %v6686_v22 = vld [vmem:[#allocation2 + $0xe7] sm:$0xff] }
 0x103   : > { %1229 = vrot.lane.b32.xlu0 %v6356_v8, %s5983_s16 }
 0x104   : > { %v6644_v24 = vpop.permute.xlu1 %855 }
 0x105   : > { %8456 = vst [vmem:[#allocation27_spill] sm:$0xff] %v6644_v24  ;;  %v6646_v20 = vpop.permute.xlu0 %861  ;;  %v380_v24 = vld [vmem:[#allocation2 + $0x7] sm:$0xff] }
 0x106   : > { %8457 = vst [vmem:[#allocation28_spill] sm:$0xff] %v6646_v20  ;;  %1103 = vrot.lane.b32.xlu1 %v6291_v43, %s5982_s11 }
 0x107   : > { %1357 = vrot.lane.b32.xlu0 %v6650_v21, %s5984_s23 }
 0x108   : > { %v6654_v40 = vpop.permute.xlu1 %859 }
 0x109   : > { %8459 = vst [vmem:[#allocation30_spill] sm:$0xff] %v6654_v40  ;;  %v6656_v3 = vpop.permute.xlu0 %865 }
 0x10a   : > { %8460 = vst [vmem:[#allocation31_spill] sm:$0xff] %v6656_v3  ;;  %1231 = vrot.lane.b32.xlu1 %v6368_v11, %s5983_s16 }
 0x10b   : > { %1485 = vrot.lane.b32.xlu0 %v6287_v42, %s5985_s28 }
 0x10c   : > { %v6662_v8 = vpop.permute.xlu1 %863 }
 0x10d   : > { %8461 = vst [vmem:[#allocation32_spill] sm:$0xff] %v6662_v8  ;;  %v958_v43 = vpop.permute.xlu0 %957 }
 0x10e   : > { %1359 = vrot.lane.b32.xlu1 %v6664_v5, %s5984_s23 }
 0x10f   : > { %1613 = vrot.lane.b32.xlu0 %v6364_v10, %s5986_s29 }
 0x110   : > { %v6670_v20 = vpop.permute.xlu1 %867 }
 0x111   : > { %8463 = vst [vmem:[#allocation34_spill] sm:$0xff] %v6670_v20  ;;  %v1086_v3 = vpop.permute.xlu0 %1085 }
 0x112   : > { %1487 = vrot.lane.b32.xlu1 %v6299_v45, %s5985_s28 }
 0x113   : > { %977 = vrot.lane.b32.xlu0 %v6650_v21, %s5981_s6 }
 0x114   : > { %v960_v11 = vpop.permute.xlu1 %959 }
 0x115   : > { %v1214_v8 = vpop.permute.xlu0 %1213 }
 0x116   : > { %1615 = vrot.lane.b32.xlu1 %v6376_v13, %s5986_s29 }
 0x117   : > { %1105 = vrot.lane.b32.xlu0 %v6287_v42, %s5982_s11 }
 0x118   : > { %v1088_v1 = vpop.permute.xlu1 %1087 }
 0x119   : > { %v1342_v40 = vpop.permute.xlu0 %1341 }
 0x11a   : > { %979 = vrot.lane.b32.xlu1 %v6664_v5, %s5981_s6  ;;  %v381_v5 = vld [vmem:[#allocation2 + $0xf] sm:$0xff] }
 0x11b   : > { %1233 = vrot.lane.b32.xlu0 %v6364_v10, %s5983_s16  ;;  %v1694_v32 = vsel %vm331_vm1, %v381_v5, %v6447_v51 }
 0x11c   : > { %v1216_v20 = vpop.permute.xlu1 %1215  ;;  %v1726_v61 = vsel %vm225_vm0, %v1694_v32, %v6592_v38 }
 0x11d   : > { %v1344_v2 = vpop.permute.xlu0 %1343  ;;  %v1759_v36 = vsel %vm1757_vm2, %v1726_v61, %v960_v11  ;;  %v6740_v11 = vld [vmem:[#allocation2 + $0x107] sm:$0xff] }
 0x11e   : > { %1107 = vrot.lane.b32.xlu1 %v6299_v45, %s5982_s11  ;;  %v1693_v45 = vsel %vm331_vm1, %v380_v24, %v6433_v25  ;;  %v1792_v5 = vsel %vm1790_vm3, %v1759_v36, %v1088_v1 }
 0x11f   : > { %1361 = vrot.lane.b32.xlu0 %v6686_v22, %s5984_s23 }
 0x120   : > { %v6690_v62 = vpop.permute.xlu1 %961 }
 0x121   : > { %v6692_v42 = vpop.permute.xlu0 %963 }
 0x122   : > { %1235 = vrot.lane.b32.xlu1 %v6376_v13, %s5983_s16  ;;  %v1725_v13 = vsel %vm225_vm0, %v1693_v45, %v6578_v39  ;;  %v1825_v39 = vsel %vm1823_vm4, %v1792_v5, %v1216_v20  ;;  %v1695_v45 = vsel %vm331_vm1, %v6396_v18, %v6453_v27 }
 0x123   : > { %1489 = vrot.lane.b32.xlu0 %v6295_v44, %s5985_s28  ;;  %v1758_v31 = vsel %vm1757_vm2, %v1725_v13, %v958_v43  ;;  %v1858_v1 = vsel %vm1856_vm5, %v1825_v39, %v1344_v2  ;;  %v6751_v13 = vld [vmem:[#allocation2 + $0x10f] sm:$0xff] }
 0x124   : > { %v1470_v10 = vpop.permute.xlu1 %1469  ;;  %v1791_v51 = vsel %vm1790_vm3, %v1758_v31, %v1086_v3 }
 0x125   : > { %v1472_v21 = vpop.permute.xlu0 %1471  ;;  %v1824_v24 = vsel %vm1823_vm4, %v1791_v51, %v1214_v8  ;;  %v1696_v51 = vsel %vm331_vm1, %v6412_v23, %v6464_v54 }
 0x126   : > { %1363 = vrot.lane.b32.xlu1 %v6698_v0, %s5984_s23  ;;  %v1857_v61 = vsel %vm1856_vm5, %v1824_v24, %v1342_v40  ;;  %v1891_v20 = vsel %vm1889_vm6, %v1858_v1, %v1472_v21 }
 0x127   : > { %1617 = vrot.lane.b32.xlu0 %v6372_v12, %s5986_s29  ;;  %v1890_v38 = vsel %vm1889_vm6, %v1857_v61, %v1470_v10 }
 0x128   : > { %v1090_v25 = vpop.permute.xlu1 %1089 }
 0x129   : > { %v1092_v32 = vpop.permute.xlu0 %1091 }
 0x12a   : > { %1491 = vrot.lane.b32.xlu1 %v6307_v47, %s5985_s28 }
 0x12b   : > { %981 = vrot.lane.b32.xlu0 %v6686_v22, %s5981_s6 }
 0x12c   : > { %v1598_v3 = vpop.permute.xlu1 %1597 }
 0x12d   : > { %v1923_v31 = vsel %vm1922_vm7, %v1890_v38, %v1598_v3  ;;  %v1600_v36 = vpop.permute.xlu0 %1599  ;;  %v522_v38 = vld [vmem:[#allocation2 + $0x108] sm:$0xff] }
 0x12e   : > { %1619 = vrot.lane.b32.xlu1 %v6384_v15, %s5986_s29  ;;  %5129 = vmatprep.mubr.msk.f32.mxu0 %vm1964_vm8, %v1923_v31  ;;  %v1924_v40 = vsel %vm1922_vm7, %v1891_v20, %v1600_v36  ;;  %v1697_v31 = vsel %vm331_vm1, %v6431_v37, %v6458_v53  ;;  %v6800_v37 = vld [vmem:[#allocation2 + $0x127] sm:$0xff] }
 0x12f   : > { %1109 = vrot.lane.b32.xlu0 %v6295_v44, %s5982_s11  ;;  %5130 = vmatmul.mubr.msk.f32.vlgmr.msra.gmra.mrb[0].mxu0 %vm1964_vm8, %v1924_v40  ;;  %v1729_v36 = vsel %vm225_vm0, %v1697_v31, %v6594_v7  ;;  %v523_v40 = vld [vmem:[#allocation2 + $0x110] sm:$0xff] }
 0x130   : > { %v1218_v8 = vpop.permute.xlu1 %1217 }
 0x131   : > { %v1346_v43 = vpop.permute.xlu0 %1345 }
 0x132   : > { %983 = vrot.lane.b32.xlu1 %v6698_v0, %s5981_s6 }
 0x133   : > { %1237 = vrot.lane.b32.xlu0 %v6372_v12, %s5983_s16 }
 0x134   : > { %v1220_v2 = vpop.permute.xlu1 %1219 }
 0x135   : > { %v1348_v21 = vpop.permute.xlu0 %1347 }
 0x136   : > { %1111 = vrot.lane.b32.xlu1 %v6307_v47, %s5982_s11  ;;  %v1727_v47 = vsel %vm225_vm0, %v1695_v45, %v6586_v52 }
 0x137   : > { %1365 = vrot.lane.b32.xlu0 %v6740_v11, %s5984_s23 }
 0x138   : > { %v966_v44 = vpop.permute.xlu1 %965 }
 0x139   : > { %v968_v10 = vpop.permute.xlu0 %967 }
 0x13a   : > { %1239 = vrot.lane.b32.xlu1 %v6384_v15, %s5983_s16  ;;  %v1760_v15 = vsel %vm1757_vm2, %v1727_v47, %v6690_v62 }
 0x13b   : > { %1493 = vrot.lane.b32.xlu0 %v6303_v46, %s5985_s28  ;;  %v1728_v46 = vsel %vm225_vm0, %v1696_v51, %v6602_v30  ;;  %v1793_v18 = vsel %vm1790_vm3, %v1760_v15, %v1090_v25 }
 0x13c   : > { %v1474_v12 = vpop.permute.xlu1 %1473  ;;  %v1761_v27 = vsel %vm1757_vm2, %v1728_v46, %v6692_v42  ;;  %v1826_v52 = vsel %vm1823_vm4, %v1793_v18, %v1218_v8  ;;  %v1762_v8 = vsel %vm1757_vm2, %v1729_v36, %v966_v44  ;;  %v619_v44 = vld [vmem:[#allocation2 + $0x128] sm:$0xff] }
 0x13d   : > { %v1476_v5 = vpop.permute.xlu0 %1475  ;;  %v1794_v54 = vsel %vm1790_vm3, %v1761_v27, %v1092_v32  ;;  %v1859_v30 = vsel %vm1856_vm5, %v1826_v52, %v1346_v43  ;;  %v6817_v18 = vld [vmem:[#allocation2 + $0x12f] sm:$0xff] }
 0x13e   : > { %1367 = vrot.lane.b32.xlu1 %v6751_v13, %s5984_s23  ;;  %v1827_v62 = vsel %vm1823_vm4, %v1794_v54, %v1220_v2  ;;  %v1892_v25 = vsel %vm1889_vm6, %v1859_v30, %v1474_v12 }
 0x13f   : > { %1621 = vrot.lane.b32.xlu0 %v6380_v14, %s5986_s29  ;;  %v1860_v39 = vsel %vm1856_vm5, %v1827_v62, %v1348_v21 }
 0x140   : > { %v1094_v23 = vpop.permute.xlu1 %1093  ;;  %v1893_v32 = vsel %vm1889_vm6, %v1860_v39, %v1476_v5 }
 0x141   : > { %v1096_v24 = vpop.permute.xlu0 %1095  ;;  %v1795_v2 = vsel %vm1790_vm3, %v1762_v8, %v1094_v23 }
 0x142   : > { %1495 = vrot.lane.b32.xlu1 %v6313_v49, %s5985_s28 }
 0x143   : > { %985 = vrot.lane.b32.xlu0 %v6740_v11, %s5981_s6 }
 0x144   : > { %v1602_v42 = vpop.permute.xlu1 %1601 }
 0x145   : > { %v1925_v61 = vsel %vm1922_vm7, %v1892_v25, %v1602_v42  ;;  %v1604_v3 = vpop.permute.xlu0 %1603  ;;  %v1699_v42 = vsel %vm331_vm1, %v6494_v26, %v6466_v55  ;;  %v621_v26 = vld [vmem:[#allocation2 + $0x148] sm:$0xff] }
 0x146   : > { %1623 = vrot.lane.b32.xlu1 %v6392_v17, %s5986_s29  ;;  %5132 = vmatprep.mubr.msk.f32.mxu0 %vm1964_vm8, %v1925_v61  ;;  %v1926_v49 = vsel %vm1922_vm7, %v1893_v32, %v1604_v3  ;;  %v1731_v61 = vsel %vm225_vm0, %v1699_v42, %v6604_v48  ;;  %v6846_v3 = vld [vmem:[#allocation2 + $0x147] sm:$0xff]  ;;  %v1700_v48 = vsel %vm331_vm1, %v6504_v63, %v6480_v58 }
 0x147   : > { %1113 = vrot.lane.b32.xlu0 %v522_v38, %s5982_s11  ;;  %5133 = vmatmul.mubr.msk.f32.gmra.mrb[2].mxu0 %vm1964_vm8, %v1926_v49  ;;  %v1732_v36 = vsel %vm225_vm0, %v1700_v48, %v6620_v33  ;;  %v6868_v63 = vld [vmem:[#allocation2 + $0x149] sm:$0xff] }
 0x148   : > { %v1222_v1 = vpop.permute.xlu1 %1221 }
 0x149   : > { %v1350_v20 = vpop.permute.xlu0 %1349  ;;  %v1828_v21 = vsel %vm1823_vm4, %v1795_v2, %v1222_v1  ;;  %v6865_v2 = vld [vmem:[#allocation2 + $0x14f] sm:$0xff] }
 0x14a   : > { %987 = vrot.lane.b32.xlu1 %v6751_v13, %s5981_s6  ;;  %v1861_v7 = vsel %vm1856_vm5, %v1828_v21, %v1350_v20 }
 0x14b   : > { %1241 = vrot.lane.b32.xlu0 %v6380_v14, %s5983_s16  ;;  %v1698_v14 = vsel %vm331_vm1, %v6445_v50, %v6472_v56 }
 0x14c   : > { %v1224_v43 = vpop.permute.xlu1 %1223  ;;  %v1730_v51 = vsel %vm225_vm0, %v1698_v14, %v6610_v6  ;;  %v620_v6 = vld [vmem:[#allocation2 + $0x130] sm:$0xff] }
 0x14d   : > { %v1478_v45 = vpop.permute.xlu0 %1477  ;;  %v1763_v5 = vsel %vm1757_vm2, %v1730_v51, %v968_v10 }
 0x14e   : > { %1115 = vrot.lane.b32.xlu1 %v523_v40, %s5982_s11  ;;  %v1894_v12 = vsel %vm1889_vm6, %v1861_v7, %v1478_v45  ;;  %v1796_v50 = vsel %vm1790_vm3, %v1763_v5, %v1096_v24  ;;  %v622_v45 = vld [vmem:[#allocation2 + $0x150] sm:$0xff] }
 0x14f   : > { %1369 = vrot.lane.b32.xlu0 %v6800_v37, %s5984_s23  ;;  %v1829_v56 = vsel %vm1823_vm4, %v1796_v50, %v1224_v43 }
 0x150   : > { %v1352_v53 = vpop.permute.xlu1 %1351 }
 0x151   : > { %v1606_v47 = vpop.permute.xlu0 %1605 }
 0x152   : > { %1243 = vrot.lane.b32.xlu1 %v6392_v17, %s5983_s16  ;;  %v1927_v15 = vsel %vm1922_vm7, %v1894_v12, %v1606_v47  ;;  %v1862_v17 = vsel %vm1856_vm5, %v1829_v56, %v1352_v53  ;;  %v654_v12 = vld [vmem:[#allocation2 + $0x151] sm:$0xff] }
 0x153   : > { %1497 = vrot.lane.b32.xlu0 %v619_v44, %s5985_s28  ;;  %5135 = vmatprep.mubr.msk.f32.mxu0 %vm1964_vm8, %v1927_v15 }
 0x154   : > { %v1480_v46 = vpop.permute.xlu1 %1479 }
 0x155   : > { %v970_v27 = vpop.permute.xlu0 %969  ;;  %v1895_v10 = vsel %vm1889_vm6, %v1862_v17, %v1480_v46  ;;  %v1701_v46 = vsel %vm331_vm1, %v6546_v28, %v6474_v57 }
 0x156   : > { %1371 = vrot.lane.b32.xlu1 %v6817_v18, %s5984_s23  ;;  %v1764_v38 = vsel %vm1757_vm2, %v1731_v61, %v970_v27  ;;  %v1733_v56 = vsel %vm225_vm0, %v1701_v46, %v6614_v41  ;;  %v1702_v41 = vsel %vm331_vm1, %v6560_v35, %v6488_v60  ;;  %v6915_v60 = vld [vmem:[#allocation2 + $0x16f] sm:$0xff] }
 0x157   : > { %1625 = vrot.lane.b32.xlu0 %v6388_v16, %s5986_s29  ;;  %v6918_v61 = vld [vmem:[#allocation2 + $0x169] sm:$0xff] }
 0x158   : > { %v1608_v52 = vpop.permute.xlu1 %1607  ;;  %v625_v46 = vld [vmem:[#allocation2 + $0x188] sm:$0xff] }
 0x159   : > { %v1928_v23 = vsel %vm1922_vm7, %v1895_v10, %v1608_v52  ;;  %v1098_v54 = vpop.permute.xlu0 %1097 }
 0x15a   : > { %1499 = vrot.lane.b32.xlu1 %v620_v6, %s5985_s28  ;;  %5136 = vmatmul.mubr.msk.f32.gmra.mrb[4].mxu0 %vm1964_vm8, %v1928_v23  ;;  %v1797_v49 = vsel %vm1790_vm3, %v1764_v38, %v1098_v54  ;;  %v623_v23 = vld [vmem:[#allocation2 + $0x168] sm:$0xff] }
 0x15b   : > { %989 = vrot.lane.b32.xlu0 %v6800_v37, %s5981_s6 }
 0x15c   : > { %v972_v62 = vpop.permute.xlu1 %971 }
 0x15d   : > { %v1226_v24 = vpop.permute.xlu0 %1225  ;;  %v1765_v8 = vsel %vm1757_vm2, %v1732_v36, %v972_v62 }
 0x15e   : > { %1627 = vrot.lane.b32.xlu1 %v6400_v19, %s5986_s29  ;;  %v1830_v1 = vsel %vm1823_vm4, %v1797_v49, %v1226_v24  ;;  %v1734_v24 = vsel %vm225_vm0, %v1702_v41, %v6628_v9  ;;  %v624_v49 = vld [vmem:[#allocation2 + $0x170] sm:$0xff] }
 0x15f   : > { %1117 = vrot.lane.b32.xlu0 %v619_v44, %s5982_s11  ;;  %v626_v41 = vld [vmem:[#allocation2 + $0x190] sm:$0xff] }
 0x160   : > { %v1100_v30 = vpop.permute.xlu1 %1099 }
 0x161   : > { %v1354_v25 = vpop.permute.xlu0 %1353  ;;  %v1798_v58 = vsel %vm1790_vm3, %v1765_v8, %v1100_v30 }
 0x162   : > { %991 = vrot.lane.b32.xlu1 %v6817_v18, %s5981_s6 }
 0x163   : > { %1245 = vrot.lane.b32.xlu0 %v6388_v16, %s5983_s16  ;;  %v1863_v16 = vsel %vm1856_vm5, %v1830_v1, %v1354_v25  ;;  %v328_v25 = vld [vmem:[%s6189_s24 + $0xf0] sm:$0xff] }
 0x164   : > { %v1228_v39 = vpop.permute.xlu1 %1227  ;;  %362 = vst.msk [vmem:[#allocation2 + $0x208] sm:$0xff] %vm331_vm1, %v328_v25 }
 0x165   : > { %v1482_v32 = vpop.permute.xlu0 %1481 }
 0x166   : > { %1119 = vrot.lane.b32.xlu1 %v620_v6, %s5982_s11  ;;  %v1896_v31 = vsel %vm1889_vm6, %v1863_v16, %v1482_v32  ;;  %v6895_v6 = vld [vmem:[#allocation2 + $0x167] sm:$0xff] }
 0x167   : > { %1373 = vrot.lane.b32.xlu0 %v6846_v3, %s5984_s23 }
 0x168   : > { %v1356_v55 = vpop.permute.xlu1 %1355 }
 0x169   : > { %v1610_v20 = vpop.permute.xlu0 %1609 }
 0x16a   : > { %1247 = vrot.lane.b32.xlu1 %v6400_v19, %s5983_s16  ;;  %v1929_v40 = vsel %vm1922_vm7, %v1896_v31, %v1610_v20  ;;  %v1831_v19 = vsel %vm1823_vm4, %v1798_v58, %v1228_v39  ;;  %v6932_v31 = vld [vmem:[#allocation2 + $0x171] sm:$0xff] }
 0x16b   : > { %1501 = vrot.lane.b32.xlu0 %v621_v26, %s5985_s28  ;;  %5138 = vmatprep.mubr.msk.f32.mxu0 %vm1964_vm8, %v1929_v40  ;;  %v1864_v33 = vsel %vm1856_vm5, %v1831_v19, %v1356_v55 }
 0x16c   : > { %v1484_v43 = vpop.permute.xlu1 %1483 }
 0x16d   : > { %v974_v21 = vpop.permute.xlu0 %973  ;;  %v1897_v53 = vsel %vm1889_vm6, %v1864_v33, %v1484_v43  ;;  %v1703_v43 = vsel %vm331_vm1, %v6598_v4, %v6482_v59 }
 0x16e   : > { %1375 = vrot.lane.b32.xlu1 %v6865_v2, %s5984_s23  ;;  %v1766_v27 = vsel %vm1757_vm2, %v1733_v56, %v974_v21 }
 0x16f   : > { %1629 = vrot.lane.b32.xlu0 %v6868_v63, %s5986_s29 }
 0x170   : > { %v1612_v7 = vpop.permute.xlu1 %1611 }
 0x171   : > { %v1930_v44 = vsel %vm1922_vm7, %v1897_v53, %v1612_v7  ;;  %v1102_v14 = vpop.permute.xlu0 %1101  ;;  %v8464_v53 = vld [vmem:[#allocation23_spill] sm:$0xff] }
 0x172   : > { %1503 = vrot.lane.b32.xlu1 %v622_v45, %s5985_s28  ;;  %5139 = vmatmul.mubr.msk.f32.gmra.mrb[6].mxu0 %vm1964_vm8, %v1930_v44  ;;  %v1799_v10 = vsel %vm1790_vm3, %v1766_v27, %v1102_v14  ;;  %v6960_v14 = vld [vmem:[#allocation2 + $0x187] sm:$0xff] }
 0x173   : > { %993 = vrot.lane.b32.xlu0 %v6846_v3, %s5981_s6 }
 0x174   : > { %v976_v47 = vpop.permute.xlu1 %975 }
 0x175   : > { %v1230_v51 = vpop.permute.xlu0 %1229  ;;  %v1767_v42 = vsel %vm1757_vm2, %v1734_v24, %v976_v47  ;;  %v6987_v24 = vld [vmem:[#allocation2 + $0x191] sm:$0xff] }
 0x176   : > { %1631 = vrot.lane.b32.xlu1 %v654_v12, %s5986_s29  ;;  %v1832_v52 = vsel %vm1823_vm4, %v1799_v10, %v1230_v51 }
 0x177   : > { %1121 = vrot.lane.b32.xlu0 %v621_v26, %s5982_s11  ;;  %v329_v26 = vld [vmem:[%s6189_s24 + $0xf8] sm:$0xff] }
 0x178   : > { %v1104_v15 = vpop.permute.xlu1 %1103  ;;  %363 = vst.msk [vmem:[#allocation2 + $0x210] sm:$0xff] %vm331_vm1, %v329_v26 }
 0x179   : > { %v1358_v5 = vpop.permute.xlu0 %1357  ;;  %v1800_v35 = vsel %vm1790_vm3, %v1767_v42, %v1104_v15  ;;  %v8466_v42 = vld [vmem:[#allocation3_spill] sm:$0xff] }
 0x17a   : > { %995 = vrot.lane.b32.xlu1 %v6865_v2, %s5981_s6  ;;  %v1865_v28 = vsel %vm1856_vm5, %v1832_v52, %v1358_v5  ;;  %v6976_v52 = vld [vmem:[#allocation2 + $0x18f] sm:$0xff] }
 0x17b   : > { %1249 = vrot.lane.b32.xlu0 %v6868_v63, %s5983_s16 }
 0x17c   : > { %v1232_v50 = vpop.permute.xlu1 %1231 }
 0x17d   : > { %v1486_v17 = vpop.permute.xlu0 %1485  ;;  %v1833_v9 = vsel %vm1823_vm4, %v1800_v35, %v1232_v50 }
 0x17e   : > { %1123 = vrot.lane.b32.xlu1 %v622_v45, %s5982_s11  ;;  %v1898_v54 = vsel %vm1889_vm6, %v1865_v28, %v1486_v17  ;;  %v6979_v28 = vld [vmem:[#allocation2 + $0x189] sm:$0xff] }
 0x17f   : > { %1377 = vrot.lane.b32.xlu0 %v6895_v6, %s5984_s23 }
 0x180   : > { %v1360_v57 = vpop.permute.xlu1 %1359 }
 0x181   : > { %v1614_v62 = vpop.permute.xlu0 %1613  ;;  %v1866_v32 = vsel %vm1856_vm5, %v1833_v9, %v1360_v57 }
 0x182   : > { %1251 = vrot.lane.b32.xlu1 %v654_v12, %s5983_s16  ;;  %v1931_v30 = vsel %vm1922_vm7, %v1898_v54, %v1614_v62 }
 0x183   : > { %1505 = vrot.lane.b32.xlu0 %v623_v23, %s5985_s28  ;;  %5141 = vmatprep.mubr.msk.f32.mxu0 %vm1964_vm8, %v1931_v30 }
 0x184   : > { %v1488_v39 = vpop.permute.xlu1 %1487 }
 0x185   : > { %v978_v38 = vpop.permute.xlu0 %977  ;;  %v1899_v1 = vsel %vm1889_vm6, %v1866_v32, %v1488_v39  ;;  %v8467_v39 = vld [vmem:[#allocation29_spill] sm:$0xff] }
 0x186   : > { %1379 = vrot.lane.b32.xlu1 %v6915_v60, %s5984_s23  ;;  %v1705_v35 = vsel %vm331_vm1, %v8467_v39, %v8466_v42  ;;  %v8474_v42 = vld [vmem:[#allocation7_spill] sm:$0xff] }
 0x187   : > { %1633 = vrot.lane.b32.xlu0 %v6918_v61, %s5986_s29  ;;  %v1708_v39 = vsel %vm331_vm1, %v6698_v0, %v8474_v42 }
 0x188   : > { %v1616_v55 = vpop.permute.xlu1 %1615 }
 0x189   : > { %v1932_v16 = vsel %vm1922_vm7, %v1899_v1, %v1616_v55  ;;  %v1106_v48 = vpop.permute.xlu0 %1105 }
 0x18a   : > { %1507 = vrot.lane.b32.xlu1 %v624_v49, %s5985_s28  ;;  %5142 = vmatmul.mubr.msk.f32.gmra.mrb[8].mxu0 %vm1964_vm8, %v1932_v16 }
 0x18b   : > { %869 = vrot.lane.b32.xlu0 %v6868_v63, %s5980_s26  ;;  %v1735_v63 = vsel %vm225_vm0, %v1703_v43, %v6622_v34  ;;  %v1704_v34 = vsel %vm331_vm1, %v8464_v53, %v6498_v29 }
 0x18c   : > { %v980_v20 = vpop.permute.xlu1 %979  ;;  %v1768_v19 = vsel %vm1757_vm2, %v1735_v63, %v978_v38  ;;  %v8468_v38 = vld [vmem:[#allocation24_spill] sm:$0xff] }
 0x18d   : > { %v1234_v36 = vpop.permute.xlu0 %1233  ;;  %v1801_v33 = vsel %vm1790_vm3, %v1768_v19, %v1106_v48  ;;  %v1737_v32 = vsel %vm225_vm0, %v1705_v35, %v8468_v38  ;;  %v8469_v48 = vld [vmem:[#allocation5_spill] sm:$0xff]  ;;  %v8475_v38 = vld [vmem:[#allocation30_spill] sm:$0xff] }
 0x18e   : > { %1635 = vrot.lane.b32.xlu1 %v6932_v31, %s5986_s29  ;;  %v1834_v45 = vsel %vm1823_vm4, %v1801_v33, %v1234_v36 }
 0x18f   : > { %997 = vrot.lane.b32.xlu0 %v6895_v6, %s5981_s6 }
 0x190   : > { %v1108_v40 = vpop.permute.xlu1 %1107 }
 0x191   : > { %v1362_v8 = vpop.permute.xlu0 %1361 }
 0x192   : > { %871 = vrot.lane.b32.xlu1 %v654_v12, %s5980_s26  ;;  %v1867_v4 = vsel %vm1856_vm5, %v1834_v45, %v1362_v8  ;;  %v8465_v12 = vld [vmem:[#allocation25_spill] sm:$0xff] }
 0x193   : > { %1125 = vrot.lane.b32.xlu0 %v623_v23, %s5982_s11  ;;  %v1736_v47 = vsel %vm225_vm0, %v1704_v34, %v8465_v12 }
 0x194   : > { %v1236_v58 = vpop.permute.xlu1 %1235  ;;  %v1769_v15 = vsel %vm1757_vm2, %v1736_v47, %v980_v20  ;;  %v8470_v20 = vld [vmem:[#allocation33_spill] sm:$0xff] }
 0x195   : > { %v1490_v21 = vpop.permute.xlu0 %1489  ;;  %v1802_v29 = vsel %vm1790_vm3, %v1769_v15, %v1108_v40  ;;  %v1706_v36 = vsel %vm331_vm1, %v8470_v20, %v8469_v48  ;;  %v7036_v15 = vld [vmem:[#allocation2 + $0x1a9] sm:$0xff] }
 0x196   : > { %999 = vrot.lane.b32.xlu1 %v6915_v60, %s5981_s6  ;;  %v1900_v7 = vsel %vm1889_vm6, %v1867_v4, %v1490_v21  ;;  %v1835_v50 = vsel %vm1823_vm4, %v1802_v29, %v1236_v58  ;;  %v628_v29 = vld [vmem:[#allocation2 + $0x1b0] sm:$0xff] }
 0x197   : > { %1253 = vrot.lane.b32.xlu0 %v6918_v61, %s5983_s16 }
 0x198   : > { %v1364_v59 = vpop.permute.xlu1 %1363 }
 0x199   : > { %v1618_v44 = vpop.permute.xlu0 %1617  ;;  %v1868_v27 = vsel %vm1856_vm5, %v1835_v50, %v1364_v59  ;;  %v7023_v59 = vld [vmem:[#allocation2 + $0x1a7] sm:$0xff] }
 0x19a   : > { %1127 = vrot.lane.b32.xlu1 %v624_v49, %s5982_s11  ;;  %v1933_v51 = vsel %vm1922_vm7, %v1900_v7, %v1618_v44  ;;  %v627_v44 = vld [vmem:[#allocation2 + $0x1a8] sm:$0xff] }
 0x19b   : > { %1381 = vrot.lane.b32.xlu0 %v6960_v14, %s5984_s23  ;;  %5144 = vmatprep.mubr.msk.f32.mxu0 %vm1964_vm8, %v1933_v51  ;;  %v7034_v51 = vld [vmem:[#allocation2 + $0x1af] sm:$0xff] }
 0x19c   : > { %v1492_v5 = vpop.permute.xlu1 %1491 }
 0x19d   : > { %v982_v56 = vpop.permute.xlu0 %981  ;;  %v1901_v17 = vsel %vm1889_vm6, %v1868_v27, %v1492_v5  ;;  %v8472_v27 = vld [vmem:[#allocation4_spill] sm:$0xff] }
 0x19e   : > { %1255 = vrot.lane.b32.xlu1 %v6932_v31, %s5983_s16  ;;  %v1770_v49 = vsel %vm1757_vm2, %v1737_v32, %v982_v56  ;;  %v7043_v56 = vld [vmem:[#allocation2 + $0x1b1] sm:$0xff]  ;;  %v1740_v32 = vsel %vm225_vm0, %v1708_v39, %v8475_v38  ;;  %v599_v38 = vld [vmem:[#allocation2 + $0x1e7] sm:$0xff] }
 0x19f   : > { %1509 = vrot.lane.b32.xlu0 %v625_v46, %s5985_s28 }
 0x1a0   : > { %v1620_v10 = vpop.permute.xlu1 %1619 }
 0x1a1   : > { %v1934_v57 = vsel %vm1922_vm7, %v1901_v17, %v1620_v10  ;;  %v1110_v23 = vpop.permute.xlu0 %1109  ;;  %v1707_v17 = vsel %vm331_vm1, %v6686_v22, %v8472_v27  ;;  %v8478_v27 = vld [vmem:[#allocation9_spill] sm:$0xff] }
 0x1a2   : > { %1383 = vrot.lane.b32.xlu1 %v6976_v52, %s5984_s23  ;;  %5145 = vmatmul.mubr.msk.f32.gmra.mrb[10].mxu0 %vm1964_vm8, %v1934_v57  ;;  %v8473_v57 = vld [vmem:[#allocation26_spill] sm:$0xff] }
 0x1a3   : > { %1637 = vrot.lane.b32.xlu0 %v6979_v28, %s5986_s29 }
 0x1a4   : > { %v984_v54 = vpop.permute.xlu1 %983 }
 0x1a5   : > { %v1238_v62 = vpop.permute.xlu0 %1237 }
 0x1a6   : > { %1511 = vrot.lane.b32.xlu1 %v626_v41, %s5985_s28 }
 0x1a7   : > { %873 = vrot.lane.b32.xlu0 %v6918_v61, %s5980_s26  ;;  %v1803_v61 = vsel %vm1790_vm3, %v1770_v49, %v1110_v23  ;;  %v1739_v23 = vsel %vm225_vm0, %v1707_v17, %v8473_v57  ;;  %v1710_v17 = vsel %vm331_vm1, %v6751_v13, %v8478_v27  ;;  %v7172_v27 = vld [vmem:[#allocation2 + $0x28] ss:$2 sm:$0xff] }
 0x1a8   : > { %v1112_v30 = vpop.permute.xlu1 %1111  ;;  %v1836_v55 = vsel %vm1823_vm4, %v1803_v61, %v1238_v62 }
 0x1a9   : > { %v1366_v25 = vpop.permute.xlu0 %1365 }
 0x1aa   : > { %1639 = vrot.lane.b32.xlu1 %v6987_v24, %s5986_s29  ;;  %v1869_v26 = vsel %vm1856_vm5, %v1836_v55, %v1366_v25 }
 0x1ab   : > { %1001 = vrot.lane.b32.xlu0 %v6960_v14, %s5981_s6 }
 0x1ac   : > { %v1240_v9 = vpop.permute.xlu1 %1239 }
 0x1ad   : > { %v1494_v1 = vpop.permute.xlu0 %1493 }
 0x1ae   : > { %875 = vrot.lane.b32.xlu1 %v6932_v31, %s5980_s26  ;;  %v1902_v40 = vsel %vm1889_vm6, %v1869_v26, %v1494_v1  ;;  %v8471_v31 = vld [vmem:[#allocation27_spill] sm:$0xff]  ;;  %v501_v1 = vld [vmem:[#allocation2 + $0x1af] sm:$0xff] }
 0x1af   : > { %1129 = vrot.lane.b32.xlu0 %v625_v46, %s5982_s11  ;;  %v1738_v43 = vsel %vm225_vm0, %v1706_v36, %v8471_v31 }
 0x1b0   : > { %v1368_v16 = vpop.permute.xlu1 %1367  ;;  %v1771_v63 = vsel %vm1757_vm2, %v1738_v43, %v984_v54  ;;  %v629_v43 = vld [vmem:[#allocation2 + $0x1c8] sm:$0xff] }
 0x1b1   : > { %v1622_v8 = vpop.permute.xlu0 %1621  ;;  %v1804_v21 = vsel %vm1790_vm3, %v1771_v63, %v1112_v30  ;;  %v598_v63 = vld [vmem:[#allocation2 + $0x1cf] sm:$0xff] }
 0x1b2   : > { %1003 = vrot.lane.b32.xlu1 %v6976_v52, %s5981_s6  ;;  %v1935_v58 = vsel %vm1922_vm7, %v1902_v40, %v1622_v8  ;;  %v1837_v33 = vsel %vm1823_vm4, %v1804_v21, %v1240_v9  ;;  %v597_v40 = vld [vmem:[#allocation2 + $0x1c7] sm:$0xff] }
 0x1b3   : > { %1257 = vrot.lane.b32.xlu0 %v6979_v28, %s5983_s16  ;;  %5147 = vmatprep.mubr.msk.f32.mxu0 %vm1964_vm8, %v1935_v58  ;;  %v1870_v4 = vsel %vm1856_vm5, %v1837_v33, %v1368_v16  ;;  %v7085_v21 = vld [vmem:[#allocation2 + $0x1c9] sm:$0xff] }
 0x1b4   : > { %v1496_v19 = vpop.permute.xlu1 %1495 }
 0x1b5   : > { %v986_v45 = vpop.permute.xlu0 %985  ;;  %v1903_v53 = vsel %vm1889_vm6, %v1870_v4, %v1496_v19  ;;  %v8476_v4 = vld [vmem:[#allocation6_spill] sm:$0xff] }
 0x1b6   : > { %1131 = vrot.lane.b32.xlu1 %v626_v41, %s5982_s11  ;;  %v500_v41 = vld [vmem:[#allocation2 + $0x1a7] sm:$0xff]  ;;  %v1772_v54 = vsel %vm1757_vm2, %v1739_v23, %v986_v45  ;;  %v630_v45 = vld [vmem:[#allocation2 + $0x1d0] sm:$0xff] }
 0x1b7   : > { %1385 = vrot.lane.b32.xlu0 %v7023_v59, %s5984_s23  ;;  %v8479_v23 = vld [vmem:[#allocation32_spill] sm:$0xff] }
 0x1b8   : > { %v1624_v34 = vpop.permute.xlu1 %1623 }
 0x1b9   : > { %v1936_v7 = vsel %vm1922_vm7, %v1903_v53, %v1624_v34  ;;  %v1114_v12 = vpop.permute.xlu0 %1113  ;;  %v1709_v53 = vsel %vm331_vm1, %v6740_v11, %v8476_v4 }
 0x1ba   : > { %1259 = vrot.lane.b32.xlu1 %v6987_v24, %s5983_s16  ;;  %5148 = vmatmul.mubr.msk.f32.gmra.mrb[12].mxu0 %vm1964_vm8, %v1936_v7  ;;  %v1805_v30 = vsel %vm1790_vm3, %v1772_v54, %v1114_v12  ;;  %v8477_v7 = vld [vmem:[#allocation28_spill] sm:$0xff] }
 0x1bb   : > { %1513 = vrot.lane.b32.xlu0 %v627_v44, %s5985_s28 }
 0x1bc   : > { %v988_v47 = vpop.permute.xlu1 %987 }
 0x1bd   : > { %v1242_v5 = vpop.permute.xlu0 %1241  ;;  %v1773_v61 = vsel %vm1757_vm2, %v1740_v32, %v988_v47 }
 0x1be   : > { %1387 = vrot.lane.b32.xlu1 %v7034_v51, %s5984_s23  ;;  %v1838_v25 = vsel %vm1823_vm4, %v1805_v30, %v1242_v5 }
 0x1bf   : > { %1641 = vrot.lane.b32.xlu0 %v7036_v15, %s5986_s29 }
 0x1c0   : > { %v1116_v46 = vpop.permute.xlu1 %1115 }
 0x1c1   : > { %v1370_v50 = vpop.permute.xlu0 %1369  ;;  %v1806_v0 = vsel %vm1790_vm3, %v1773_v61, %v1116_v46  ;;  %v600_v61 = vld [vmem:[#allocation2 + $0x1ef] sm:$0xff] }
 0x1c2   : > { %1515 = vrot.lane.b32.xlu1 %v628_v29, %s5985_s28 }
 0x1c3   : > { %877 = vrot.lane.b32.xlu0 %v6979_v28, %s5980_s26  ;;  %v1871_v28 = vsel %vm1856_vm5, %v1838_v25, %v1370_v50 }
 0x1c4   : > { %v1244_v10 = vpop.permute.xlu1 %1243 }
 0x1c5   : > { %v1498_v62 = vpop.permute.xlu0 %1497  ;;  %v1839_v16 = vsel %vm1823_vm4, %v1806_v0, %v1244_v10 }
 0x1c6   : > { %1643 = vrot.lane.b32.xlu1 %v7043_v56, %s5986_s29  ;;  %v1904_v35 = vsel %vm1889_vm6, %v1871_v28, %v1498_v62 }
 0x1c7   : > { %1005 = vrot.lane.b32.xlu0 %v500_v41, %s5981_s6  ;;  %v1742_v41 = vsel %vm225_vm0, %v1710_v17, %v8479_v23 }
 0x1c8   : > { %v1372_v22 = vpop.permute.xlu1 %1371 }
 0x1c9   : > { %v1626_v9 = vpop.permute.xlu0 %1625 }
 0x1ca   : > { %879 = vrot.lane.b32.xlu1 %v6987_v24, %s5980_s26  ;;  %v1937_v49 = vsel %vm1922_vm7, %v1904_v35, %v1626_v9  ;;  %v1872_v24 = vsel %vm1856_vm5, %v1839_v16, %v1372_v22 }
 0x1cb   : > { %1133 = vrot.lane.b32.xlu0 %v627_v44, %s5982_s11  ;;  %5150 = vmatprep.mubr.msk.f32.mxu0 %vm1964_vm8, %v1937_v49  ;;  %v1741_v44 = vsel %vm225_vm0, %v1709_v53, %v8477_v7  ;;  %v631_v49 = vld [vmem:[#allocation2 + $0x1e8] sm:$0xff] }
 0x1cc   : > { %v1500_v55 = vpop.permute.xlu1 %1499 }
 0x1cd   : > { %v990_v26 = vpop.permute.xlu0 %989  ;;  %v1905_v48 = vsel %vm1889_vm6, %v1872_v24, %v1500_v55  ;;  %v8480_v55 = vld [vmem:[#allocation8_spill] sm:$0xff] }
 0x1ce   : > { %1007 = vrot.lane.b32.xlu1 %v501_v1, %s5981_s6  ;;  %v1774_v12 = vsel %vm1757_vm2, %v1741_v44, %v990_v26  ;;  %v1711_v0 = vsel %vm331_vm1, %v6800_v37, %v8480_v55  ;;  %v8481_v26 = vld [vmem:[#allocation31_spill] sm:$0xff]  ;;  %v3762_v55 = vld [vmem:[%s8424_s2 + $0x8] sm:$0xff] }
 0x1cf   : > { %1261 = vrot.lane.b32.xlu0 %v7036_v15, %s5983_s16  ;;  %v1743_v24 = vsel %vm225_vm0, %v1711_v0, %v8481_v26  ;;  %v8485_v26 = vld [vmem:[#allocation13_spill] sm:$0xff] }
 0x1d0   : > { %v1628_v20 = vpop.permute.xlu1 %1627 }
 0x1d1   : > { %v1938_v36 = vsel %vm1922_vm7, %v1905_v48, %v1628_v20  ;;  %v1118_v8 = vpop.permute.xlu0 %1117  ;;  %v7138_v48 = vld [vmem:[#allocation2 + $0x1e9] sm:$0xff] }
 0x1d2   : > { %1135 = vrot.lane.b32.xlu1 %v628_v29, %s5982_s11  ;;  %5151 = vmatmul.mubr.msk.f32.gmra.mrb[14].mxu0 %vm1964_vm8, %v1938_v36  ;;  %v1807_v5 = vsel %vm1790_vm3, %v1774_v12, %v1118_v8  ;;  %v7098_v29 = vld [vmem:[#allocation2 + $0x1d1] sm:$0xff] }
 0x1d3   : > { %1389 = vrot.lane.b32.xlu0 %v597_v40, %s5984_s23  ;;  %v632_v8 = vld [vmem:[#allocation2 + $0x1f0] sm:$0xff] }
 0x1d4   : > { %v992_v31 = vpop.permute.xlu1 %991 }
 0x1d5   : > { %v1246_v58 = vpop.permute.xlu0 %1245 }
 0x1d6   : > { %1263 = vrot.lane.b32.xlu1 %v7043_v56, %s5983_s16  ;;  %v1840_v46 = vsel %vm1823_vm4, %v1807_v5, %v1246_v58  ;;  %v8482_v58 = vld [vmem:[#allocation11_spill] sm:$0xff] }
 0x1d7   : > { %1517 = vrot.lane.b32.xlu0 %v629_v43, %s5985_s28 }
 0x1d8   : > { %v1120_v19 = vpop.permute.xlu1 %1119 }
 0x1d9   : > { %v1374_v33 = vpop.permute.xlu0 %1373 }
 0x1da   : > { %1391 = vrot.lane.b32.xlu1 %v598_v63, %s5984_s23  ;;  %v1873_v50 = vsel %vm1856_vm5, %v1840_v46, %v1374_v33 }
 0x1db   : > { %1645 = vrot.lane.b32.xlu0 %v7085_v21, %s5986_s29 }
 0x1dc   : > { %v1248_v34 = vpop.permute.xlu1 %1247 }
 0x1dd   : > { %v1502_v47 = vpop.permute.xlu0 %1501 }
 0x1de   : > { %1519 = vrot.lane.b32.xlu1 %v630_v45, %s5985_s28  ;;  %v1906_v10 = vsel %vm1889_vm6, %v1873_v50, %v1502_v47 }
 0x1df   : > { %881 = vrot.lane.b32.xlu0 %v7036_v15, %s5980_s26  ;;  %v1775_v15 = vsel %vm1757_vm2, %v1742_v41, %v992_v31 }
 0x1e0   : > { %v1376_v11 = vpop.permute.xlu1 %1375  ;;  %v1808_v13 = vsel %vm1790_vm3, %v1775_v15, %v1120_v19  ;;  %v601_v15 = vld [vmem:[#allocation2 + $0x207] sm:$0xff] }
 0x1e1   : > { %v1630_v57 = vpop.permute.xlu0 %1629  ;;  %v1841_v30 = vsel %vm1823_vm4, %v1808_v13, %v1248_v34  ;;  %v7155_v34 = vld [vmem:[#allocation2 + $0x1f1] sm:$0xff] }
 0x1e2   : > { %1647 = vrot.lane.b32.xlu1 %v7098_v29, %s5986_s29  ;;  %v1939_v54 = vsel %vm1922_vm7, %v1906_v10, %v1630_v57  ;;  %v1874_v22 = vsel %vm1856_vm5, %v1841_v30, %v1376_v11  ;;  %v7182_v30 = vld [vmem:[#allocation2 + $0x208] sm:$0xff] }
 0x1e3   : > { %1009 = vrot.lane.b32.xlu0 %v597_v40, %s5981_s6  ;;  %5153 = vmatprep.mubr.msk.f32.mxu0 %vm1964_vm8, %v1939_v54 }
 0x1e4   : > { %v1504_v62 = vpop.permute.xlu1 %1503 }
 0x1e5   : > { %v994_v25 = vpop.permute.xlu0 %993  ;;  %v1907_v28 = vsel %vm1889_vm6, %v1874_v22, %v1504_v62  ;;  %v7186_v22 = vld [vmem:[#allocation2 + $0x20f] sm:$0xff] }
 0x1e6   : > { %883 = vrot.lane.b32.xlu1 %v7043_v56, %s5980_s26  ;;  %v1776_v20 = vsel %vm1757_vm2, %v1743_v24, %v994_v25  ;;  %v1714_v24 = vsel %vm331_vm1, %v6865_v2, %v8485_v26 }
 0x1e7   : > { %1137 = vrot.lane.b32.xlu0 %v629_v43, %s5982_s11 }
 0x1e8   : > { %v1632_v42 = vpop.permute.xlu1 %1631 }
 0x1e9   : > { %v1940_v39 = vsel %vm1922_vm7, %v1907_v28, %v1632_v42  ;;  %v1122_v35 = vpop.permute.xlu0 %1121  ;;  %v8484_v28 = vld [vmem:[#allocation10_spill] sm:$0xff] }
 0x1ea   : > { %1011 = vrot.lane.b32.xlu1 %v598_v63, %s5981_s6  ;;  %5154 = vmatmul.mubr.msk.f32.gmra.mrb[16].mxu0 %vm1964_vm8, %v1940_v39  ;;  %v1809_v40 = vsel %vm1790_vm3, %v1776_v20, %v1122_v35  ;;  %v1712_v63 = vsel %vm331_vm1, %v6817_v18, %v8482_v58  ;;  %v1713_v42 = vsel %vm331_vm1, %v6846_v3, %v8484_v28  ;;  %v3763_v58 = vld [vmem:[%s8424_s2 + $0x10] sm:$0xff]  ;;  %v3772_v28 = vld [vmem:[%s8424_s2 + $0x58] sm:$0xff] }
 0x1eb   : > { %1265 = vrot.lane.b32.xlu0 %v7085_v21, %s5983_s16 }
 0x1ec   : > { %v996_v9 = vpop.permute.xlu1 %995 }
 0x1ed   : > { %v1250_v56 = vpop.permute.xlu0 %1249 }
 0x1ee   : > { %1139 = vrot.lane.b32.xlu1 %v630_v45, %s5982_s11  ;;  %v1842_v31 = vsel %vm1823_vm4, %v1809_v40, %v1250_v56  ;;  %v8483_v45 = vld [vmem:[#allocation34_spill] sm:$0xff]  ;;  %v5987_v40 = vmov 0.0|0.0  }
 0x1ef   : > { %1393 = vrot.lane.b32.xlu0 %v599_v38, %s5984_s23  ;;  %v1744_v4 = vsel %vm225_vm0, %v1712_v63, %v8483_v45  ;;  %5261 = vmatprep.subr.bf16.mxu1 %v5987_v40  ;;  %v3764_v63 = vld [vmem:[%s8424_s2 + $0x18] sm:$0xff] }
 0x1f0   : > { %v1124_v32 = vpop.permute.xlu1 %1123  ;;  %v1777_v7 = vsel %vm1757_vm2, %v1744_v4, %v996_v9  ;;  %v7194_v9 = vld [vmem:[#allocation2 + $0x209] sm:$0xff]  ;;  %5207 = vmatprep.subr.bf16.mxu0 %v5987_v40 }
 0x1f1   : > { %v1378_v1 = vpop.permute.xlu0 %1377  ;;  %v1810_v18 = vsel %vm1790_vm3, %v1777_v7, %v1124_v32 }
 0x1f2   : > { %1267 = vrot.lane.b32.xlu1 %v7098_v29, %s5983_s16  ;;  %v1875_v43 = vsel %vm1856_vm5, %v1842_v31, %v1378_v1 }
 0x1f3   : > { %1521 = vrot.lane.b32.xlu0 %v631_v49, %s5985_s28 }
 0x1f4   : > { %v1252_v16 = vpop.permute.xlu1 %1251 }
 0x1f5   : > { %v1506_v36 = vpop.permute.xlu0 %1505  ;;  %v1843_v12 = vsel %vm1823_vm4, %v1810_v18, %v1252_v16 }
 0x1f6   : > { %1395 = vrot.lane.b32.xlu1 %v600_v61, %s5984_s23  ;;  %v1908_v19 = vsel %vm1889_vm6, %v1875_v43, %v1506_v36 }
 0x1f7   : > { %1649 = vrot.lane.b32.xlu0 %v7138_v48, %s5986_s29 }
 0x1f8   : > { %v1380_v37 = vpop.permute.xlu1 %1379 }
 0x1f9   : > { %v1634_v33 = vpop.permute.xlu0 %1633  ;;  %v1876_v5 = vsel %vm1856_vm5, %v1843_v12, %v1380_v37  ;;  %v7221_v37 = vld [vmem:[#allocation2 + $0x211] sm:$0xff] }
 0x1fa   : > { %1523 = vrot.lane.b32.xlu1 %v632_v8, %s5985_s28  ;;  %v1941_v53 = vsel %vm1922_vm7, %v1908_v19, %v1634_v33  ;;  %v5211_v33 = vpack.c.bf16 %v3764_v63, %v3763_v58  ;;  %v3775_v63 = vld [vmem:[%s8424_s2 + $0x70] sm:$0xff] }
 0x1fb   : > { %885 = vrot.lane.b32.xlu0 %v7085_v21, %s5980_s26  ;;  %5156 = vmatprep.mubr.msk.f32.mxu0 %vm1964_vm8, %v1941_v53 }
 0x1fc   : > { %v1508_v44 = vpop.permute.xlu1 %1507 }
 0x1fd   : > { %v870_v47 = vpop.permute.xlu0 %869  ;;  %v1909_v46 = vsel %vm1889_vm6, %v1876_v5, %v1508_v44  ;;  %v3766_v5 = vld [vmem:[%s8424_s2 + $0x28] sm:$0xff] }
 0x1fe   : > { %1651 = vrot.lane.b32.xlu1 %v7155_v34, %s5986_s29  ;;  %v1745_v35 = vsel %vm225_vm0, %v1713_v42, %v870_v47  ;;  %v3765_v47 = vld [vmem:[%s8424_s2 + $0x20] sm:$0xff]  ;;  %v635_v42 = vld [vmem:[#allocation2 + $0x228] sm:$0xff] }
 0x1ff   : > { %1013 = vrot.lane.b32.xlu0 %v599_v38, %s5981_s6 }
 0x200   : > { %v1636_v11 = vpop.permute.xlu1 %1635 }
 0x201   : > { %v1942_v21 = vsel %vm1922_vm7, %v1909_v46, %v1636_v11  ;;  %v998_v50 = vpop.permute.xlu0 %997 }
 0x202   : > { %887 = vrot.lane.b32.xlu1 %v7098_v29, %s5980_s26  ;;  %5157 = vmatmul.mubr.msk.f32.gmra.mrb[18].mxu0 %vm1964_vm8, %v1942_v21  ;;  %v5131_v17 = vpop.f32.mrb[0].mxu0  ;;  %v1778_v38 = vsel %vm1757_vm2, %v1745_v35, %v998_v50  ;;  %v5214_v21 = vpack.c.bf16 %v3766_v5, %v3765_v47  ;;  %v668_v47 = vld [vmem:[#allocation2 + $0x231] sm:$0xff] }
 0x203   : > { %v2287_v10 = vmax.f32 %v5131_v17, 0.0  ;;  %1141 = vrot.lane.b32.xlu0 %v631_v49, %s5982_s11  ;;  %v2127_v57 = vpop.f32.mrb[1].mxu0  ;;  %v7200_v49 = vld [vmem:[#allocation2 + $0x210] sm:$0xff] }
 0x204   : > { %v872_v23 = vpop.permute.xlu1 %871  ;;  %v2286_v41 = vmax.f32 %v2127_v57, 0.0 }
 0x205   : > { %2319 = vst.msk [vmem:[#allocation2 + $0x30] sm:$0xff] %vm225_vm0, %v2287_v10  ;;  %v1126_v54 = vpop.permute.xlu0 %1125  ;;  %v3767_v10 = vld [vmem:[%s8424_s2 + $0x30] sm:$0xff] }
 0x206   : > { %1015 = vrot.lane.b32.xlu1 %v600_v61, %s5981_s6  ;;  %2318 = vst.msk [vmem:[#allocation2 + $0x28] sm:$0xff] %vm225_vm0, %v2286_v41  ;;  %v1811_v32 = vsel %vm1790_vm3, %v1778_v38, %v1126_v54  ;;  %v3761_v61 = vld [vmem:[%s8424_s2] sm:$0xff]  ;;  %v8486_v38 = vld [vmem:[#allocation12_spill] sm:$0xff] }
 0x207   : > { %1269 = vrot.lane.b32.xlu0 %v7138_v48, %s5983_s16  ;;  %v5208_v16 = vpack.c.bf16 %v3762_v55, %v3761_v61  ;;  %v3769_v54 = vld [vmem:[%s8424_s2 + $0x40] sm:$0xff] }
 0x208   : > { %v1000_v29 = vpop.permute.xlu1 %999 }
 0x209   : > { %v1254_v62 = vpop.permute.xlu0 %1253  ;;  %5270 = vmatpush1.bf16.msra.mxu1 %v5208_v16  ;;  %5209 = vmatpush1.bf16.msra.mxu0 %v5208_v16 }
 0x20a   : > { %1143 = vrot.lane.b32.xlu1 %v632_v8, %s5982_s11  ;;  %v1844_v3 = vsel %vm1823_vm4, %v1811_v32, %v1254_v62  ;;  %v1746_v8 = vsel %vm225_vm0, %v1714_v24, %v872_v23  ;;  %5262 = vmatprep.subr.bf16.mxu1 %v5987_v40  ;;  %v603_v62 = vld [vmem:[#allocation2 + $0x227] sm:$0xff] }
 0x20b   : > { %1397 = vrot.lane.b32.xlu0 %v601_v15, %s5984_s23  ;;  %v1779_v2 = vsel %vm1757_vm2, %v1746_v8, %v1000_v29  ;;  %5210 = vmatprep.subr.bf16.mxu0 %v5987_v40  ;;  %v3770_v29 = vld [vmem:[%s8424_s2 + $0x48] sm:$0xff] }
 0x20c   : > { %v1128_v13 = vpop.permute.xlu1 %1127 }
 0x20d   : > { %v1382_v25 = vpop.permute.xlu0 %1381  ;;  %v1812_v19 = vsel %vm1790_vm3, %v1779_v2, %v1128_v13  ;;  %5271 = vmatpush1.bf16.msra.mxu1 %v5211_v33  ;;  %5212 = vmatpush1.bf16.msra.mxu0 %v5211_v33  ;;  %v5220_v13 = vpack.c.bf16 %v3770_v29, %v3769_v54  ;;  %v2384_v2 = vld [vmem:[#allocation2 + $0x28] sm:$0xff] }
 0x20e   : > { %1271 = vrot.lane.b32.xlu1 %v7155_v34, %s5983_s16  ;;  %v1877_v0 = vsel %vm1856_vm5, %v1844_v3, %v1382_v25  ;;  %5263 = vmatprep.subr.bf16.mxu1 %v5987_v40  ;;  %v3774_v3 = vld [vmem:[%s8424_s2 + $0x68] sm:$0xff] }
 0x20f   : > { %1525 = vrot.lane.b32.xlu0 %v7182_v30, %s5985_s28  ;;  %5213 = vmatprep.subr.bf16.mxu0 %v5987_v40 }
 0x210   : > { %v1256_v39 = vpop.permute.xlu1 %1255 }
 0x211   : > { %v1510_v56 = vpop.permute.xlu0 %1509  ;;  %v1845_v45 = vsel %vm1823_vm4, %v1812_v19, %v1256_v39  ;;  %5272 = vmatpush1.bf16.msra.mxu1 %v5214_v21  ;;  %5215 = vmatpush1.bf16.msra.mxu0 %v5214_v21  ;;  %v3776_v19 = vld [vmem:[%s8424_s2 + $0x78] sm:$0xff]  ;;  %v3778_v21 = vld [vmem:[%s8424_s2 + $0x88] sm:$0xff] }
 0x212   : > { %1399 = vrot.lane.b32.xlu1 %v7186_v22, %s5984_s23  ;;  %v1910_v20 = vsel %vm1889_vm6, %v1877_v0, %v1510_v56  ;;  %5264 = vmatprep.subr.bf16.mxu1 %v5987_v40  ;;  %v1715_v56 = vsel %vm331_vm1, %v6895_v6, %v8486_v38  ;;  %v667_v6 = vld [vmem:[#allocation2 + $0x229] sm:$0xff] }
 0x213   : > { %1653 = vrot.lane.b32.xlu0 %v7194_v9, %s5986_s29  ;;  %5216 = vmatprep.subr.bf16.mxu0 %v5987_v40 }
 0x214   : > { %v1384_v1 = vpop.permute.xlu1 %1383 }
 0x215   : > { %v1638_v36 = vpop.permute.xlu0 %1637  ;;  %v1878_v4 = vsel %vm1856_vm5, %v1845_v45, %v1384_v1  ;;  %v7315_v1 = vld [vmem:[#allocation2 + $0x68] ss:$2 sm:$0xff]  ;;  %v5229_v45 = vpack.c.bf16 %v3776_v19, %v3775_v63 }
 0x216   : > { %1527 = vrot.lane.b32.xlu1 %v7200_v49, %s5985_s28  ;;  %v1943_v31 = vsel %vm1922_vm7, %v1910_v20, %v1638_v36 }
 0x217   : > { %889 = vrot.lane.b32.xlu0 %v7138_v48, %s5980_s26  ;;  %5159 = vmatprep.mubr.msk.f32.mxu0 %vm1964_vm8, %v1943_v31  ;;  %v636_v31 = vld [vmem:[#allocation2 + $0x230] sm:$0xff] }
 0x218   : > { %v1512_v43 = vpop.permute.xlu1 %1511 }
 0x219   : > { %v7237_v48 = vpop.permute.xlu0 %873  ;;  %v1911_v7 = vsel %vm1889_vm6, %v1878_v4, %v1512_v43 }
 0x21a   : > { %1655 = vrot.lane.b32.xlu1 %v7221_v37, %s5986_s29  ;;  %v5134_v53 = vpop.f32.mrb[2].mxu0  ;;  %v1747_v61 = vsel %vm225_vm0, %v1715_v56, %v7237_v48  ;;  %v8487_v48 = vld [vmem:[#allocation15_spill] sm:$0xff] }
 0x21b   : > { %v2289_v44 = vmax.f32 %v5134_v53, 0.0  ;;  %1017 = vrot.lane.b32.xlu0 %v601_v15, %s5981_s6  ;;  %v2137_v12 = vpop.f32.mrb[3].mxu0  ;;  %v1716_v4 = vsel %vm331_vm1, %v6915_v60, %v8487_v48 }
 0x21c   : > { %v1640_v18 = vpop.permute.xlu1 %1639  ;;  %v2288_v11 = vmax.f32 %v2137_v12, 0.0 }
 0x21d   : > { %v1944_v46 = vsel %vm1922_vm7, %v1911_v7, %v1640_v18  ;;  %2321 = vst.msk [vmem:[#allocation2 + $0x50] sm:$0xff] %vm225_vm0, %v2289_v44  ;;  %v1002_v50 = vpop.permute.xlu0 %1001 }
 0x21e   : > { %891 = vrot.lane.b32.xlu1 %v7155_v34, %s5980_s26  ;;  %5160 = vmatmul.mubr.msk.f32.gmra.mrb[20].mxu0 %vm1964_vm8, %v1944_v46  ;;  %2320 = vst.msk [vmem:[#allocation2 + $0x48] sm:$0xff] %vm225_vm0, %v2288_v11  ;;  %v3768_v34 = vld [vmem:[%s8424_s2 + $0x38] sm:$0xff]  ;;  %v1780_v16 = vsel %vm1757_vm2, %v1747_v61, %v1002_v50  ;;  %v3777_v11 = vld [vmem:[%s8424_s2 + $0x80] sm:$0xff] }
 0x21f   : > { %1145 = vrot.lane.b32.xlu0 %v7182_v30, %s5982_s11  ;;  %v5217_v57 = vpack.c.bf16 %v3768_v34, %v3767_v10  ;;  %v2415_v10 = vld [vmem:[#allocation2 + $0x11] sm:$0xff]  ;;  %v2416_v34 = vld [vmem:[#allocation2 + $0x29] sm:$0xff] }
 0x220   : > { %v7261_v17 = vpop.permute.xlu1 %875 }
 0x221   : > { %v1130_v23 = vpop.permute.xlu0 %1129  ;;  %5273 = vmatpush1.bf16.msra.mxu1 %v5217_v57  ;;  %5218 = vmatpush1.bf16.msra.mxu0 %v5217_v57  ;;  %v1748_v18 = vsel %vm225_vm0, %v1716_v4, %v7261_v17  ;;  %v7358_v17 = vld [vmem:[#allocation2 + $0x2f] sm:$0xff]  ;;  %v5232_v57 = vpack.c.bf16 %v3778_v21, %v3777_v11 }
 0x222   : > { %1019 = vrot.lane.b32.xlu1 %v7186_v22, %s5981_s6  ;;  %5265 = vmatprep.subr.bf16.mxu1 %v5987_v40  ;;  %v3771_v22 = vld [vmem:[%s8424_s2 + $0x50] sm:$0xff]  ;;  %v1813_v36 = vsel %vm1790_vm3, %v1780_v16, %v1130_v23 }
 0x223   : > { %1273 = vrot.lane.b32.xlu0 %v7194_v9, %s5983_s16  ;;  %v5223_v39 = vpack.c.bf16 %v3772_v28, %v3771_v22  ;;  %5219 = vmatprep.subr.bf16.mxu0 %v5987_v40  ;;  %v604_v9 = vld [vmem:[#allocation2 + $0x22f] sm:$0xff] }
 0x224   : > { %v7275_v41 = vpop.permute.xlu1 %1003  ;;  %v7284_v15 = vld [vmem:[#allocation2 + $0x51] sm:$0xff] }
 0x225   : > { %v1258_v30 = vpop.permute.xlu0 %1257  ;;  %5010 = vmatprep.mubr.msk.f32.mxu1 %vm225_vm0, %v7284_v15  ;;  %5274 = vmatpush1.bf16.msra.mxu1 %v5220_v13  ;;  %v7343_v5 = vld [vmem:[#allocation2 + $0x47] sm:$0xff]  ;;  %v1781_v60 = vsel %vm1757_vm2, %v1748_v18, %v7275_v41  ;;  %v2511_v28 = vld [vmem:[#allocation2 + $0x31] sm:$0xff] }
 0x226   : > { %1147 = vrot.lane.b32.xlu1 %v7200_v49, %s5982_s11  ;;  %5266 = vmatprep.subr.bf16.mxu1 %v5987_v40  ;;  %v3773_v49 = vld [vmem:[%s8424_s2 + $0x60] sm:$0xff]  ;;  %v1846_v43 = vsel %vm1823_vm4, %v1813_v36, %v1258_v30  ;;  %v5310_v54 = vpack.i.bf16 %v7343_v5, %v7358_v17 }
 0x227   : > { %1401 = vrot.lane.b32.xlu0 %v603_v62, %s5984_s23  ;;  %5221 = vmatpush1.bf16.msra.mxu0 %v5220_v13  ;;  %v5226_v0 = vpack.c.bf16 %v3774_v3, %v3773_v49  ;;  %v7366_v62 = vld [vmem:[#allocation2 + $0x49] sm:$0xff] }
 0x228   : > { %v7291_v25 = vpop.permute.xlu1 %1131  ;;  %5222 = vmatprep.subr.bf16.mxu0 %v5987_v40  ;;  %v2575_v49 = vld [vmem:[#allocation2 + $0x50] sm:$0xff] }
 0x229   : > { %v1386_v35 = vpop.permute.xlu0 %1385  ;;  %5275 = vmatpush1.bf16.msra.mxu1 %v5223_v39  ;;  %v1814_v50 = vsel %vm1790_vm3, %v1781_v60, %v7291_v25  ;;  %v5305_v25 = vpack.i.bf16 %v2416_v34, %v2415_v10 }
 0x22a   : > { %1275 = vrot.lane.b32.xlu1 %v7221_v37, %s5983_s16  ;;  %5267 = vmatprep.subr.bf16.mxu1 %v5987_v40  ;;  %v2383_v37 = vld [vmem:[#allocation2 + $0x10] sm:$0xff]  ;;  %v1879_v33 = vsel %vm1856_vm5, %v1846_v43, %v1386_v35  ;;  %v5320_v35 = vpack.i.bf16 %v7366_v62, %v2511_v28 }
 0x22b   : > { %1529 = vrot.lane.b32.xlu0 %v635_v42, %s5985_s28  ;;  %5224 = vmatpush1.bf16.msra.mxu0 %v5223_v39  ;;  %v5300_v44 = vpack.i.bf16 %v2384_v2, %v2383_v37  ;;  %v2480_v42 = vld [vmem:[#allocation2 + $0x48] sm:$0xff]  ;;  %v8488_v2 = vld [vmem:[#allocation14_spill] sm:$0xff] }
 0x22c   : > { %v1260_v32 = vpop.permute.xlu1 %1259  ;;  %5225 = vmatprep.subr.bf16.mxu0 %v5987_v40  ;;  %v1717_v43 = vsel %vm331_vm1, %v6960_v14, %v8488_v2 }
 0x22d   : > { %v5137_v55 = vpop.f32.mrb[4].mxu0  ;;  %v1514_v24 = vpop.permute.xlu0 %1513  ;;  %5276 = vmatpush1.bf16.msra.mxu1 %v5226_v0  ;;  %v1847_v23 = vsel %vm1823_vm4, %v1814_v50, %v1260_v32 }
 0x22e   : > { %v2291_v26 = vmax.f32 %v5137_v55, 0.0  ;;  %1403 = vrot.lane.b32.xlu1 %v604_v9, %s5984_s23  ;;  %v2147_v20 = vpop.f32.mrb[5].mxu0  ;;  %5268 = vmatprep.subr.bf16.mxu1 %v5987_v40  ;;  %v1912_v53 = vsel %vm1889_vm6, %v1879_v33, %v1514_v24  ;;  %v2479_v9 = vld [vmem:[#allocation2 + $0x30] sm:$0xff] }
 0x22f   : > { %v2290_v8 = vmax.f32 %v2147_v20, 0.0  ;;  %1657 = vrot.lane.b32.xlu0 %v667_v6, %s5986_s29  ;;  %5227 = vmatpush1.bf16.msra.mxu0 %v5226_v0  ;;  %v5315_v32 = vpack.i.bf16 %v2480_v42, %v2479_v9  ;;  %v7379_v6 = vld [vmem:[#allocation2 + $0x4f] sm:$0xff] }
 0x230   : > { %2323 = vst.msk [vmem:[#allocation2 + $0x70] sm:$0xff] %vm225_vm0, %v2291_v26  ;;  %v1388_v58 = vpop.permute.xlu1 %1387  ;;  %5228 = vmatprep.subr.bf16.mxu0 %v5987_v40 }
 0x231   : > { %2322 = vst.msk [vmem:[#allocation2 + $0x68] sm:$0xff] %vm225_vm0, %v2290_v8  ;;  %v1642_v7 = vpop.permute.xlu0 %1641  ;;  %5277 = vmatpush1.bf16.msra.mxu1 %v5229_v45  ;;  %v1880_v29 = vsel %vm1856_vm5, %v1847_v23, %v1388_v58 }
 0x232   : > { %1531 = vrot.lane.b32.xlu1 %v636_v31, %s5985_s28  ;;  %v1945_v12 = vsel %vm1922_vm7, %v1912_v53, %v1642_v7  ;;  %5269 = vmatprep.subr.bf16.mxu1 %v5987_v40 }
 0x233   : > { %5162 = vmatprep.mubr.msk.f32.mxu0 %vm1964_vm8, %v1945_v12  ;;  %5301 = vrot.lane.b32.xlu0 %v5300_v44, %s5980_s26  ;;  %v8489_v44 = vld [vmem:[#allocation17_spill] sm:$0xff] }
 0x234   : > { %v1516_v46 = vpop.permute.xlu1 %1515  ;;  %5230 = vmatpush1.bf16.msra.mxu0 %v5229_v45  ;;  %v1718_v18 = vsel %vm331_vm1, %v6976_v52, %v8489_v44 }
 0x235   : > { %v878_v41 = vpop.permute.xlu0 %877  ;;  %5278 = vmatpush1.bf16.msra.mxu1 %v5232_v57  ;;  %5231 = vmatprep.subr.bf16.mxu0 %v5987_v40  ;;  %v1913_v13 = vsel %vm1889_vm6, %v1880_v29, %v1516_v46 }
 0x236   : > { %1659 = vrot.lane.b32.xlu1 %v668_v47, %s5986_s29  ;;  %v1749_v63 = vsel %vm225_vm0, %v1717_v43, %v878_v41 }
 0x237   : > { %5311 = vrot.lane.b32.xlu0 %v5310_v54, %s5984_s23  ;;  %v2577_v11 = vld [vmem:[#allocation2 + $0x70] sm:$0xff] }
 0x238   : > { %v1644_v30 = vpop.permute.xlu1 %1643  ;;  %v2576_v38 = vld [vmem:[#allocation2 + $0x68] sm:$0xff]  ;;  %5233 = vmatpush1.bf16.msra.mxu0 %v5232_v57  ;;  %v7436_v9 = vld [vmem:[#allocation2 + $0x71] sm:$0xff] }
 0x239   : > { %v1946_v22 = vsel %vm1922_vm7, %v1913_v13, %v1644_v30  ;;  %v1006_v39 = vpop.permute.xlu0 %1005  ;;  %v7376_v3 = vld [vmem:[#allocation2 + $0x67] sm:$0xff]  ;;  %v5330_v55 = vpack.i.bf16 %v2576_v38, %v2575_v49  ;;  %v7412_v10 = vld [vmem:[#allocation2 + $0x6f] sm:$0xff] }
 0x23a   : > { %5163 = vmatmul.mubr.msk.f32.gmra.mrb[22].mxu0 %vm1964_vm8, %v1946_v22  ;;  %5306 = vrot.lane.b32.xlu1 %v5305_v25, %s5982_s11  ;;  %v5325_v16 = vpack.i.bf16 %v7376_v3, %v7379_v6  ;;  %v7394_v19 = vld [vmem:[#allocation2 + $0x69] sm:$0xff]  ;;  %v1782_v33 = vsel %vm1757_vm2, %v1749_v63, %v1006_v39 }
 0x23b   : > { %5321 = vrot.lane.b32.xlu0 %v5320_v35, %s5988_s30  ;;  %v5355_v53 = vpack.i.bf16 %v7394_v19, %v7284_v15  ;;  %v7438_v38 = vld [vmem:[#allocation2 + $0xa8] ss:$2 sm:$0xff] }
 0x23c   : > { %v880_v56 = vpop.permute.xlu1 %879 }
 0x23d   : > { %v1134_v61 = vpop.permute.xlu0 %1133  ;;  %v1750_v60 = vsel %vm225_vm0, %v1718_v18, %v880_v56 }
 0x23e   : > { %5316 = vrot.lane.b32.xlu1 %v5315_v32, %s5986_s29  ;;  %v1815_v48 = vsel %vm1790_vm3, %v1782_v33, %v1134_v61 }
 0x23f   : > { %5331 = vrot.lane.b32.xlu0 %v5330_v55, %s5989_s7 }
 0x240   : > { %v1008_v0 = vpop.permute.xlu1 %1007 }
 0x241   : > { %v1262_v26 = vpop.permute.xlu0 %1261  ;;  %v1783_v21 = vsel %vm1757_vm2, %v1750_v60, %v1008_v0 }
 0x242   : > { %5326 = vrot.lane.b32.xlu1 %v5325_v16, %s5990_s8  ;;  %v1848_v14 = vsel %vm1823_vm4, %v1815_v48, %v1262_v26 }
 0x243   : > { %5341 = vrot.lane.b32.xlu0 %v5320_v35, %s5982_s11 }
 0x244   : > { %v1136_v24 = vpop.permute.xlu1 %1135 }
 0x245   : > { %v5140_v20 = vpop.f32.mrb[6].mxu0  ;;  %v1390_v8 = vpop.permute.xlu0 %1389  ;;  %v1816_v52 = vsel %vm1790_vm3, %v1783_v21, %v1136_v24  ;;  %v8490_v24 = vld [vmem:[#allocation16_spill] sm:$0xff] }
 0x246   : > { %v2293_v36 = vmax.f32 %v5140_v20, 0.0  ;;  %v2157_v31 = vpop.f32.mrb[7].mxu0  ;;  %5336 = vrot.lane.b32.xlu1 %v5315_v32, %s5980_s26  ;;  %v1881_v7 = vsel %vm1856_vm5, %v1848_v14, %v1390_v8  ;;  %v1719_v20 = vsel %vm331_vm1, %v7023_v59, %v8490_v24 }
 0x247   : > { %v2292_v37 = vmax.f32 %v2157_v31, 0.0  ;;  %5351 = vrot.lane.b32.xlu0 %v5330_v55, %s5986_s29 }
 0x248   : > { %2325 = vst.msk [vmem:[#allocation2 + $0x90] sm:$0xff] %vm225_vm0, %v2293_v36  ;;  %v1264_v58 = vpop.permute.xlu1 %1263 }
 0x249   : > { %2324 = vst.msk [vmem:[#allocation2 + $0x88] sm:$0xff] %vm225_vm0, %v2292_v37  ;;  %v1518_v45 = vpop.permute.xlu0 %1517  ;;  %v1849_v41 = vsel %vm1823_vm4, %v1816_v52, %v1264_v58 }
 0x24a   : > { %5346 = vrot.lane.b32.xlu1 %v5325_v16, %s5984_s23  ;;  %v1914_v12 = vsel %vm1889_vm6, %v1881_v7, %v1518_v45 }
 0x24c   : > { %v1392_v4 = vpop.permute.xlu1 %1391 }
 0x24d   : > { %v1646_v47 = vpop.permute.xlu0 %1645  ;;  %v1882_v29 = vsel %vm1856_vm5, %v1849_v41, %v1392_v4 }
 0x24e   : > { %5356 = vrot.lane.b32.xlu1 %v5355_v53, %s5988_s30  ;;  %v1947_v46 = vsel %vm1922_vm7, %v1914_v12, %v1646_v47 }
 0x24f   : > { %5165 = vmatprep.mubr.msk.f32.mxu0 %vm1964_vm8, %v1947_v46  ;;  %v2579_v43 = vld [vmem:[#allocation2 + $0x90] sm:$0xff] }
 0x250   : > { %v1520_v50 = vpop.permute.xlu1 %1519  ;;  %v2578_v15 = vld [vmem:[#allocation2 + $0x88] sm:$0xff] }
 0x251   : > { %v7414_v34 = vld [vmem:[#allocation2 + $0x87] sm:$0xff]  ;;  %v7417_v57 = vpack.i.bf16 %v2578_v15, %v2577_v11  ;;  %v882_v54 = vpop.permute.xlu0 %881  ;;  %v1915_v13 = vsel %vm1889_vm6, %v1882_v29, %v1520_v50  ;;  %v7452_v33 = vld [vmem:[#allocation2 + $0x8f] sm:$0xff] }
 0x252   : > { %v5360_v23 = vpack.i.bf16 %v7414_v34, %v7412_v10  ;;  %v7431_v39 = vld [vmem:[#allocation2 + $0x89] sm:$0xff]  ;;  %v1751_v8 = vsel %vm225_vm0, %v1719_v20, %v882_v54 }
 0x253   : > { %5366 = vrot.lane.b32.xlu1 %v7417_v57, %s5989_s7  ;;  %v5390_v32 = vpack.i.bf16 %v7431_v39, %v7436_v9 }
 0x254   : > { %5361 = vrot.lane.b32.xlu0 %v5360_v23, %s5990_s8  ;;  %v1648_v30 = vpop.permute.xlu1 %1647 }
 0x255   : > { %v1948_v25 = vsel %vm1922_vm7, %v1915_v13, %v1648_v30  ;;  %v1010_v22 = vpop.permute.xlu0 %1009  ;;  %v7486_v13 = vld [vmem:[#allocation2 + $0x91] sm:$0xff] }
 0x256   : > { %5166 = vmatmul.mubr.msk.f32.gmra.mrb[24].mxu0 %vm1964_vm8, %v1948_v25  ;;  %v1784_v31 = vsel %vm1757_vm2, %v1751_v8, %v1010_v22 }
 0x257   : > { %5376 = vrot.lane.b32.xlu1 %v5355_v53, %s5982_s11  ;;  %v8491_v53 = vld [vmem:[#allocation19_spill] sm:$0xff] }
 0x258   : > { %5371 = vrot.lane.b32.xlu0 %v5330_v55, %s5980_s26  ;;  %v884_v28 = vpop.permute.xlu1 %883  ;;  %v1720_v7 = vsel %vm331_vm1, %v7034_v51, %v8491_v53  ;;  %v8493_v53 = vld [vmem:[#allocation21_spill] sm:$0xff] }
 0x259   : > { %v1138_v42 = vpop.permute.xlu0 %1137  ;;  %v1752_v12 = vsel %vm225_vm0, %v1720_v7, %v884_v28 }
 0x25a   : > { %v1817_v2 = vsel %vm1790_vm3, %v1784_v31, %v1138_v42 }
 0x25b   : > { %5386 = vrot.lane.b32.xlu1 %v7417_v57, %s5986_s29 }
 0x25c   : > { %5381 = vrot.lane.b32.xlu0 %v5360_v23, %s5984_s23  ;;  %v1012_v35 = vpop.permute.xlu1 %1011 }
 0x25d   : > { %v5143_v56 = vpop.f32.mrb[8].mxu0  ;;  %v1266_v61 = vpop.permute.xlu0 %1265  ;;  %v1785_v60 = vsel %vm1757_vm2, %v1752_v12, %v1012_v35 }
 0x25e   : > { %v2295_v49 = vmax.f32 %v5143_v56, 0.0  ;;  %v2167_v55 = vpop.f32.mrb[9].mxu0  ;;  %v1850_v58 = vsel %vm1823_vm4, %v1817_v2, %v1266_v61 }
 0x25f   : > { %v2294_v0 = vmax.f32 %v2167_v55, 0.0 }
 0x260   : > { %5391 = vrot.lane.b32.xlu0 %v5390_v32, %s5988_s30  ;;  %2327 = vst.msk [vmem:[#allocation2 + $0xb0] sm:$0xff] %vm225_vm0, %v2295_v49  ;;  %v1140_v16 = vpop.permute.xlu1 %1139  ;;  %v408_v49 = vld [vmem:[#allocation2 + $0x1c7] sm:$0xff] }
 0x261   : > { %2326 = vst.msk [vmem:[#allocation2 + $0xa8] sm:$0xff] %vm225_vm0, %v2294_v0  ;;  %v1394_v26 = vpop.permute.xlu0 %1393  ;;  %v1818_v11 = vsel %vm1790_vm3, %v1785_v60, %v1140_v16  ;;  %v8492_v0 = vld [vmem:[#allocation18_spill] sm:$0xff] }
 0x262   : > { %v1883_v14 = vsel %vm1856_vm5, %v1850_v58, %v1394_v26  ;;  %v1721_v16 = vsel %vm331_vm1, %v408_v49, %v8492_v0  ;;  %v409_v58 = vld [vmem:[#allocation2 + $0x1cf] sm:$0xff] }
 0x263   : > { %v1722_v7 = vsel %vm331_vm1, %v409_v58, %v8493_v53  ;;  %v411_v53 = vld [vmem:[#allocation2 + $0x1ef] sm:$0xff] }
 0x264   : > { %v1268_v36 = vpop.permute.xlu1 %1267 }
 0x265   : > { %v1522_v37 = vpop.permute.xlu0 %1521  ;;  %v1851_v51 = vsel %vm1823_vm4, %v1818_v11, %v1268_v36 }
 0x266   : > { %v1916_v44 = vsel %vm1889_vm6, %v1883_v14, %v1522_v37 }
 0x267   : > { %v2581_v55 = vld [vmem:[#allocation2 + $0xb0] sm:$0xff] }
 0x268   : > { %v1396_v63 = vpop.permute.xlu1 %1395  ;;  %v7454_v45 = vld [vmem:[#allocation2 + $0xa7] sm:$0xff]  ;;  %v7495_v20 = vld [vmem:[#allocation2 + $0xaf] sm:$0xff] }
 0x269   : > { %v2580_v48 = vld [vmem:[#allocation2 + $0xa8] sm:$0xff]  ;;  %v5395_v59 = vpack.i.bf16 %v7454_v45, %v7452_v33  ;;  %v1650_v18 = vpop.permute.xlu0 %1649  ;;  %v1884_v50 = vsel %vm1856_vm5, %v1851_v51, %v1396_v63 }
 0x26a   : > { %v7459_v4 = vpack.i.bf16 %v2580_v48, %v2579_v43  ;;  %v1949_v47 = vsel %vm1922_vm7, %v1916_v44, %v1650_v18  ;;  %v7481_v54 = vld [vmem:[#allocation2 + $0xa9] sm:$0xff] }
 0x26b   : > { %5396 = vrot.lane.b32.xlu1 %v5395_v59, %s5990_s8  ;;  %5168 = vmatprep.mubr.msk.f32.mxu0 %vm1964_vm8, %v1949_v47  ;;  %v5425_v30 = vpack.i.bf16 %v7481_v54, %v7486_v13 }
 0x26c   : > { %5401 = vrot.lane.b32.xlu0 %v7459_v4, %s5989_s7  ;;  %v1524_v46 = vpop.permute.xlu1 %1523 }
 0x26d   : > { %v886_v21 = vpop.permute.xlu0 %885  ;;  %v1917_v15 = vsel %vm1889_vm6, %v1884_v50, %v1524_v46 }
 0x26e   : > { %v1753_v8 = vsel %vm225_vm0, %v1721_v16, %v886_v21 }
 0x26f   : > { %5406 = vrot.lane.b32.xlu1 %v7417_v57, %s5980_s26 }
 0x270   : > { %5411 = vrot.lane.b32.xlu0 %v5390_v32, %s5982_s11  ;;  %v1652_v52 = vpop.permute.xlu1 %1651 }
 0x271   : > { %v1950_v23 = vsel %vm1922_vm7, %v1917_v15, %v1652_v52  ;;  %v1014_v41 = vpop.permute.xlu0 %1013 }
 0x272   : > { %5169 = vmatmul.mubr.msk.f32.gmra.mrb[26].mxu0 %vm1964_vm8, %v1950_v23  ;;  %v1786_v2 = vsel %vm1757_vm2, %v1753_v8, %v1014_v41  ;;  %v7530_v23 = vld [vmem:[#allocation2 + $0xb1] sm:$0xff] }
 0x273   : > { %5416 = vrot.lane.b32.xlu1 %v5395_v59, %s5984_s23  ;;  %v7532_v41 = vld [vmem:[#allocation2 + $0xe8] ss:$2 sm:$0xff] }
 0x274   : > { %5421 = vrot.lane.b32.xlu0 %v7459_v4, %s5986_s29  ;;  %v888_v29 = vpop.permute.xlu1 %887 }
 0x275   : > { %v5146_v57 = vpop.f32.mrb[10].mxu0  ;;  %v1142_v22 = vpop.permute.xlu0 %1141  ;;  %v1754_v12 = vsel %vm225_vm0, %v1722_v7, %v888_v29 }
 0x276   : > { %v2297_v25 = vmax.f32 %v5146_v57, 0.0  ;;  %v2177_v28 = vpop.f32.mrb[11].mxu0  ;;  %v1819_v63 = vsel %vm1790_vm3, %v1786_v2, %v1142_v22 }
 0x277   : > { %v2296_v42 = vmax.f32 %v2177_v28, 0.0  ;;  %5426 = vrot.lane.b32.xlu1 %v5425_v30, %s5988_s30 }
 0x278   : > { %2329 = vst.msk [vmem:[#allocation2 + $0xd0] sm:$0xff] %vm225_vm0, %v2297_v25  ;;  %v1016_v35 = vpop.permute.xlu1 %1015 }
 0x279   : > { %2328 = vst.msk [vmem:[#allocation2 + $0xc8] sm:$0xff] %vm225_vm0, %v2296_v42  ;;  %v1270_v56 = vpop.permute.xlu0 %1269  ;;  %v1787_v60 = vsel %vm1757_vm2, %v1754_v12, %v1016_v35 }
 0x27a   : > { %v1852_v48 = vsel %vm1823_vm4, %v1819_v63, %v1270_v56 }
 0x27c   : > { %v1144_v32 = vpop.permute.xlu1 %1143 }
 0x27d   : > { %v1398_v61 = vpop.permute.xlu0 %1397  ;;  %v1820_v11 = vsel %vm1790_vm3, %v1787_v60, %v1144_v32 }
 0x27e   : > { %v1885_v59 = vsel %vm1856_vm5, %v1852_v48, %v1398_v61 }
 0x27f   : > { %v2583_v61 = vld [vmem:[#allocation2 + $0xd0] sm:$0xff] }
 0x280   : > { %v1272_v26 = vpop.permute.xlu1 %1271  ;;  %v2582_v24 = vld [vmem:[#allocation2 + $0xc8] sm:$0xff] }
 0x281   : > { %v7497_v36 = vld [vmem:[#allocation2 + $0xc7] sm:$0xff]  ;;  %v7500_v31 = vpack.i.bf16 %v2582_v24, %v2581_v55  ;;  %v1526_v43 = vpop.permute.xlu0 %1525  ;;  %v1853_v51 = vsel %vm1823_vm4, %v1820_v11, %v1272_v26  ;;  %v7541_v0 = vld [vmem:[#allocation2 + $0xcf] sm:$0xff] }
 0x282   : > { %v5430_v37 = vpack.i.bf16 %v7497_v36, %v7495_v20  ;;  %v1918_v44 = vsel %vm1889_vm6, %v1885_v59, %v1526_v43  ;;  %v7523_v50 = vld [vmem:[#allocation2 + $0xc9] sm:$0xff] }
 0x283   : > { %5436 = vrot.lane.b32.xlu1 %v7500_v31, %s5989_s7  ;;  %v410_v24 = vld [vmem:[#allocation2 + $0x1e7] sm:$0xff] }
 0x284   : > { %5431 = vrot.lane.b32.xlu0 %v5430_v37, %s5990_s8  ;;  %v1400_v14 = vpop.permute.xlu1 %1399  ;;  %v8494_v43 = vld [vmem:[#allocation20_spill] sm:$0xff] }
 0x285   : > { %v1654_v18 = vpop.permute.xlu0 %1653  ;;  %v1886_v15 = vsel %vm1856_vm5, %v1853_v51, %v1400_v14  ;;  %v1723_v58 = vsel %vm331_vm1, %v410_v24, %v8494_v43  ;;  %v2351_v24 = vld [vmem:[#allocation2 + $0xf] sm:$0xff] }
 0x286   : > { %v1951_v47 = vsel %vm1922_vm7, %v1918_v44, %v1654_v18 }
 0x287   : > { %5446 = vrot.lane.b32.xlu1 %v5425_v30, %s5982_s11  ;;  %5171 = vmatprep.mubr.msk.f32.mxu0 %vm1964_vm8, %v1951_v47  ;;  %v5460_v30 = vpack.i.bf16 %v7523_v50, %v7530_v23  ;;  %v8495_v47 = vld [vmem:[#allocation22_spill] sm:$0xff] }
 0x288   : > { %5441 = vrot.lane.b32.xlu0 %v7459_v4, %s5980_s26  ;;  %v1528_v46 = vpop.permute.xlu1 %1527  ;;  %v1724_v60 = vsel %vm331_vm1, %v411_v53, %v8495_v47 }
 0x289   : > { %v890_v21 = vpop.permute.xlu0 %889  ;;  %v1919_v4 = vsel %vm1889_vm6, %v1886_v15, %v1528_v46 }
 0x28a   : > { %v1755_v48 = vsel %vm225_vm0, %v1723_v58, %v890_v21 }
 0x28b   : > { %5456 = vrot.lane.b32.xlu1 %v7500_v31, %s5986_s29 }
 0x28c   : > { %5451 = vrot.lane.b32.xlu0 %v5430_v37, %s5984_s23  ;;  %v1656_v52 = vpop.permute.xlu1 %1655 }
 0x28d   : > { %v1952_v29 = vsel %vm1922_vm7, %v1919_v4, %v1656_v52  ;;  %v5149_v57 = vpop.f32.mrb[12].mxu0  ;;  %v1018_v22 = vpop.permute.xlu0 %1017  ;;  %v7574_v52 = vld [vmem:[#allocation2 + $0xd1] sm:$0xff] }
 0x28e   : > { %v2299_v25 = vmax.f32 %v5149_v57, 0.0  ;;  %v2187_v28 = vpop.f32.mrb[13].mxu0  ;;  %5172 = vmatmul.mubr.msk.f32.gmra.mrb[28].mxu0 %vm1964_vm8, %v1952_v29  ;;  %v1788_v14 = vsel %vm1757_vm2, %v1755_v48, %v1018_v22 }
 0x28f   : > { %v2298_v42 = vmax.f32 %v2187_v28, 0.0 }
 0x290   : > { %5461 = vrot.lane.b32.xlu0 %v5460_v30, %s5988_s30  ;;  %2331 = vst.msk [vmem:[#allocation2 + $0xf0] sm:$0xff] %vm225_vm0, %v2299_v25  ;;  %v892_v35 = vpop.permute.xlu1 %891 }
 0x291   : > { %2330 = vst.msk [vmem:[#allocation2 + $0xe8] sm:$0xff] %vm225_vm0, %v2298_v42  ;;  %v1146_v56 = vpop.permute.xlu0 %1145  ;;  %v1756_v21 = vsel %vm225_vm0, %v1724_v60, %v892_v35 }
 0x292   : > { %v1821_v7 = vsel %vm1790_vm3, %v1788_v14, %v1146_v56 }
 0x294   : > { %v1020_v32 = vpop.permute.xlu1 %1019 }
 0x295   : > { %v1274_v49 = vpop.permute.xlu0 %1273 }
 0x296   : > { %v1854_v44 = vsel %vm1823_vm4, %v1821_v7, %v1274_v49 }
 0x297   : > { %v2585_v7 = vld [vmem:[#allocation2 + $0xf0] sm:$0xff] }
 0x298   : > { %v1148_v55 = vpop.permute.xlu1 %1147  ;;  %v7543_v16 = vld [vmem:[#allocation2 + $0xe7] sm:$0xff] }
 0x299   : > { %v2584_v26 = vld [vmem:[#allocation2 + $0xe8] sm:$0xff]  ;;  %v5465_v8 = vpack.i.bf16 %v7543_v16, %v7541_v0  ;;  %v1402_v2 = vpop.permute.xlu0 %1401 }
 0x29a   : > { %v7547_v37 = vpack.i.bf16 %v2584_v26, %v2583_v61  ;;  %v1887_v12 = vsel %vm1856_vm5, %v1854_v44, %v1402_v2  ;;  %v7565_v51 = vld [vmem:[#allocation2 + $0xe9] sm:$0xff] }
 0x29b   : > { %5466 = vrot.lane.b32.xlu1 %v5465_v8, %s5990_s8 }
 0x29c   : > { %5471 = vrot.lane.b32.xlu0 %v7547_v37, %s5989_s7  ;;  %v1276_v63 = vpop.permute.xlu1 %1275 }
 0x29d   : > { %v1530_v59 = vpop.permute.xlu0 %1529 }
 0x29e   : > { %v1920_v46 = vsel %vm1889_vm6, %v1887_v12, %v1530_v59 }
 0x29f   : > { %5476 = vrot.lane.b32.xlu1 %v7500_v31, %s5980_s26  ;;  %v1789_v31 = vsel %vm1757_vm2, %v1756_v21, %v1020_v32 }
 0x2a0   : > { %5481 = vrot.lane.b32.xlu0 %v5460_v30, %s5982_s11  ;;  %v1404_v18 = vpop.permute.xlu1 %1403  ;;  %v1822_v29 = vsel %vm1790_vm3, %v1789_v31, %v1148_v55  ;;  %v5495_v30 = vpack.i.bf16 %v7565_v51, %v7574_v52 }
 0x2a1   : > { %v1658_v11 = vpop.permute.xlu0 %1657  ;;  %v1855_v25 = vsel %vm1823_vm4, %v1822_v29, %v1276_v63  ;;  %v7589_v63 = vld [vmem:[#allocation2 + $0x27] sm:$0xff] }
 0x2a2   : > { %v1953_v15 = vsel %vm1922_vm7, %v1920_v46, %v1658_v11  ;;  %v1888_v35 = vsel %vm1856_vm5, %v1855_v25, %v1404_v18 }
 0x2a3   : > { %5486 = vrot.lane.b32.xlu1 %v5465_v8, %s5984_s23  ;;  %5174 = vmatprep.mubr.msk.f32.mxu0 %vm1964_vm8, %v1953_v15 }
 0x2a4   : > { %5491 = vrot.lane.b32.xlu0 %v7547_v37, %s5986_s29  ;;  %v1532_v4 = vpop.permute.xlu1 %1531 }
 0x2a5   : > { %v5152_v57 = vpop.f32.mrb[14].mxu0  ;;  %v5302_v42 = vpop.permute.xlu0 %5301  ;;  %v1921_v32 = vsel %vm1889_vm6, %v1888_v35, %v1532_v4 }
 0x2a6   : > { %v2301_v22 = vmax.f32 %v5152_v57, 0.0  ;;  %v2197_v28 = vpop.f32.mrb[15].mxu0  ;;  %v5303_v55 = vunpack.i.l.bf16 %v5302_v42  ;;  %v5304_v8 = vunpack.i.h.bf16 %v5302_v42 }
 0x2a7   : > { %v2300_v56 = vmax.f32 %v2197_v28, 0.0  ;;  %5496 = vrot.lane.b32.xlu1 %v5495_v30, %s5988_s30 }
 0x2a8   : > { %2333 = vst.msk [vmem:[#allocation2 + $0x110] sm:$0xff] %vm225_vm0, %v2301_v22  ;;  %v1660_v49 = vpop.permute.xlu1 %1659  ;;  %v3535_v48 = vsel %vm225_vm0, %v2351_v24, %v5303_v55  ;;  %v3536_v59 = vsel %vm225_vm0, %v7589_v63, %v5304_v8 }
 0x2a9   : > { %2332 = vst.msk [vmem:[#allocation2 + $0x108] sm:$0xff] %vm225_vm0, %v2300_v56  ;;  %v1954_v61 = vsel %vm1922_vm7, %v1921_v32, %v1660_v49  ;;  %v5312_v26 = vpop.permute.xlu0 %5311 }
 0x2aa   : > { %5175 = vmatmul.mubr.msk.f32.gmra.mrb[30].mxu0 %vm1964_vm8, %v1954_v61  ;;  %v5313_v44 = vunpack.i.l.bf16 %v5312_v26  ;;  %v5314_v31 = vunpack.i.h.bf16 %v5312_v26 }
 0x2ab   : > { %5009 = vmatprep.mubr.msk.f32.mxu0 %vm225_vm0, %v7366_v62  ;;  %v7596_v62 = vld [vmem:[#allocation2 + $0xef] sm:$0xff] }
 0x2ac   : > { %v5307_v2 = vpop.permute.xlu1 %5306 }
 0x2ad   : > { %v5309_v43 = vunpack.i.h.bf16 %v5307_v2  ;;  %v5308_v58 = vunpack.i.l.bf16 %v5307_v2  ;;  %v5322_v14 = vpop.permute.xlu0 %5321 }
 0x2ae   : > { %v5323_v25 = vunpack.i.l.bf16 %v5322_v14  ;;  %v5324_v32 = vunpack.i.h.bf16 %v5322_v14 }
 0x2af   : > { %v3567_v53 = vsel %vm1790_vm3, %v3535_v48, %v5308_v58  ;;  %v3568_v18 = vsel %vm1790_vm3, %v3536_v59, %v5309_v43 }
 0x2b0   : > { %v5317_v12 = vpop.permute.xlu1 %5316  ;;  %v2586_v47 = vld [vmem:[#allocation2 + $0x108] sm:$0xff]  ;;  %v3599_v4 = vsel %vm1856_vm5, %v3567_v53, %v5313_v44  ;;  %v3600_v22 = vsel %vm1856_vm5, %v3568_v18, %v5314_v31  ;;  %v7627_v53 = vld [vmem:[#allocation2 + $0xf1] sm:$0xff] }
 0x2b1   : > { %v7598_v60 = vld [vmem:[#allocation2 + $0x107] sm:$0xff]  ;;  %v5319_v46 = vunpack.i.h.bf16 %v5317_v12  ;;  %v5318_v11 = vunpack.i.l.bf16 %v5317_v12  ;;  %v7600_v21 = vpack.i.bf16 %v2586_v47, %v2585_v7  ;;  %v5332_v57 = vpop.permute.xlu0 %5331 }
 0x2b2   : > { %v5500_v15 = vpack.i.bf16 %v7598_v60, %v7596_v62  ;;  %v5333_v49 = vunpack.i.l.bf16 %v5332_v57  ;;  %v5334_v43 = vunpack.i.h.bf16 %v5332_v57  ;;  %v7621_v58 = vld [vmem:[#allocation2 + $0x109] sm:$0xff] }
 0x2b3   : > { %v3631_v29 = vsel %vm1922_vm7, %v3599_v4, %v5318_v11  ;;  %5506 = vrot.lane.b32.xlu1 %v7600_v21, %s5989_s7  ;;  %v3632_v42 = vsel %vm1922_vm7, %v3600_v22, %v5319_v46  ;;  %v7629_v7 = vld [vmem:[#allocation2 + $0x128] ss:$2 sm:$0xff] }
 0x2b4   : > { %5501 = vrot.lane.b32.xlu0 %v5500_v15, %s5990_s8  ;;  %v5327_v28 = vpop.permute.xlu1 %5326  ;;  %v3664_v61 = vsel %vm3662_vm9, %v3631_v29, %v5323_v25  ;;  %v3665_v8 = vsel %vm3662_vm9, %v3632_v42, %v5324_v32 }
 0x2b5   : > { %v5329_v35 = vunpack.i.h.bf16 %v5327_v28  ;;  %v5328_v56 = vunpack.i.l.bf16 %v5327_v28 }
 0x2b7   : > { %5516 = vrot.lane.b32.xlu1 %v5495_v30, %s5982_s11  ;;  %v3697_v55 = vsel %vm3695_vm10, %v3664_v61, %v5328_v56  ;;  %v3698_v2 = vsel %vm3695_vm10, %v3665_v8, %v5329_v35  ;;  %v5342_v30 = vpop.permute.xlu0 %5341 }
 0x2b8   : > { %5511 = vrot.lane.b32.xlu0 %v7547_v37, %s5980_s26  ;;  %v5337_v26 = vpop.permute.xlu1 %5336  ;;  %v3730_v24 = vsel %vm3728_vm11, %v3697_v55, %v5333_v49  ;;  %v3731_v59 = vsel %vm3728_vm11, %v3698_v2, %v5334_v43  ;;  %v5344_v57 = vunpack.i.h.bf16 %v5342_v30  ;;  %v2587_v2 = vld [vmem:[#allocation2 + $0x110] sm:$0xff] }
 0x2b9   : > { %3945 = vmatmul.mubr.f32.vlgmr.msra.gmra.mrb[0].mxu1 %v3730_v24  ;;  %v5338_v48 = vunpack.i.l.bf16 %v5337_v26  ;;  %v5339_v37 = vunpack.i.h.bf16 %v5337_v26 }
 0x2ba   : > { %5011 = vmatprep.mubr.msk.f32.mxu1 %vm225_vm0, %v7394_v19  ;;  %v5530_v19 = vpack.i.bf16 %v7621_v58, %v7627_v53 }
 0x2bb   : > { %5526 = vrot.lane.b32.xlu1 %v7600_v21, %s5986_s29  ;;  %v3537_v47 = vsel %vm225_vm0, %v7358_v17, %v5338_v48  ;;  %v3538_v31 = vsel %vm225_vm0, %v7343_v5, %v5339_v37  ;;  %v5352_v25 = vpop.permute.xlu0 %5351  ;;  %v7650_v48 = vld [vmem:[#allocation2 + $0x10f] sm:$0xff] }
 0x2bc   : > { %5521 = vrot.lane.b32.xlu0 %v5500_v15, %s5984_s23  ;;  %v5347_v14 = vpop.permute.xlu1 %5346  ;;  %v5343_v15 = vunpack.i.l.bf16 %v5342_v30  ;;  %v3570_v17 = vsel %vm1790_vm3, %v3538_v31, %v5344_v57  ;;  %v5353_v42 = vunpack.i.l.bf16 %v5352_v25  ;;  %v5354_v5 = vunpack.i.h.bf16 %v5352_v25  ;;  %v7677_v25 = vld [vmem:[#allocation2 + $0x111] sm:$0xff] }
 0x2bd   : > { %v5155_v44 = vpop.f32.mrb[16].mxu0  ;;  %3950 = vmatmul.mubr.f32.gmra.mrb[2].mxu1 %v3731_v59  ;;  %v5348_v46 = vunpack.i.l.bf16 %v5347_v14  ;;  %v5349_v4 = vunpack.i.h.bf16 %v5347_v14 }
 0x2be   : > { %v2303_v18 = vmax.f32 %v5155_v44, 0.0  ;;  %v2207_v12 = vpop.f32.mrb[17].mxu0  ;;  %5012 = vmatprep.mubr.msk.f32.mxu1 %vm225_vm0, %v7436_v9  ;;  %v3569_v9 = vsel %vm1790_vm3, %v3537_v47, %v5343_v15 }
 0x2bf   : > { %v2302_v11 = vmax.f32 %v2207_v12, 0.0  ;;  %v3601_v22 = vsel %vm1856_vm5, %v3569_v9, %v5348_v46  ;;  %v3602_v35 = vsel %vm1856_vm5, %v3570_v17, %v5349_v4 }
 0x2c0   : > { %5531 = vrot.lane.b32.xlu0 %v5530_v19, %s5988_s30  ;;  %2335 = vst.msk [vmem:[#allocation2 + $0x130] sm:$0xff] %vm225_vm0, %v2303_v18  ;;  %v5357_v29 = vpop.permute.xlu1 %5356  ;;  %v3633_v24 = vsel %vm1922_vm7, %v3601_v22, %v5353_v42  ;;  %v3634_v43 = vsel %vm1922_vm7, %v3602_v35, %v5354_v5 }
 0x2c1   : > { %2334 = vst.msk [vmem:[#allocation2 + $0x128] sm:$0xff] %vm225_vm0, %v2302_v11  ;;  %v5358_v28 = vunpack.i.l.bf16 %v5357_v29  ;;  %v5359_v56 = vunpack.i.h.bf16 %v5357_v29 }
 0x2c3   : > { %v3666_v8 = vsel %vm3662_vm9, %v3633_v24, %v5358_v28  ;;  %v3667_v59 = vsel %vm3662_vm9, %v3634_v43, %v5359_v56 }
 0x2c5   : > { %v5367_v32 = vpop.permute.xlu1 %5366 }
 0x2c6   : > { %v5362_v49 = vpop.permute.xlu0 %5361  ;;  %v5368_v61 = vunpack.i.l.bf16 %v5367_v32  ;;  %v5369_v44 = vunpack.i.h.bf16 %v5367_v32 }
 0x2c7   : > { %v5364_v55 = vunpack.i.h.bf16 %v5362_v49  ;;  %v5363_v26 = vunpack.i.l.bf16 %v5362_v49 }
 0x2c8   : > { %v7652_v37 = vld [vmem:[#allocation2 + $0x127] sm:$0xff] }
 0x2c9   : > { %v3699_v30 = vsel %vm3695_vm10, %v3666_v8, %v5363_v26  ;;  %v2588_v14 = vld [vmem:[#allocation2 + $0x128] sm:$0xff]  ;;  %v5535_v12 = vpack.i.bf16 %v7652_v37, %v7650_v48  ;;  %v3700_v46 = vsel %vm3695_vm10, %v3667_v59, %v5364_v55  ;;  %v5377_v31 = vpop.permute.xlu1 %5376 }
 0x2ca   : > { %v3732_v18 = vsel %vm3728_vm11, %v3699_v30, %v5368_v61  ;;  %v7658_v47 = vpack.i.bf16 %v2588_v14, %v2587_v2  ;;  %v5372_v11 = vpop.permute.xlu0 %5371  ;;  %v3733_v15 = vsel %vm3728_vm11, %v3700_v46, %v5369_v44  ;;  %v7672_v29 = vld [vmem:[#allocation2 + $0x129] sm:$0xff]  ;;  %v5379_v22 = vunpack.i.h.bf16 %v5377_v31 }
 0x2cb   : > { %3955 = vmatmul.mubr.f32.gmra.mrb[4].mxu1 %v3732_v18  ;;  %5536 = vrot.lane.b32.xlu1 %v5535_v12, %s5990_s8  ;;  %v5373_v57 = vunpack.i.l.bf16 %v5372_v11  ;;  %v2589_v46 = vld [vmem:[#allocation2 + $0x130] sm:$0xff] }
 0x2cc   : > { %5541 = vrot.lane.b32.xlu0 %v7658_v47, %s5989_s7  ;;  %5013 = vmatprep.mubr.msk.f32.mxu1 %vm225_vm0, %v7431_v39  ;;  %v5374_v39 = vunpack.i.h.bf16 %v5372_v11 }
 0x2cd   : > { %v3539_v28 = vsel %vm225_vm0, %v7379_v6, %v5373_v57  ;;  %v5387_v42 = vpop.permute.xlu1 %5386 }
 0x2ce   : > { %v5382_v4 = vpop.permute.xlu0 %5381  ;;  %v3540_v5 = vsel %vm225_vm0, %v7376_v3, %v5374_v39  ;;  %v5388_v61 = vunpack.i.l.bf16 %v5387_v42  ;;  %v5389_v26 = vunpack.i.h.bf16 %v5387_v42 }
 0x2cf   : > { %3960 = vmatmul.mubr.f32.gmra.mrb[6].mxu1 %v3733_v15  ;;  %5546 = vrot.lane.b32.xlu1 %v7600_v21, %s5980_s26  ;;  %v5565_v21 = vpack.i.bf16 %v7672_v29, %v7677_v25  ;;  %v5383_v35 = vunpack.i.l.bf16 %v5382_v4  ;;  %v5384_v32 = vunpack.i.h.bf16 %v5382_v4  ;;  %v3572_v6 = vsel %vm1790_vm3, %v3540_v5, %v5379_v22  ;;  %v7696_v4 = vld [vmem:[#allocation2 + $0x12f] sm:$0xff] }
 0x2d0   : > { %5551 = vrot.lane.b32.xlu0 %v5530_v19, %s5982_s11  ;;  %5014 = vmatprep.mubr.msk.f32.mxu1 %vm225_vm0, %v7486_v13  ;;  %v5378_v19 = vunpack.i.l.bf16 %v5377_v31 }
 0x2d1   : > { %v3604_v2 = vsel %vm1856_vm5, %v3572_v6, %v5384_v32 }
 0x2d2   : > { %v5392_v49 = vpop.permute.xlu0 %5391  ;;  %v3571_v55 = vsel %vm1790_vm3, %v3539_v28, %v5378_v19  ;;  %v3636_v11 = vsel %vm1922_vm7, %v3604_v2, %v5389_v26 }
 0x2d3   : > { %5556 = vrot.lane.b32.xlu1 %v5535_v12, %s5984_s23  ;;  %v3603_v24 = vsel %vm1856_vm5, %v3571_v55, %v5383_v35  ;;  %v5393_v8 = vunpack.i.l.bf16 %v5392_v49  ;;  %v5394_v43 = vunpack.i.h.bf16 %v5392_v49 }
 0x2d4   : > { %5561 = vrot.lane.b32.xlu0 %v7658_v47, %s5986_s29  ;;  %v3635_v18 = vsel %vm1922_vm7, %v3603_v24, %v5388_v61  ;;  %v7730_v24 = vld [vmem:[#allocation2 + $0x168] ss:$2 sm:$0xff] }
 0x2d5   : > { %v5158_v9 = vpop.f32.mrb[18].mxu0  ;;  %v3668_v12 = vsel %vm3662_vm9, %v3635_v18, %v5393_v8  ;;  %v3669_v39 = vsel %vm3662_vm9, %v3636_v11, %v5394_v43 }
 0x2d6   : > { %v2305_v17 = vmax.f32 %v5158_v9, 0.0  ;;  %v2217_v13 = vpop.f32.mrb[19].mxu0 }
 0x2d7   : > { %v2304_v56 = vmax.f32 %v2217_v13, 0.0  ;;  %5566 = vrot.lane.b32.xlu1 %v5565_v21, %s5988_s30 }
 0x2d8   : > { %2337 = vst.msk [vmem:[#allocation2 + $0x150] sm:$0xff] %vm225_vm0, %v2305_v17 }
 0x2d9   : > { %2336 = vst.msk [vmem:[#allocation2 + $0x148] sm:$0xff] %vm225_vm0, %v2304_v56 }
 0x2dd   : > { %v5397_v30 = vpop.permute.xlu1 %5396 }
 0x2de   : > { %v5402_v3 = vpop.permute.xlu0 %5401  ;;  %v5399_v14 = vunpack.i.h.bf16 %v5397_v30  ;;  %v5398_v59 = vunpack.i.l.bf16 %v5397_v30 }
 0x2df   : > { %v5403_v44 = vunpack.i.l.bf16 %v5402_v3  ;;  %v5404_v9 = vunpack.i.h.bf16 %v5402_v3 }
 0x2e0   : > { %v3701_v15 = vsel %vm3695_vm10, %v3668_v12, %v5398_v59  ;;  %v2590_v31 = vld [vmem:[#allocation2 + $0x148] sm:$0xff]  ;;  %v3702_v22 = vsel %vm3695_vm10, %v3669_v39, %v5399_v14 }
 0x2e1   : > { %v7698_v57 = vld [vmem:[#allocation2 + $0x147] sm:$0xff]  ;;  %v3734_v19 = vsel %vm3728_vm11, %v3701_v15, %v5403_v44  ;;  %v7702_v17 = vpack.i.bf16 %v2590_v31, %v2589_v46  ;;  %v5407_v28 = vpop.permute.xlu1 %5406  ;;  %v3735_v42 = vsel %vm3728_vm11, %v3702_v22, %v5404_v9 }
 0x2e2   : > { %v5570_v13 = vpack.i.bf16 %v7698_v57, %v7696_v4  ;;  %3965 = vmatmul.mubr.f32.gmra.mrb[8].mxu1 %v3734_v19  ;;  %v5412_v35 = vpop.permute.xlu0 %5411  ;;  %v7718_v5 = vld [vmem:[#allocation2 + $0x149] sm:$0xff]  ;;  %v5408_v32 = vunpack.i.l.bf16 %v5407_v28  ;;  %v5409_v49 = vunpack.i.h.bf16 %v5407_v28 }
 0x2e3   : > { %5576 = vrot.lane.b32.xlu1 %v7702_v17, %s5989_s7  ;;  %5015 = vmatprep.mubr.msk.f32.mxu1 %vm225_vm0, %v7481_v54  ;;  %v7723_v54 = vld [vmem:[#allocation2 + $0x131] sm:$0xff]  ;;  %v5414_v26 = vunpack.i.h.bf16 %v5412_v35 }
 0x2e4   : > { %5571 = vrot.lane.b32.xlu0 %v5570_v13, %s5990_s8  ;;  %v3542_v8 = vsel %vm225_vm0, %v7414_v34, %v5409_v49 }
 0x2e5   : > { %v5417_v56 = vpop.permute.xlu1 %5416  ;;  %v3574_v12 = vsel %vm1790_vm3, %v3542_v8, %v5414_v26 }
 0x2e6   : > { %3970 = vmatmul.mubr.f32.gmra.mrb[10].mxu1 %v3735_v42  ;;  %v5418_v61 = vunpack.i.l.bf16 %v5417_v56  ;;  %v5422_v55 = vpop.permute.xlu0 %5421  ;;  %v5419_v2 = vunpack.i.h.bf16 %v5417_v56 }
 0x2e7   : > { %5586 = vrot.lane.b32.xlu1 %v5565_v21, %s5982_s11  ;;  %5016 = vmatprep.mubr.msk.f32.mxu1 %vm225_vm0, %v7530_v23  ;;  %v5600_v21 = vpack.i.bf16 %v7718_v5, %v7723_v54  ;;  %v3541_v23 = vsel %vm225_vm0, %v7412_v10, %v5408_v32  ;;  %v5423_v3 = vunpack.i.l.bf16 %v5422_v55  ;;  %v5424_v46 = vunpack.i.h.bf16 %v5422_v55 }
 0x2e8   : > { %5581 = vrot.lane.b32.xlu0 %v7658_v47, %s5980_s26  ;;  %v5413_v47 = vunpack.i.l.bf16 %v5412_v35  ;;  %v3606_v11 = vsel %vm1856_vm5, %v3574_v12, %v5419_v2 }
 0x2e9   : > { %v5427_v6 = vpop.permute.xlu1 %5426  ;;  %v3638_v28 = vsel %vm1922_vm7, %v3606_v11, %v5424_v46  ;;  %v7773_v46 = vld [vmem:[#allocation2 + $0x151] sm:$0xff] }
 0x2ea   : > { %v3573_v30 = vsel %vm1790_vm3, %v3541_v23, %v5413_v47  ;;  %v5428_v44 = vunpack.i.l.bf16 %v5427_v6  ;;  %v5429_v15 = vunpack.i.h.bf16 %v5427_v6  ;;  %v2591_v47 = vld [vmem:[#allocation2 + $0x150] sm:$0xff] }
 0x2eb   : > { %5596 = vrot.lane.b32.xlu1 %v7702_v17, %s5986_s29  ;;  %v3605_v10 = vsel %vm1856_vm5, %v3573_v30, %v5418_v61  ;;  %v7749_v61 = vld [vmem:[#allocation2 + $0x14f] sm:$0xff] }
 0x2ec   : > { %5591 = vrot.lane.b32.xlu0 %v5570_v13, %s5984_s23  ;;  %v3637_v39 = vsel %vm1922_vm7, %v3605_v10, %v5423_v3  ;;  %v3671_v32 = vsel %vm3662_vm9, %v3638_v28, %v5429_v15 }
 0x2ed   : > { %v3670_v22 = vsel %vm3662_vm9, %v3637_v39, %v5428_v44 }
 0x2f0   : > { %5601 = vrot.lane.b32.xlu0 %v5600_v21, %s5988_s30 }
 0x2f1   : > { %v5161_v43 = vpop.f32.mrb[20].mxu0 }
 0x2f2   : > { %v2307_v14 = vmax.f32 %v5161_v43, 0.0  ;;  %v2227_v59 = vpop.f32.mrb[21].mxu0 }
 0x2f3   : > { %v2306_v18 = vmax.f32 %v2227_v59, 0.0 }
 0x2f4   : > { %2339 = vst.msk [vmem:[#allocation2 + $0x170] sm:$0xff] %vm225_vm0, %v2307_v14 }
 0x2f5   : > { %2338 = vst.msk [vmem:[#allocation2 + $0x168] sm:$0xff] %vm225_vm0, %v2306_v18  ;;  %v5437_v34 = vpop.permute.xlu1 %5436 }
 0x2f6   : > { %v5432_v31 = vpop.permute.xlu0 %5431  ;;  %v5438_v9 = vunpack.i.l.bf16 %v5437_v34  ;;  %v5439_v35 = vunpack.i.h.bf16 %v5437_v34 }
 0x2f7   : > { %v5434_v19 = vunpack.i.h.bf16 %v5432_v31  ;;  %v5433_v13 = vunpack.i.l.bf16 %v5432_v31 }
 0x2f9   : > { %v3703_v42 = vsel %vm3695_vm10, %v3670_v22, %v5433_v13  ;;  %v3704_v49 = vsel %vm3695_vm10, %v3671_v32, %v5434_v19 }
 0x2fa   : > { %v3736_v56 = vsel %vm3728_vm11, %v3703_v42, %v5438_v9  ;;  %v5442_v23 = vpop.permute.xlu0 %5441  ;;  %v3737_v6 = vsel %vm3728_vm11, %v3704_v49, %v5439_v35 }
 0x2fb   : > { %3975 = vmatmul.mubr.f32.gmra.mrb[12].mxu1 %v3736_v56  ;;  %v5443_v30 = vunpack.i.l.bf16 %v5442_v23  ;;  %v5444_v3 = vunpack.i.h.bf16 %v5442_v23 }
 0x2fc   : > { %5017 = vmatprep.mubr.msk.f32.mxu1 %vm225_vm0, %v7523_v50  ;;  %v7751_v55 = vld [vmem:[#allocation2 + $0x167] sm:$0xff]  ;;  %v5447_v50 = vpop.permute.xlu1 %5446 }
 0x2fd   : > { %v2592_v26 = vld [vmem:[#allocation2 + $0x168] sm:$0xff]  ;;  %v5605_v8 = vpack.i.bf16 %v7751_v55, %v7749_v61  ;;  %v5448_v14 = vunpack.i.l.bf16 %v5447_v50  ;;  %v3543_v10 = vsel %vm225_vm0, %v7452_v33, %v5443_v30 }
 0x2fe   : > { %v7756_v2 = vpack.i.bf16 %v2592_v26, %v2591_v47  ;;  %v5452_v43 = vpop.permute.xlu0 %5451  ;;  %v7766_v59 = vld [vmem:[#allocation2 + $0x169] sm:$0xff] }
 0x2ff   : > { %3980 = vmatmul.mubr.f32.gmra.mrb[14].mxu1 %v3737_v6  ;;  %5606 = vrot.lane.b32.xlu1 %v5605_v8, %s5990_s8  ;;  %v5453_v18 = vunpack.i.l.bf16 %v5452_v43  ;;  %v5635_v11 = vpack.i.bf16 %v7766_v59, %v7773_v46  ;;  %v3575_v33 = vsel %vm1790_vm3, %v3543_v10, %v5448_v14 }
 0x300   : > { %5611 = vrot.lane.b32.xlu0 %v7756_v2, %s5989_s7  ;;  %5018 = vmatprep.mubr.msk.f32.mxu1 %vm225_vm0, %v7574_v52  ;;  %v5457_v44 = vpop.permute.xlu1 %5456  ;;  %v5449_v52 = vunpack.i.h.bf16 %v5447_v50 }
 0x301   : > { %v5458_v15 = vunpack.i.l.bf16 %v5457_v44  ;;  %v3607_v34 = vsel %vm1856_vm5, %v3575_v33, %v5453_v18  ;;  %v5459_v39 = vunpack.i.h.bf16 %v5457_v44  ;;  %v7798_v44 = vld [vmem:[#allocation2 + $0x170] sm:$0xff] }
 0x302   : > { %v5462_v12 = vpop.permute.xlu0 %5461 }
 0x303   : > { %5616 = vrot.lane.b32.xlu1 %v7702_v17, %s5980_s26  ;;  %v3544_v17 = vsel %vm225_vm0, %v7454_v45, %v5444_v3  ;;  %v5463_v31 = vunpack.i.l.bf16 %v5462_v12  ;;  %v5464_v13 = vunpack.i.h.bf16 %v5462_v12  ;;  %v3639_v49 = vsel %vm1922_vm7, %v3607_v34, %v5458_v15 }
 0x304   : > { %5621 = vrot.lane.b32.xlu0 %v5600_v21, %s5982_s11  ;;  %v5454_v21 = vunpack.i.h.bf16 %v5452_v43  ;;  %v3576_v9 = vsel %vm1790_vm3, %v3544_v17, %v5449_v52  ;;  %v7802_v52 = vld [vmem:[#allocation2 + $0x16f] sm:$0xff] }
 0x305   : > { %v3672_v26 = vsel %vm3662_vm9, %v3639_v49, %v5463_v31 }
 0x306   : > { %v3608_v19 = vsel %vm1856_vm5, %v3576_v9, %v5454_v21 }
 0x307   : > { %5626 = vrot.lane.b32.xlu1 %v5605_v8, %s5984_s23  ;;  %v3640_v8 = vsel %vm1922_vm7, %v3608_v19, %v5459_v39 }
 0x308   : > { %5631 = vrot.lane.b32.xlu0 %v7756_v2, %s5986_s29  ;;  %v3673_v30 = vsel %vm3662_vm9, %v3640_v8, %v5464_v13 }
 0x30b   : > { %5636 = vrot.lane.b32.xlu1 %v5635_v11, %s5988_s30 }
 0x30d   : > { %v5164_v22 = vpop.f32.mrb[22].mxu0  ;;  %v5467_v45 = vpop.permute.xlu1 %5466 }
 0x30e   : > { %v2309_v28 = vmax.f32 %v5164_v22, 0.0  ;;  %v5469_v42 = vunpack.i.h.bf16 %v5467_v45  ;;  %v5468_v35 = vunpack.i.l.bf16 %v5467_v45  ;;  %v5472_v56 = vpop.permute.xlu0 %5471  ;;  %v2237_v32 = vpop.f32.mrb[23].mxu0 }
 0x30f   : > { %v5473_v47 = vunpack.i.l.bf16 %v5472_v56  ;;  %v2308_v23 = vmax.f32 %v2237_v32, 0.0  ;;  %v5474_v50 = vunpack.i.h.bf16 %v5472_v56  ;;  %v7826_v32 = vld [vmem:[#allocation2 + $0x171] sm:$0xff] }
 0x310   : > { %2341 = vst.msk [vmem:[#allocation2 + $0x190] sm:$0xff] %vm225_vm0, %v2309_v28  ;;  %v3705_v6 = vsel %vm3695_vm10, %v3672_v26, %v5468_v35  ;;  %v3706_v3 = vsel %vm3695_vm10, %v3673_v30, %v5469_v42 }
 0x311   : > { %2340 = vst.msk [vmem:[#allocation2 + $0x188] sm:$0xff] %vm225_vm0, %v2308_v23  ;;  %v3738_v43 = vsel %vm3728_vm11, %v3705_v6, %v5473_v47  ;;  %v5477_v14 = vpop.permute.xlu1 %5476  ;;  %v3739_v10 = vsel %vm3728_vm11, %v3706_v3, %v5474_v50 }
 0x312   : > { %3985 = vmatmul.mubr.f32.gmra.mrb[16].mxu1 %v3738_v43  ;;  %v5482_v17 = vpop.permute.xlu0 %5481  ;;  %v5478_v33 = vunpack.i.l.bf16 %v5477_v14 }
 0x313   : > { %5019 = vmatprep.mubr.msk.f32.mxu1 %vm225_vm0, %v7565_v51  ;;  %v5483_v34 = vunpack.i.l.bf16 %v5482_v17  ;;  %v5484_v19 = vunpack.i.h.bf16 %v5482_v17 }
 0x314   : > { %v3545_v31 = vsel %vm225_vm0, %v7495_v20, %v5478_v33 }
 0x315   : > { %v5487_v15 = vpop.permute.xlu1 %5486  ;;  %v3577_v28 = vsel %vm1790_vm3, %v3545_v31, %v5483_v34 }
 0x316   : > { %3990 = vmatmul.mubr.f32.gmra.mrb[18].mxu1 %v3739_v10  ;;  %v5488_v39 = vunpack.i.l.bf16 %v5487_v15  ;;  %v5492_v9 = vpop.permute.xlu0 %5491  ;;  %v5489_v45 = vunpack.i.h.bf16 %v5487_v15  ;;  %v7836_v10 = vld [vmem:[#allocation2 + $0x1a8] ss:$2 sm:$0xff] }
 0x317   : > { %5020 = vmatprep.mubr.msk.f32.mxu1 %vm225_vm0, %v7627_v53  ;;  %v5479_v53 = vunpack.i.h.bf16 %v5477_v14  ;;  %v5493_v42 = vunpack.i.l.bf16 %v5492_v9 }
 0x318   : > { %v7800_v18 = vld [vmem:[#allocation2 + $0x188] sm:$0xff]  ;;  %v3609_v20 = vsel %vm1856_vm5, %v3577_v28, %v5488_v39 }
 0x319   : > { %v7804_v12 = vld [vmem:[#allocation2 + $0x187] sm:$0xff]  ;;  %v5645_v21 = vpack.i.bf16 %v7800_v18, %v7798_v44  ;;  %v5497_v13 = vpop.permute.xlu1 %5496  ;;  %v3546_v22 = vsel %vm225_vm0, %v7497_v36, %v5479_v53  ;;  %v3641_v6 = vsel %vm1922_vm7, %v3609_v20, %v5493_v42  ;;  %v7848_v28 = vld [vmem:[#allocation2 + $0x18f] sm:$0xff] }
 0x31a   : > { %v5640_v51 = vpack.i.bf16 %v7804_v12, %v7802_v52  ;;  %v7820_v35 = vld [vmem:[#allocation2 + $0x189] sm:$0xff]  ;;  %v5498_v56 = vunpack.i.l.bf16 %v5497_v13  ;;  %v5499_v49 = vunpack.i.h.bf16 %v5497_v13 }
 0x31b   : > { %5646 = vrot.lane.b32.xlu1 %v5645_v21, %s5989_s7  ;;  %v5670_v26 = vpack.i.bf16 %v7820_v35, %v7826_v32 }
 0x31c   : > { %5641 = vrot.lane.b32.xlu0 %v5640_v51, %s5990_s8  ;;  %v3674_v30 = vsel %vm3662_vm9, %v3641_v6, %v5498_v56 }
 0x31f   : > { %5656 = vrot.lane.b32.xlu1 %v5635_v11, %s5982_s11  ;;  %v5494_v11 = vunpack.i.h.bf16 %v5492_v9 }
 0x320   : > { %5651 = vrot.lane.b32.xlu0 %v7756_v2, %s5980_s26  ;;  %v3578_v2 = vsel %vm1790_vm3, %v3546_v22, %v5484_v19 }
 0x321   : > { %v3610_v36 = vsel %vm1856_vm5, %v3578_v2, %v5489_v45  ;;  %v2595_v45 = vld [vmem:[#allocation2 + $0x190] sm:$0xff] }
 0x322   : > { %v3642_v3 = vsel %vm1922_vm7, %v3610_v36, %v5494_v11  ;;  %v2382_v36 = vld [vmem:[#allocation2 + $0x8] sm:$0xff] }
 0x323   : > { %5666 = vrot.lane.b32.xlu1 %v5645_v21, %s5986_s29  ;;  %v3675_v15 = vsel %vm3662_vm9, %v3642_v3, %v5499_v49  ;;  %v2414_v49 = vld [vmem:[#allocation2 + $0x9] sm:$0xff] }
 0x324   : > { %5661 = vrot.lane.b32.xlu0 %v5640_v51, %s5984_s23 }
 0x325   : > { %v5507_v47 = vpop.permute.xlu1 %5506 }
 0x326   : > { %v5502_v23 = vpop.permute.xlu0 %5501  ;;  %v5508_v8 = vunpack.i.l.bf16 %v5507_v47  ;;  %v5509_v17 = vunpack.i.h.bf16 %v5507_v47 }
 0x327   : > { %v5504_v50 = vunpack.i.h.bf16 %v5502_v23  ;;  %v5503_v43 = vunpack.i.l.bf16 %v5502_v23 }
 0x328   : > { %5671 = vrot.lane.b32.xlu0 %v5670_v26, %s5988_s30 }
 0x329   : > { %v3707_v14 = vsel %vm3695_vm10, %v3674_v30, %v5503_v43  ;;  %v5167_v21 = vpop.f32.mrb[24].mxu0  ;;  %v3708_v34 = vsel %vm3695_vm10, %v3675_v15, %v5504_v50  ;;  %v5517_v19 = vpop.permute.xlu1 %5516  ;;  %v5685_v43 = vpack.i.bf16 %v2382_v36, %v7798_v44  ;;  %v5690_v30 = vpack.i.bf16 %v2414_v49, %v7826_v32  ;;  %v2478_v15 = vld [vmem:[#allocation2 + $0x28] sm:$0xff] }
 0x32a   : > { %v3740_v51 = vsel %vm3728_vm11, %v3707_v14, %v5508_v8  ;;  %v2311_v33 = vmax.f32 %v5167_v21, 0.0  ;;  %v2247_v53 = vpop.f32.mrb[25].mxu0  ;;  %v5512_v39 = vpop.permute.xlu0 %5511  ;;  %v3741_v9 = vsel %vm3728_vm11, %v3708_v34, %v5509_v17  ;;  %v5518_v11 = vunpack.i.l.bf16 %v5517_v19 }
 0x32b   : > { %3995 = vmatmul.mubr.f32.gmra.mrb[20].mxu1 %v3740_v51  ;;  %v2310_v31 = vmax.f32 %v2247_v53, 0.0  ;;  %v5513_v22 = vunpack.i.l.bf16 %v5512_v39  ;;  %v5514_v20 = vunpack.i.h.bf16 %v5512_v39  ;;  %v5519_v26 = vunpack.i.h.bf16 %v5517_v19  ;;  %v7873_v39 = vld [vmem:[#allocation2 + $0x191] sm:$0xff] }
 0x32c   : > { %5021 = vmatprep.mubr.msk.f32.mxu1 %vm225_vm0, %v7621_v58  ;;  %2343 = vst.msk [vmem:[#allocation2 + $0x1b0] sm:$0xff] %vm225_vm0, %v2311_v33  ;;  %v5695_v34 = vpack.i.bf16 %v7589_v63, %v7848_v28 }
 0x32d   : > { %2342 = vst.msk [vmem:[#allocation2 + $0x1a8] sm:$0xff] %vm225_vm0, %v2310_v31  ;;  %v5527_v47 = vpop.permute.xlu1 %5526  ;;  %v3548_v8 = vsel %vm225_vm0, %v7543_v16, %v5514_v20  ;;  %v5700_v31 = vpack.i.bf16 %v2478_v15, %v2595_v45 }
 0x32e   : > { %v5522_v13 = vpop.permute.xlu0 %5521  ;;  %v5528_v3 = vunpack.i.l.bf16 %v5527_v47  ;;  %v5529_v21 = vunpack.i.h.bf16 %v5527_v47  ;;  %v3580_v51 = vsel %vm1790_vm3, %v3548_v8, %v5519_v26  ;;  %v2542_v8 = vld [vmem:[#allocation2 + $0x47] sm:$0xff] }
 0x32f   : > { %4000 = vmatmul.mubr.f32.gmra.mrb[22].mxu1 %v3741_v9  ;;  %v5523_v23 = vunpack.i.l.bf16 %v5522_v13  ;;  %v5524_v50 = vunpack.i.h.bf16 %v5522_v13 }
 0x330   : > { %5022 = vmatprep.mubr.msk.f32.mxu1 %vm225_vm0, %v7677_v25  ;;  %v3547_v25 = vsel %vm225_vm0, %v7541_v0, %v5513_v22 }
 0x331   : > { %v3579_v14 = vsel %vm1790_vm3, %v3547_v25, %v5518_v11  ;;  %v3612_v16 = vsel %vm1856_vm5, %v3580_v51, %v5524_v50  ;;  %v5705_v25 = vpack.i.bf16 %v2595_v45, %v7800_v18  ;;  %v7895_v18 = vld [vmem:[%s8426_s4] sm:$0xff] }
 0x332   : > { %v5532_v6 = vpop.permute.xlu0 %5531  ;;  %v3611_v0 = vsel %vm1856_vm5, %v3579_v14, %v5523_v23  ;;  %v3644_v63 = vsel %vm1922_vm7, %v3612_v16, %v5529_v21  ;;  %5177 = vmatprep.subr.mxu0 %v7895_v18 }
 0x333   : > { %v5533_v17 = vunpack.i.l.bf16 %v5532_v6  ;;  %v5534_v33 = vunpack.i.h.bf16 %v5532_v6  ;;  %v3643_v22 = vsel %vm1922_vm7, %v3611_v0, %v5528_v3 }
 0x334   : > { %v7850_v42 = vld [vmem:[#allocation2 + $0x1a7] sm:$0xff]  ;;  %v7886_v26 = vld [vmem:[#allocation2 + $0x1af] sm:$0xff] }
 0x335   : > { %v7852_v58 = vld [vmem:[#allocation2 + $0x1a8] sm:$0xff]  ;;  %v5675_v56 = vpack.i.bf16 %v7850_v42, %v7848_v28  ;;  %v3676_v20 = vsel %vm3662_vm9, %v3643_v22, %v5533_v17  ;;  %v3677_v47 = vsel %vm3662_vm9, %v3644_v63, %v5534_v33  ;;  %v5725_v51 = vpack.i.bf16 %v7886_v26, %v7850_v42 }
 0x336   : > { %v5680_v2 = vpack.i.bf16 %v7852_v58, %v2595_v45  ;;  %v2574_v17 = vld [vmem:[#allocation2 + $0x48] sm:$0xff] }
 0x337   : > { %5676 = vrot.lane.b32.xlu1 %v5675_v56, %s5990_s8  ;;  %v2510_v56 = vld [vmem:[#allocation2 + $0x29] sm:$0xff] }
 0x338   : > { %5681 = vrot.lane.b32.xlu0 %v5680_v2, %s5989_s7  ;;  %v5710_v11 = vpack.i.bf16 %v2510_v56, %v7873_v39  ;;  %v7910_v33 = vld [vmem:[#allocation2 + $0x1a9] sm:$0xff] }
 0x33b   : > { %5686 = vrot.lane.b32.xlu1 %v5685_v43, %s5980_s26  ;;  %v5715_v43 = vpack.i.bf16 %v7873_v39, %v7820_v35 }
 0x33c   : > { %5691 = vrot.lane.b32.xlu0 %v5690_v30, %s5982_s11  ;;  %v5720_v30 = vpack.i.bf16 %v2542_v8, %v7886_v26 }
 0x33d   : > { %v5537_v44 = vpop.permute.xlu1 %5536 }
 0x33e   : > { %v5542_v53 = vpop.permute.xlu0 %5541  ;;  %v5539_v9 = vunpack.i.h.bf16 %v5537_v44  ;;  %v5538_v19 = vunpack.i.l.bf16 %v5537_v44  ;;  %v7912_v44 = vld [vmem:[#allocation2 + $0x1b1] sm:$0xff] }
 0x33f   : > { %v5543_v13 = vunpack.i.l.bf16 %v5542_v53  ;;  %5696 = vrot.lane.b32.xlu1 %v5695_v34, %s5984_s23  ;;  %v5544_v36 = vunpack.i.h.bf16 %v5542_v53 }
 0x340   : > { %5701 = vrot.lane.b32.xlu0 %v5700_v31, %s5986_s29  ;;  %v3709_v2 = vsel %vm3695_vm10, %v3676_v20, %v5538_v19  ;;  %v3710_v23 = vsel %vm3695_vm10, %v3677_v47, %v5539_v9  ;;  %v5740_v31 = vpack.i.bf16 %v7912_v44, %v7910_v33 }
 0x341   : > { %v3742_v49 = vsel %vm3728_vm11, %v3709_v2, %v5543_v13  ;;  %v5547_v6 = vpop.permute.xlu1 %5546  ;;  %v3743_v50 = vsel %vm3728_vm11, %v3710_v23, %v5544_v36 }
 0x342   : > { %4005 = vmatmul.mubr.f32.gmra.mrb[24].mxu1 %v3742_v49  ;;  %v5552_v21 = vpop.permute.xlu0 %5551  ;;  %v5548_v53 = vunpack.i.l.bf16 %v5547_v6  ;;  %v5549_v34 = vunpack.i.h.bf16 %v5547_v6 }
 0x343   : > { %5706 = vrot.lane.b32.xlu1 %v5705_v25, %s5980_s26  ;;  %5023 = vmatprep.mubr.msk.f32.mxu1 %vm225_vm0, %v7672_v29  ;;  %v2597_v29 = vld [vmem:[#allocation2 + $0x1b0] sm:$0xff]  ;;  %v5553_v9 = vunpack.i.l.bf16 %v5552_v21  ;;  %v5554_v56 = vunpack.i.h.bf16 %v5552_v21 }
 0x344   : > { %5711 = vrot.lane.b32.xlu0 %v5710_v11, %s5988_s30  ;;  %v5730_v15 = vpack.i.bf16 %v2574_v17, %v2597_v29  ;;  %v3549_v19 = vsel %vm225_vm0, %v7596_v62, %v5548_v53  ;;  %v3550_v36 = vsel %vm225_vm0, %v7598_v60, %v5549_v34 }
 0x345   : > { %v5170_v45 = vpop.f32.mrb[26].mxu0  ;;  %v5557_v16 = vpop.permute.xlu1 %5556  ;;  %v3581_v47 = vsel %vm1790_vm3, %v3549_v19, %v5553_v9 }
 0x346   : > { %v2313_v3 = vmax.f32 %v5170_v45, 0.0  ;;  %v2257_v14 = vpop.f32.mrb[27].mxu0  ;;  %4010 = vmatmul.mubr.f32.gmra.mrb[26].mxu1 %v3743_v50  ;;  %v5558_v13 = vunpack.i.l.bf16 %v5557_v16  ;;  %v5562_v22 = vpop.permute.xlu0 %5561  ;;  %v5559_v49 = vunpack.i.h.bf16 %v5557_v16  ;;  %v3582_v45 = vsel %vm1790_vm3, %v3550_v36, %v5554_v56 }
 0x347   : > { %v2312_v0 = vmax.f32 %v2257_v14, 0.0  ;;  %5716 = vrot.lane.b32.xlu1 %v5715_v43, %s5982_s11  ;;  %5024 = vmatprep.mubr.msk.f32.mxu1 %vm225_vm0, %v7723_v54  ;;  %v5735_v54 = vpack.i.bf16 %v2597_v29, %v7852_v58  ;;  %v5563_v23 = vunpack.i.l.bf16 %v5562_v22  ;;  %v5564_v60 = vunpack.i.h.bf16 %v5562_v22 }
 0x348   : > { %5721 = vrot.lane.b32.xlu0 %v5720_v30, %s5990_s8  ;;  %2345 = vst.msk [vmem:[#allocation2 + $0x1d0] sm:$0xff] %vm225_vm0, %v2313_v3  ;;  %v3613_v6 = vsel %vm1856_vm5, %v3581_v47, %v5558_v13  ;;  %v3614_v50 = vsel %vm1856_vm5, %v3582_v45, %v5559_v49 }
 0x349   : > { %2344 = vst.msk [vmem:[#allocation2 + $0x1c8] sm:$0xff] %vm225_vm0, %v2312_v0  ;;  %v5567_v2 = vpop.permute.xlu1 %5566  ;;  %v3645_v14 = vsel %vm1922_vm7, %v3613_v6, %v5563_v23 }
 0x34a   : > { %v5568_v8 = vunpack.i.l.bf16 %v5567_v2  ;;  %v5569_v43 = vunpack.i.h.bf16 %v5567_v2 }
 0x34b   : > { %5726 = vrot.lane.b32.xlu1 %v5725_v51, %s5984_s23  ;;  %v3646_v51 = vsel %vm1922_vm7, %v3614_v50, %v5564_v60 }
 0x34c   : > { %5731 = vrot.lane.b32.xlu0 %v5730_v15, %s5989_s7  ;;  %v3678_v21 = vsel %vm3662_vm9, %v3645_v14, %v5568_v8  ;;  %v3679_v34 = vsel %vm3662_vm9, %v3646_v51, %v5569_v43 }
 0x34f   : > { %5736 = vrot.lane.b32.xlu1 %v5735_v54, %s5986_s29  ;;  %v2599_v20 = vld [vmem:[#allocation2 + $0x1d0] sm:$0xff] }
 0x350   : > { %5741 = vrot.lane.b32.xlu0 %v5740_v31, %s5988_s30  ;;  %v7923_v11 = vld [vmem:[#allocation2 + $0x1c7] sm:$0xff]  ;;  %v7925_v63 = vld [vmem:[#allocation2 + $0x1cf] sm:$0xff] }
 0x351   : > { %v2598_v58 = vld [vmem:[#allocation2 + $0x1c8] sm:$0xff]  ;;  %v5745_v62 = vpack.i.bf16 %v7925_v63, %v7923_v11  ;;  %v7951_v13 = vld [vmem:[#allocation2 + $0x1d1] sm:$0xff] }
 0x352   : > { %v7931_v25 = vpack.i.bf16 %v2599_v20, %v2598_v58  ;;  %v7949_v19 = vld [vmem:[#allocation2 + $0x1c9] sm:$0xff] }
 0x353   : > { %5746 = vrot.lane.b32.xlu1 %v5745_v62, %s5990_s8  ;;  %v7964_v20 = vld [vmem:[#allocation2 + $0x1e8] ss:$2 sm:$0xff] }
 0x354   : > { %5751 = vrot.lane.b32.xlu0 %v7931_v25, %s5989_s7 }
 0x355   : > { %v5577_v30 = vpop.permute.xlu1 %5576 }
 0x356   : > { %v5572_v3 = vpop.permute.xlu0 %5571  ;;  %v5578_v29 = vunpack.i.l.bf16 %v5577_v30  ;;  %v5579_v16 = vunpack.i.h.bf16 %v5577_v30 }
 0x357   : > { %v5574_v0 = vunpack.i.h.bf16 %v5572_v3  ;;  %v5573_v17 = vunpack.i.l.bf16 %v5572_v3  ;;  %5756 = vrot.lane.b32.xlu1 %v5735_v54, %s5980_s26 }
 0x358   : > { %5761 = vrot.lane.b32.xlu0 %v5740_v31, %s5982_s11  ;;  %v5775_v31 = vpack.i.bf16 %v7951_v13, %v7949_v19 }
 0x359   : > { %v3711_v15 = vsel %vm3695_vm10, %v3678_v21, %v5573_v17  ;;  %v3712_v9 = vsel %vm3695_vm10, %v3679_v34, %v5574_v0 }
 0x35a   : > { %v3744_v53 = vsel %vm3728_vm11, %v3711_v15, %v5578_v29  ;;  %v3745_v54 = vsel %vm3728_vm11, %v3712_v9, %v5579_v16  ;;  %v5582_v22 = vpop.permute.xlu0 %5581 }
 0x35b   : > { %4015 = vmatmul.mubr.f32.gmra.mrb[28].mxu1 %v3744_v53  ;;  %5766 = vrot.lane.b32.xlu1 %v5745_v62, %s5984_s23  ;;  %v5583_v62 = vunpack.i.l.bf16 %v5582_v22  ;;  %v5584_v47 = vunpack.i.h.bf16 %v5582_v22 }
 0x35c   : > { %5771 = vrot.lane.b32.xlu0 %v7931_v25, %s5986_s29  ;;  %5025 = vmatprep.mubr.msk.f32.mxu1 %vm225_vm0, %v7718_v5  ;;  %v5587_v5 = vpop.permute.xlu1 %5586 }
 0x35d   : > { %v5588_v23 = vunpack.i.l.bf16 %v5587_v5  ;;  %v3551_v6 = vsel %vm225_vm0, %v7650_v48, %v5583_v62  ;;  %v5589_v60 = vunpack.i.h.bf16 %v5587_v5  ;;  %v3552_v14 = vsel %vm225_vm0, %v7652_v37, %v5584_v47 }
 0x35e   : > { %v5592_v49 = vpop.permute.xlu0 %5591 }
 0x35f   : > { %4020 = vmatmul.mubr.f32.gmra.mrb[30].mxu1 %v3745_v54  ;;  %5776 = vrot.lane.b32.xlu1 %v5775_v31, %s5988_s30  ;;  %v5593_v8 = vunpack.i.l.bf16 %v5592_v49  ;;  %v5594_v29 = vunpack.i.h.bf16 %v5592_v49  ;;  %v3583_v21 = vsel %vm1790_vm3, %v3551_v6, %v5588_v23  ;;  %v3584_v37 = vsel %vm1790_vm3, %v3552_v14, %v5589_v60 }
 0x360   : > { %5026 = vmatprep.mubr.msk.f32.mxu1 %vm225_vm0, %v7773_v46  ;;  %v5597_v46 = vpop.permute.xlu1 %5596 }
 0x361   : > { %v5173_v56 = vpop.f32.mrb[28].mxu0  ;;  %v5598_v48 = vunpack.i.l.bf16 %v5597_v46  ;;  %v3615_v51 = vsel %vm1856_vm5, %v3583_v21, %v5593_v8  ;;  %v5599_v16 = vunpack.i.h.bf16 %v5597_v46  ;;  %v3616_v53 = vsel %vm1856_vm5, %v3584_v37, %v5594_v29 }
 0x362   : > { %v2315_v2 = vmax.f32 %v5173_v56, 0.0  ;;  %v2267_v58 = vpop.f32.mrb[29].mxu0  ;;  %v5602_v50 = vpop.permute.xlu0 %5601 }
 0x363   : > { %v2314_v36 = vmax.f32 %v2267_v58, 0.0  ;;  %v5603_v15 = vunpack.i.l.bf16 %v5602_v50  ;;  %v5604_v34 = vunpack.i.h.bf16 %v5602_v50  ;;  %v3647_v58 = vsel %vm1922_vm7, %v3615_v51, %v5598_v48 }
 0x364   : > { %2347 = vst.msk [vmem:[#allocation2 + $0x1f0] sm:$0xff] %vm225_vm0, %v2315_v2  ;;  %v3648_v49 = vsel %vm1922_vm7, %v3616_v53, %v5599_v16 }
 0x365   : > { %2346 = vst.msk [vmem:[#allocation2 + $0x1e8] sm:$0xff] %vm225_vm0, %v2314_v36  ;;  %v3680_v36 = vsel %vm3662_vm9, %v3647_v58, %v5603_v15  ;;  %v3681_v23 = vsel %vm3662_vm9, %v3648_v49, %v5604_v34 }
 0x36b   : > { %v2601_v45 = vld [vmem:[#allocation2 + $0x1f0] sm:$0xff] }
 0x36c   : > { %v2600_v43 = vld [vmem:[#allocation2 + $0x1e8] sm:$0xff] }
 0x36d   : > { %v7970_v30 = vld [vmem:[#allocation2 + $0x1e7] sm:$0xff]  ;;  %v7972_v3 = vld [vmem:[#allocation2 + $0x1ef] sm:$0xff]  ;;  %v7976_v0 = vpack.i.bf16 %v2601_v45, %v2600_v43 }
 0x36e   : > { %v5780_v17 = vpack.i.bf16 %v7972_v3, %v7970_v30  ;;  %v7997_v46 = vld [vmem:[#allocation2 + $0x1e9] sm:$0xff] }
 0x36f   : > { %5786 = vrot.lane.b32.xlu1 %v7976_v0, %s5989_s7 }
 0x370   : > { %5781 = vrot.lane.b32.xlu0 %v5780_v17, %s5990_s8 }
 0x371   : > { %v5607_v9 = vpop.permute.xlu1 %5606 }
 0x372   : > { %v5612_v54 = vpop.permute.xlu0 %5611  ;;  %v5609_v22 = vunpack.i.h.bf16 %v5607_v9  ;;  %v5608_v56 = vunpack.i.l.bf16 %v5607_v9 }
 0x373   : > { %v5613_v2 = vunpack.i.l.bf16 %v5612_v54  ;;  %5796 = vrot.lane.b32.xlu1 %v5775_v31, %s5982_s11  ;;  %v5614_v62 = vunpack.i.h.bf16 %v5612_v54  ;;  %v7999_v31 = vld [vmem:[#allocation2 + $0x1f1] sm:$0xff] }
 0x374   : > { %5791 = vrot.lane.b32.xlu0 %v7931_v25, %s5980_s26  ;;  %v3713_v5 = vsel %vm3695_vm10, %v3680_v36, %v5608_v56  ;;  %v3714_v6 = vsel %vm3695_vm10, %v3681_v23, %v5609_v22  ;;  %v5810_v8 = vpack.i.bf16 %v7999_v31, %v7997_v46 }
 0x375   : > { %v3746_v47 = vsel %vm3728_vm11, %v3713_v5, %v5613_v2  ;;  %v3747_v25 = vsel %vm3728_vm11, %v3714_v6, %v5614_v62  ;;  %v5617_v45 = vpop.permute.xlu1 %5616 }
 0x376   : > { %4025 = vmatmul.mubr.f32.gmra.mrb[32].mxu1 %v3746_v47  ;;  %v5622_v29 = vpop.permute.xlu0 %5621  ;;  %v5619_v48 = vunpack.i.h.bf16 %v5617_v45 }
 0x377   : > { %5806 = vrot.lane.b32.xlu1 %v7976_v0, %s5986_s29  ;;  %5027 = vmatprep.mubr.msk.f32.mxu1 %vm225_vm0, %v7766_v59  ;;  %v5623_v21 = vunpack.i.l.bf16 %v5622_v29  ;;  %v5624_v37 = vunpack.i.h.bf16 %v5622_v29 }
 0x378   : > { %5801 = vrot.lane.b32.xlu0 %v5780_v17, %s5984_s23  ;;  %v5618_v17 = vunpack.i.l.bf16 %v5617_v45  ;;  %v3554_v22 = vsel %vm225_vm0, %v7698_v57, %v5619_v48 }
 0x379   : > { %v5627_v59 = vpop.permute.xlu1 %5626  ;;  %v3586_v62 = vsel %vm1790_vm3, %v3554_v22, %v5624_v37  ;;  %v2604_v22 = vld [vmem:[#allocation2 + $0x228] sm:$0xff] }
 0x37a   : > { %4030 = vmatmul.mubr.f32.gmra.mrb[34].mxu1 %v3747_v25  ;;  %v3553_v51 = vsel %vm225_vm0, %v7696_v4, %v5618_v17  ;;  %v5628_v15 = vunpack.i.l.bf16 %v5627_v59  ;;  %v5632_v16 = vpop.permute.xlu0 %5631  ;;  %v5629_v56 = vunpack.i.h.bf16 %v5627_v59 }
 0x37b   : > { %5028 = vmatprep.mubr.msk.f32.mxu1 %vm225_vm0, %v7826_v32  ;;  %v3585_v36 = vsel %vm1790_vm3, %v3553_v51, %v5623_v21  ;;  %v5633_v5 = vunpack.i.l.bf16 %v5632_v16  ;;  %v5634_v47 = vunpack.i.h.bf16 %v5632_v16 }
 0x37c   : > { %5811 = vrot.lane.b32.xlu0 %v5810_v8, %s5988_s30  ;;  %v3617_v49 = vsel %vm1856_vm5, %v3585_v36, %v5628_v15  ;;  %v3618_v6 = vsel %vm1856_vm5, %v3586_v62, %v5629_v56 }
 0x37d   : > { %v5176_v60 = vpop.f32.mrb[30].mxu0  ;;  %v5637_v53 = vpop.permute.xlu1 %5636  ;;  %v3650_v48 = vsel %vm1922_vm7, %v3618_v6, %v5634_v47 }
 0x37e   : > { %v2317_v50 = vmax.f32 %v5176_v60, 0.0  ;;  %v2277_v43 = vpop.f32.mrb[31].mxu0  ;;  %v5638_v4 = vunpack.i.l.bf16 %v5637_v53  ;;  %v5639_v57 = vunpack.i.h.bf16 %v5637_v53 }
 0x37f   : > { %v2316_v14 = vmax.f32 %v2277_v43, 0.0 }
 0x380   : > { %2349 = vst.msk [vmem:[#allocation2 + $0x210] sm:$0xff] %vm225_vm0, %v2317_v50  ;;  %v3649_v50 = vsel %vm1922_vm7, %v3617_v49, %v5633_v5  ;;  %v3683_v37 = vsel %vm3662_vm9, %v3650_v48, %v5639_v57 }
 0x381   : > { %2348 = vst.msk [vmem:[#allocation2 + $0x208] sm:$0xff] %vm225_vm0, %v2316_v14  ;;  %v3682_v17 = vsel %vm3662_vm9, %v3649_v50, %v5638_v4 }
 0x387   : > { %v2603_v32 = vld [vmem:[#allocation2 + $0x210] sm:$0xff] }
 0x388   : > { %v2570_v34 = vld [vmem:[#allocation2 + $0x207] sm:$0xff]  ;;  %v2571_v9 = vld [vmem:[#allocation2 + $0x20f] sm:$0xff] }
 0x389   : > { %v2602_v54 = vld [vmem:[#allocation2 + $0x208] sm:$0xff]  ;;  %v5815_v2 = vpack.i.bf16 %v2571_v9, %v2570_v34  ;;  %v8048_v56 = vld [vmem:[#allocation2 + $0x211] sm:$0xff] }
 0x38a   : > { %v5820_v58 = vpack.i.bf16 %v2603_v32, %v2602_v54  ;;  %v8041_v9 = vld [vmem:[#allocation2 + $0x209] sm:$0xff] }
 0x38b   : > { %5816 = vrot.lane.b32.xlu1 %v5815_v2, %s5990_s8 }
 0x38c   : > { %5821 = vrot.lane.b32.xlu0 %v5820_v58, %s5989_s7  ;;  %v3946_v23 = vpop.f32.mrb[0].mxu1 }
 0x38d   : > { %v4101_v25 = vmax.f32 %v3946_v23, 0.0  ;;  %v5647_v45 = vpop.permute.xlu1 %5646  ;;  %v3948_v59 = vpop.f32.mrb[1].mxu1 }
 0x38e   : > { %v5642_v60 = vpop.permute.xlu0 %5641  ;;  %v5648_v43 = vunpack.i.l.bf16 %v5647_v45  ;;  %v5649_v15 = vunpack.i.h.bf16 %v5647_v45  ;;  %v4197_v59 = vld [vmem:[#allocation2 + $0x9] ss:$2 sm:$0xff] }
 0x38f   : > { %v5644_v14 = vunpack.i.h.bf16 %v5642_v60  ;;  %v5643_v29 = vunpack.i.l.bf16 %v5642_v60  ;;  %4133 = vst.msk [vmem:[#allocation2 + $0x30] sm:$0xff] %vm225_vm0, %v4101_v25  ;;  %5826 = vrot.lane.b32.xlu1 %v7976_v0, %s5980_s26  ;;  %v2572_v0 = vld [vmem:[#allocation2 + $0x227] sm:$0xff] }
 0x390   : > { %5831 = vrot.lane.b32.xlu0 %v5810_v8, %s5982_s11  ;;  %v3951_v21 = vpop.f32.mrb[2].mxu1 }
 0x391   : > { %v3715_v51 = vsel %vm3695_vm10, %v3682_v17, %v5643_v29  ;;  %v4102_v16 = vmax.f32 %v3951_v21, 0.0  ;;  %v3953_v53 = vpop.f32.mrb[3].mxu1  ;;  %v3716_v34 = vsel %vm3695_vm10, %v3683_v37, %v5644_v14  ;;  %v4181_v17 = vld [vmem:[#allocation2 + $0x8] ss:$2 sm:$0xff] }
 0x392   : > { %v3748_v32 = vsel %vm3728_vm11, %v3715_v51, %v5648_v43  ;;  %v3749_v8 = vsel %vm3728_vm11, %v3716_v34, %v5649_v15  ;;  %v5652_v54 = vpop.permute.xlu0 %5651 }
 0x393   : > { %4035 = vmatmul.mubr.f32.gmra.mrb[36].mxu1 %v3748_v32  ;;  %4134 = vst.msk [vmem:[#allocation2 + $0x48] sm:$0xff] %vm225_vm0, %v4102_v16  ;;  %5836 = vrot.lane.b32.xlu1 %v5815_v2, %s5984_s23  ;;  %v2605_v2 = vld [vmem:[#allocation2 + $0x230] sm:$0xff]  ;;  %v5653_v62 = vunpack.i.l.bf16 %v5652_v54 }
 0x394   : > { %5841 = vrot.lane.b32.xlu0 %v5820_v58, %s5986_s29  ;;  %5029 = vmatprep.mubr.msk.f32.mxu1 %vm225_vm0, %v7820_v35  ;;  %v2573_v35 = vld [vmem:[#allocation2 + $0x22f] sm:$0xff]  ;;  %v5657_v58 = vpop.permute.xlu1 %5656 }
 0x395   : > { %v5658_v23 = vunpack.i.l.bf16 %v5657_v58  ;;  %v3555_v25 = vsel %vm225_vm0, %v7749_v61, %v5653_v62  ;;  %v5659_v50 = vunpack.i.h.bf16 %v5657_v58 }
 0x396   : > { %v5662_v5 = vpop.permute.xlu0 %5661 }
 0x397   : > { %4040 = vmatmul.mubr.f32.gmra.mrb[38].mxu1 %v3749_v8  ;;  %3242 = vrot.lane.b32.xlu1 %v8041_v9, %s5988_s30  ;;  %v5663_v60 = vunpack.i.l.bf16 %v5662_v5  ;;  %v5664_v29 = vunpack.i.h.bf16 %v5662_v5  ;;  %v3587_v21 = vsel %vm1790_vm3, %v3555_v25, %v5658_v23 }
 0x398   : > { %3370 = vrot.lane.b32.xlu0 %v2572_v0, %s5990_s8  ;;  %5030 = vmatprep.mubr.msk.f32.mxu1 %vm225_vm0, %v7873_v39  ;;  %v5654_v39 = vunpack.i.h.bf16 %v5652_v54  ;;  %v5667_v45 = vpop.permute.xlu1 %5666 }
 0x399   : > { %v5668_v48 = vunpack.i.l.bf16 %v5667_v45  ;;  %v3619_v51 = vsel %vm1856_vm5, %v3587_v21, %v5663_v60  ;;  %v5669_v32 = vunpack.i.h.bf16 %v5667_v45 }
 0x39a   : > { %v5672_v43 = vpop.permute.xlu0 %5671  ;;  %v3556_v14 = vsel %vm225_vm0, %v7751_v55, %v5654_v39 }
 0x39b   : > { %3498 = vrot.lane.b32.xlu1 %v2604_v22, %s5989_s7  ;;  %v5673_v15 = vunpack.i.l.bf16 %v5672_v43  ;;  %v3588_v37 = vsel %vm1790_vm3, %v3556_v14, %v5659_v50  ;;  %v5674_v8 = vunpack.i.h.bf16 %v5672_v43  ;;  %v3651_v58 = vsel %vm1922_vm7, %v3619_v51, %v5668_v48  ;;  %v2350_v50 = vld [vmem:[#allocation2 + $0x7] sm:$0xff] }
 0x39c   : > { %3244 = vrot.lane.b32.xlu0 %v8048_v56, %s5988_s30  ;;  %v3620_v0 = vsel %vm1856_vm5, %v3588_v37, %v5664_v29 }
 0x39e   : > { %v3956_v36 = vpop.f32.mrb[4].mxu1 }
 0x39f   : > { %v4103_v49 = vmax.f32 %v3956_v36, 0.0  ;;  %v3958_v4 = vpop.f32.mrb[5].mxu1  ;;  %3372 = vrot.lane.b32.xlu1 %v2573_v35, %s5990_s8  ;;  %v3684_v36 = vsel %vm3662_vm9, %v3651_v58, %v5673_v15 }
 0x3a0   : > { %3500 = vrot.lane.b32.xlu0 %v2605_v2, %s5989_s7 }
 0x3a1   : > { %4135 = vst.msk [vmem:[#allocation2 + $0x50] sm:$0xff] %vm225_vm0, %v4103_v49  ;;  %v3652_v49 = vsel %vm1922_vm7, %v3620_v0, %v5669_v32 }
 0x3a2   : > { %v3961_v47 = vpop.f32.mrb[6].mxu1  ;;  %v3685_v23 = vsel %vm3662_vm9, %v3652_v49, %v5674_v8 }
 0x3a3   : > { %v4104_v6 = vmax.f32 %v3961_v47, 0.0  ;;  %v3963_v57 = vpop.f32.mrb[7].mxu1 }
 0x3a5   : > { %4136 = vst.msk [vmem:[#allocation2 + $0x68] sm:$0xff] %vm225_vm0, %v4104_v6 }
 0x3a8   : > { %v4199_v16 = vld [vmem:[#allocation2 + $0x49] ss:$2 sm:$0xff]  ;;  %v4183_v61 = vld [vmem:[#allocation2 + $0x48] ss:$2 sm:$0xff] }
 0x3a9   : > { %v5850_v53 = vpack.i.bf16 %v4199_v16, %v4197_v59  ;;  %v5845_v34 = vpack.i.bf16 %v4183_v61, %v4181_v17  ;;  %v5677_v55 = vpop.permute.xlu1 %5676 }
 0x3aa   : > { %v5682_v54 = vpop.permute.xlu0 %5681  ;;  %v5679_v22 = vunpack.i.h.bf16 %v5677_v55  ;;  %v5678_v35 = vunpack.i.l.bf16 %v5677_v55 }
 0x3ab   : > { %v5683_v2 = vunpack.i.l.bf16 %v5682_v54  ;;  %5851 = vrot.lane.b32.xlu0 %v5850_v53, %s5982_s11  ;;  %5846 = vrot.lane.b32.xlu1 %v5845_v34, %s5980_s26  ;;  %v5684_v4 = vunpack.i.h.bf16 %v5682_v54 }
 0x3ac   : > { %v3717_v5 = vsel %vm3695_vm10, %v3684_v36, %v5678_v35  ;;  %v3718_v6 = vsel %vm3695_vm10, %v3685_v23, %v5679_v22 }
 0x3ad   : > { %v5687_v62 = vpop.permute.xlu1 %5686  ;;  %v3750_v47 = vsel %vm3728_vm11, %v3717_v5, %v5683_v2  ;;  %v3751_v60 = vsel %vm3728_vm11, %v3718_v6, %v5684_v4 }
 0x3ae   : > { %v5692_v39 = vpop.permute.xlu0 %5691  ;;  %4045 = vmatmul.mubr.f32.gmra.mrb[40].mxu1 %v3750_v47  ;;  %v5689_v57 = vunpack.i.h.bf16 %v5687_v62  ;;  %v5688_v43 = vunpack.i.l.bf16 %v5687_v62 }
 0x3af   : > { %5031 = vmatprep.mubr.msk.f32.mxu1 %vm225_vm0, %v7910_v33  ;;  %v5694_v14 = vunpack.i.h.bf16 %v5692_v39  ;;  %v5693_v59 = vunpack.i.l.bf16 %v5692_v39 }
 0x3b0   : > { %v3534_v29 = vsel %vm225_vm0, %v2350_v50, %v5689_v57  ;;  %v3557_v33 = vsel %vm225_vm0, %v7802_v52, %v5688_v43 }
 0x3b1   : > { %v5697_v25 = vpop.permute.xlu1 %5696  ;;  %v3566_v32 = vsel %vm1790_vm3, %v3534_v29, %v5694_v14  ;;  %v3589_v53 = vsel %vm1790_vm3, %v3557_v33, %v5693_v59 }
 0x3b2   : > { %v5702_v45 = vpop.permute.xlu0 %5701  ;;  %4050 = vmatmul.mubr.f32.gmra.mrb[42].mxu1 %v3751_v60  ;;  %v5699_v17 = vunpack.i.h.bf16 %v5697_v25  ;;  %v5698_v51 = vunpack.i.l.bf16 %v5697_v25 }
 0x3b3   : > { %5032 = vmatprep.mubr.msk.f32.mxu1 %vm225_vm0, %v7912_v44  ;;  %v5704_v37 = vunpack.i.h.bf16 %v5702_v45  ;;  %v5703_v34 = vunpack.i.l.bf16 %v5702_v45 }
 0x3b4   : > { %v3598_v44 = vsel %vm1856_vm5, %v3566_v32, %v5699_v17  ;;  %v3621_v54 = vsel %vm1856_vm5, %v3589_v53, %v5698_v51 }
 0x3b5   : > { %v5707_v48 = vpop.permute.xlu1 %5706  ;;  %v3966_v15 = vpop.f32.mrb[8].mxu1  ;;  %v3630_v5 = vsel %vm1922_vm7, %v3598_v44, %v5704_v37  ;;  %v3653_v49 = vsel %vm1922_vm7, %v3621_v54, %v5703_v34 }
 0x3b6   : > { %v5712_v21 = vpop.permute.xlu0 %5711  ;;  %v4105_v16 = vmax.f32 %v3966_v15, 0.0  ;;  %v3968_v61 = vpop.f32.mrb[9].mxu1  ;;  %v5708_v4 = vunpack.i.l.bf16 %v5707_v48  ;;  %v5709_v45 = vunpack.i.h.bf16 %v5707_v48 }
 0x3b7   : > { %v5714_v0 = vunpack.i.h.bf16 %v5712_v21  ;;  %v5713_v52 = vunpack.i.l.bf16 %v5712_v21 }
 0x3b8   : > { %4137 = vst.msk [vmem:[#allocation2 + $0x70] sm:$0xff] %vm225_vm0, %v4105_v16  ;;  %v3558_v17 = vsel %vm225_vm0, %v7804_v12, %v5708_v4  ;;  %v3559_v61 = vsel %vm225_vm0, %v7848_v28, %v5709_v45 }
 0x3b9   : > { %v5717_v8 = vpop.permute.xlu1 %5716  ;;  %v3971_v22 = vpop.f32.mrb[10].mxu1  ;;  %v3663_v62 = vsel %vm3662_vm9, %v3630_v5, %v5714_v0  ;;  %v3686_v25 = vsel %vm3662_vm9, %v3653_v49, %v5713_v52 }
 0x3ba   : > { %v5722_v55 = vpop.permute.xlu0 %5721  ;;  %v4106_v58 = vmax.f32 %v3971_v22, 0.0  ;;  %v3973_v36 = vpop.f32.mrb[11].mxu1  ;;  %v5718_v23 = vunpack.i.l.bf16 %v5717_v8  ;;  %v5719_v14 = vunpack.i.h.bf16 %v5717_v8 }
 0x3bb   : > { %v5724_v35 = vunpack.i.h.bf16 %v5722_v55  ;;  %v5723_v2 = vunpack.i.l.bf16 %v5722_v55 }
 0x3bc   : > { %4138 = vst.msk [vmem:[#allocation2 + $0x88] sm:$0xff] %vm225_vm0, %v4106_v58  ;;  %v3590_v48 = vsel %vm1790_vm3, %v3558_v17, %v5718_v23  ;;  %v3591_v37 = vsel %vm1790_vm3, %v3559_v61, %v5719_v14 }
 0x3bd   : > { %v5727_v39 = vpop.permute.xlu1 %5726  ;;  %v3696_v60 = vsel %vm3695_vm10, %v3663_v62, %v5724_v35  ;;  %v3719_v43 = vsel %vm3695_vm10, %v3686_v25, %v5723_v2 }
 0x3be   : > { %v5732_v47 = vpop.permute.xlu0 %5731  ;;  %v5728_v50 = vunpack.i.l.bf16 %v5727_v39  ;;  %v5729_v21 = vunpack.i.h.bf16 %v5727_v39 }
 0x3bf   : > { %v5734_v6 = vunpack.i.h.bf16 %v5732_v47  ;;  %v5733_v57 = vunpack.i.l.bf16 %v5732_v47 }
 0x3c0   : > { %v3622_v32 = vsel %vm1856_vm5, %v3590_v48, %v5728_v50  ;;  %v3623_v44 = vsel %vm1856_vm5, %v3591_v37, %v5729_v21 }
 0x3c1   : > { %v3729_v29 = vsel %vm3728_vm11, %v3696_v60, %v5734_v6  ;;  %v3752_v59 = vsel %vm3728_vm11, %v3719_v43, %v5733_v57  ;;  %v5737_v33 = vpop.permute.xlu1 %5736 }
 0x3c2   : > { %v5742_v51 = vpop.permute.xlu0 %5741  ;;  %3940 = vmatmul.mubr.f32.vlgmr.msra.gmra.mrb[32].mxu0 %v3729_v29  ;;  %4055 = vmatmul.mubr.f32.gmra.mrb[44].mxu1 %v3752_v59  ;;  %v5739_v15 = vunpack.i.h.bf16 %v5737_v33  ;;  %v5738_v16 = vunpack.i.l.bf16 %v5737_v33 }
 0x3c3   : > { %5033 = vmatprep.mubr.msk.f32.mxu1 %vm225_vm0, %v7949_v19  ;;  %5178 = vmatpush3.msra.mxu0 %v7895_v18  ;;  %v5743_v12 = vunpack.i.l.bf16 %v5742_v51  ;;  %v5744_v19 = vunpack.i.h.bf16 %v5742_v51 }
 0x3c4   : > { %5179 = vmatprep.mubr.msk.f32.mxu0 %vm331_vm1, %v7172_v27  ;;  %5234 = vmatprep.subr.bf16.mxu0 %v5987_v40  ;;  %v3654_v53 = vsel %vm1922_vm7, %v3622_v32, %v5738_v16  ;;  %v3655_v28 = vsel %vm1922_vm7, %v3623_v44, %v5739_v15 }
 0x3c5   : > { %v5747_v34 = vpop.permute.xlu1 %5746  ;;  %v3687_v27 = vsel %vm3662_vm9, %v3654_v53, %v5743_v12 }
 0x3c6   : > { %v5752_v18 = vpop.permute.xlu0 %5751  ;;  %5180 = vmatmul.mubr.msk.f32.vlgmr.msra.gmra.mrb[34].mxu0 %vm331_vm1, %v7315_v1  ;;  %v5749_v0 = vunpack.i.h.bf16 %v5747_v34  ;;  %v5748_v8 = vunpack.i.l.bf16 %v5747_v34  ;;  %v3688_v1 = vsel %vm3662_vm9, %v3655_v28, %v5744_v19 }
 0x3c7   : > { %v5753_v55 = vunpack.i.l.bf16 %v5752_v18  ;;  %5182 = vmatprep.mubr.msk.f32.mxu0 %vm331_vm1, %v7438_v38  ;;  %v5754_v52 = vunpack.i.h.bf16 %v5752_v18 }
 0x3c8   : > { %v3720_v54 = vsel %vm3695_vm10, %v3687_v27, %v5748_v8  ;;  %v3721_v35 = vsel %vm3695_vm10, %v3688_v1, %v5749_v0 }
 0x3c9   : > { %v3753_v22 = vsel %vm3728_vm11, %v3720_v54, %v5753_v55  ;;  %v3754_v38 = vsel %vm3728_vm11, %v3721_v35, %v5754_v52 }
 0x3ca   : > { %5183 = vmatmul.mubr.msk.f32.gmra.mrb[36].mxu0 %vm331_vm1, %v7532_v41  ;;  %4060 = vmatmul.mubr.f32.gmra.mrb[46].mxu1 %v3753_v22 }
 0x3cb   : > { %5185 = vmatprep.mubr.msk.f32.mxu0 %vm331_vm1, %v7629_v7  ;;  %5034 = vmatprep.mubr.msk.f32.mxu1 %vm225_vm0, %v7951_v13  ;;  %v5757_v7 = vpop.permute.xlu1 %5756 }
 0x3cc   : > { %v5758_v4 = vunpack.i.l.bf16 %v5757_v7  ;;  %v5759_v62 = vunpack.i.h.bf16 %v5757_v7 }
 0x3ce   : > { %5186 = vmatmul.mubr.msk.f32.gmra.mrb[38].mxu0 %vm331_vm1, %v7730_v24  ;;  %v3976_v2 = vpop.f32.mrb[12].mxu1  ;;  %4065 = vmatmul.mubr.f32.gmra.mrb[48].mxu1 %v3754_v38  ;;  %v4285_v24 = vld [vmem:[#allocation2 + $0x49] ss:$2 sm:$0xff] }
 0x3cf   : > { %5188 = vmatprep.mubr.msk.f32.mxu0 %vm331_vm1, %v7836_v10  ;;  %v4107_v41 = vmax.f32 %v3976_v2, 0.0  ;;  %v3978_v58 = vpop.f32.mrb[13].mxu1  ;;  %5035 = vmatprep.mubr.msk.f32.mxu1 %vm225_vm0, %v7997_v46  ;;  %v5762_v10 = vpop.permute.xlu0 %5761  ;;  %v3560_v46 = vsel %vm225_vm0, %v7850_v42, %v5758_v4 }
 0x3d0   : > { %v5767_v49 = vpop.permute.xlu1 %5766  ;;  %v5763_v39 = vunpack.i.l.bf16 %v5762_v10  ;;  %v5764_v6 = vunpack.i.h.bf16 %v5762_v10 }
 0x3d1   : > { %4139 = vst.msk [vmem:[#allocation2 + $0x90] sm:$0xff] %vm225_vm0, %v4107_v41  ;;  %v5768_v47 = vunpack.i.l.bf16 %v5767_v49  ;;  %v5769_v25 = vunpack.i.h.bf16 %v5767_v49 }
 0x3d2   : > { %v3981_v36 = vpop.f32.mrb[14].mxu1  ;;  %5189 = vmatmul.mubr.msk.f32.gmra.mrb[40].mxu0 %vm331_vm1, %v7964_v20  ;;  %v3561_v20 = vsel %vm225_vm0, %v7886_v26, %v5759_v62  ;;  %v3592_v45 = vsel %vm1790_vm3, %v3560_v46, %v5763_v39 }
 0x3d3   : > { %v4108_v13 = vmax.f32 %v3981_v36, 0.0  ;;  %v3983_v5 = vpop.f32.mrb[15].mxu1  ;;  %5049 = vmatprep.mubr.msk.f32.mxu0 %vm225_vm0, %v4285_v24  ;;  %v5772_v23 = vpop.permute.xlu0 %5771  ;;  %v3624_v50 = vsel %vm1856_vm5, %v3592_v45, %v5768_v47  ;;  %v3593_v14 = vsel %vm1790_vm3, %v3561_v20, %v5764_v6 }
 0x3d4   : > { %v5777_v57 = vpop.permute.xlu1 %5776  ;;  %v5773_v60 = vunpack.i.l.bf16 %v5772_v23  ;;  %v5774_v29 = vunpack.i.h.bf16 %v5772_v23  ;;  %v3625_v59 = vsel %vm1856_vm5, %v3593_v14, %v5769_v25 }
 0x3d5   : > { %4140 = vst.msk [vmem:[#allocation2 + $0xa8] sm:$0xff] %vm225_vm0, %v4108_v13  ;;  %v5778_v43 = vunpack.i.l.bf16 %v5777_v57  ;;  %v5779_v42 = vunpack.i.h.bf16 %v5777_v57 }
 0x3d6   : > { %v3656_v33 = vsel %vm1922_vm7, %v3624_v50, %v5773_v60  ;;  %v3657_v16 = vsel %vm1922_vm7, %v3625_v59, %v5774_v29 }
 0x3d7   : > { %v3689_v15 = vsel %vm3662_vm9, %v3656_v33, %v5778_v43  ;;  %v3690_v37 = vsel %vm3662_vm9, %v3657_v16, %v5779_v42 }
 0x3e1   : > { %v5787_v17 = vpop.permute.xlu1 %5786 }
 0x3e2   : > { %v5782_v21 = vpop.permute.xlu0 %5781  ;;  %v5788_v51 = vunpack.i.l.bf16 %v5787_v17  ;;  %v5789_v32 = vunpack.i.h.bf16 %v5787_v17 }
 0x3e3   : > { %v5784_v48 = vunpack.i.h.bf16 %v5782_v21  ;;  %v5783_v26 = vunpack.i.l.bf16 %v5782_v21 }
 0x3e5   : > { %v3722_v61 = vsel %vm3695_vm10, %v3689_v15, %v5783_v26  ;;  %v3986_v53 = vpop.f32.mrb[16].mxu1  ;;  %v3723_v44 = vsel %vm3695_vm10, %v3690_v37, %v5784_v48  ;;  %v5797_v27 = vpop.permute.xlu1 %5796  ;;  %v2636_v26 = vld [vmem:[#allocation2 + $0x229] sm:$0xff] }
 0x3e6   : > { %v3755_v12 = vsel %vm3728_vm11, %v3722_v61, %v5788_v51  ;;  %v4109_v19 = vmax.f32 %v3986_v53, 0.0  ;;  %v3988_v34 = vpop.f32.mrb[17].mxu1  ;;  %v3756_v18 = vsel %vm3728_vm11, %v3723_v44, %v5789_v32  ;;  %v5792_v55 = vpop.permute.xlu0 %5791  ;;  %v5798_v1 = vunpack.i.l.bf16 %v5797_v27 }
 0x3e7   : > { %4070 = vmatmul.mubr.f32.gmra.mrb[50].mxu1 %v3755_v12  ;;  %v5793_v52 = vunpack.i.l.bf16 %v5792_v55  ;;  %v5794_v22 = vunpack.i.h.bf16 %v5792_v55  ;;  %v5799_v2 = vunpack.i.h.bf16 %v5797_v27 }
 0x3e8   : > { %5036 = vmatprep.mubr.msk.f32.mxu1 %vm225_vm0, %v7999_v31  ;;  %4141 = vst.msk [vmem:[#allocation2 + $0xb0] sm:$0xff] %vm225_vm0, %v4109_v19 }
 0x3e9   : > { %v3991_v28 = vpop.f32.mrb[18].mxu1  ;;  %v3562_v31 = vsel %vm225_vm0, %v7923_v11, %v5793_v52  ;;  %v5807_v35 = vpop.permute.xlu1 %5806  ;;  %v3563_v58 = vsel %vm225_vm0, %v7925_v63, %v5794_v22 }
 0x3ea   : > { %v4110_v0 = vmax.f32 %v3991_v28, 0.0  ;;  %v3993_v8 = vpop.f32.mrb[19].mxu1  ;;  %v5802_v54 = vpop.permute.xlu0 %5801  ;;  %v3594_v36 = vsel %vm1790_vm3, %v3562_v31, %v5798_v1  ;;  %v5809_v5 = vunpack.i.h.bf16 %v5807_v35  ;;  %v3595_v10 = vsel %vm1790_vm3, %v3563_v58, %v5799_v2  ;;  %v2637_v1 = vld [vmem:[#allocation2 + $0x231] sm:$0xff] }
 0x3eb   : > { %4075 = vmatmul.mubr.f32.gmra.mrb[52].mxu1 %v3756_v18  ;;  %v5803_v38 = vunpack.i.l.bf16 %v5802_v54  ;;  %v5804_v7 = vunpack.i.h.bf16 %v5802_v54 }
 0x3ec   : > { %5037 = vmatprep.mubr.msk.f32.mxu1 %vm225_vm0, %v8041_v9  ;;  %4142 = vst.msk [vmem:[#allocation2 + $0xc8] sm:$0xff] %vm225_vm0, %v4110_v0  ;;  %v5808_v9 = vunpack.i.l.bf16 %v5807_v35 }
 0x3ed   : > { %v3626_v24 = vsel %vm1856_vm5, %v3594_v36, %v5803_v38  ;;  %v3627_v49 = vsel %vm1856_vm5, %v3595_v10, %v5804_v7 }
 0x3ee   : > { %v5812_v41 = vpop.permute.xlu0 %5811  ;;  %v3658_v63 = vsel %vm1922_vm7, %v3626_v24, %v5808_v9  ;;  %v3659_v45 = vsel %vm1922_vm7, %v3627_v49, %v5809_v5 }
 0x3ef   : > { %v5813_v13 = vunpack.i.l.bf16 %v5812_v41  ;;  %v5814_v11 = vunpack.i.h.bf16 %v5812_v41 }
 0x3f1   : > { %v3691_v20 = vsel %vm3662_vm9, %v3658_v63, %v5813_v13  ;;  %v3692_v29 = vsel %vm3662_vm9, %v3659_v45, %v5814_v11 }
 0x3fd   : > { %v5817_v4 = vpop.permute.xlu1 %5816 }
 0x3fe   : > { %v5822_v62 = vpop.permute.xlu0 %5821  ;;  %v5819_v39 = vunpack.i.h.bf16 %v5817_v4  ;;  %v5818_v46 = vunpack.i.l.bf16 %v5817_v4  ;;  %v3996_v23 = vpop.f32.mrb[20].mxu1 }
 0x3ff   : > { %v5823_v47 = vunpack.i.l.bf16 %v5822_v62  ;;  %v4111_v6 = vmax.f32 %v3996_v23, 0.0  ;;  %v3998_v57 = vpop.f32.mrb[21].mxu1  ;;  %v5824_v60 = vunpack.i.h.bf16 %v5822_v62 }
 0x400   : > { %v3724_v25 = vsel %vm3695_vm10, %v3691_v20, %v5818_v46  ;;  %v3725_v17 = vsel %vm3695_vm10, %v3692_v29, %v5819_v39  ;;  %v4581_v29 = vld [vmem:[%s8425_s3 + $0x8] sm:$0xff] }
 0x401   : > { %4143 = vst.msk [vmem:[#allocation2 + $0xd0] sm:$0xff] %vm225_vm0, %v4111_v6  ;;  %v5827_v50 = vpop.permute.xlu1 %5826  ;;  %v3757_v14 = vsel %vm3728_vm11, %v3724_v25, %v5823_v47  ;;  %v3758_v32 = vsel %vm3728_vm11, %v3725_v17, %v5824_v60  ;;  %v4583_v17 = vld [vmem:[%s8425_s3 + $0x18] sm:$0xff] }
 0x402   : > { %v5832_v43 = vpop.permute.xlu0 %5831  ;;  %v5828_v59 = vunpack.i.l.bf16 %v5827_v50  ;;  %v4001_v42 = vpop.f32.mrb[22].mxu1  ;;  %4080 = vmatmul.mubr.f32.gmra.mrb[54].mxu1 %v3757_v14  ;;  %v5829_v15 = vunpack.i.h.bf16 %v5827_v50  ;;  %v4580_v14 = vld [vmem:[%s8425_s3] sm:$0xff] }
 0x403   : > { %v5833_v21 = vunpack.i.l.bf16 %v5832_v43  ;;  %v4112_v33 = vmax.f32 %v4001_v42, 0.0  ;;  %v4003_v51 = vpop.f32.mrb[23].mxu1  ;;  %5038 = vmatprep.mubr.msk.f32.mxu1 %vm225_vm0, %v8048_v56  ;;  %v5834_v44 = vunpack.i.h.bf16 %v5832_v43  ;;  %v5235_v42 = vpack.c.bf16 %v4581_v29, %v4580_v14  ;;  %v4201_v29 = vld [vmem:[#allocation2 + $0x89] ss:$2 sm:$0xff] }
 0x404   : > { %v3564_v48 = vsel %vm225_vm0, %v7970_v30, %v5828_v59  ;;  %v3565_v30 = vsel %vm225_vm0, %v7972_v3, %v5829_v15  ;;  %v4582_v59 = vld [vmem:[%s8425_s3 + $0x10] sm:$0xff]  ;;  %v4585_v51 = vld [vmem:[%s8425_s3 + $0x28] sm:$0xff]  ;;  %v4587_v15 = vld [vmem:[%s8425_s3 + $0x38] sm:$0xff] }
 0x405   : > { %4144 = vst.msk [vmem:[#allocation2 + $0xe8] sm:$0xff] %vm225_vm0, %v4112_v33  ;;  %v5837_v16 = vpop.permute.xlu1 %5836  ;;  %v3596_v53 = vsel %vm1790_vm3, %v3564_v48, %v5833_v21  ;;  %v3597_v8 = vsel %vm1790_vm3, %v3565_v30, %v5834_v44  ;;  %5236 = vmatpush1.bf16.msra.mxu0 %v5235_v42  ;;  %v5238_v21 = vpack.c.bf16 %v4583_v17, %v4582_v59  ;;  %v4584_v33 = vld [vmem:[%s8425_s3 + $0x20] sm:$0xff]  ;;  %v4591_v30 = vld [vmem:[%s8425_s3 + $0x58] sm:$0xff] }
 0x406   : > { %v5842_v61 = vpop.permute.xlu0 %5841  ;;  %v5838_v12 = vunpack.i.l.bf16 %v5837_v16  ;;  %4085 = vmatmul.mubr.f32.gmra.mrb[56].mxu1 %v3758_v32  ;;  %v5839_v19 = vunpack.i.h.bf16 %v5837_v16  ;;  %5237 = vmatprep.subr.bf16.mxu0 %v5987_v40  ;;  %v5241_v48 = vpack.c.bf16 %v4585_v51, %v4584_v33  ;;  %v4589_v32 = vld [vmem:[%s8425_s3 + $0x48] sm:$0xff] }
 0x407   : > { %v5843_v37 = vunpack.i.l.bf16 %v5842_v61  ;;  %5039 = vmatprep.mubr.msk.f32.mxu1 %vm225_vm0, %v2636_v26  ;;  %v5844_v55 = vunpack.i.h.bf16 %v5842_v61  ;;  %v4586_v26 = vld [vmem:[%s8425_s3 + $0x30] sm:$0xff]  ;;  %v4588_v61 = vld [vmem:[%s8425_s3 + $0x40] sm:$0xff] }
 0x408   : > { %v3628_v56 = vsel %vm1856_vm5, %v3596_v53, %v5838_v12  ;;  %v3629_v22 = vsel %vm1856_vm5, %v3597_v8, %v5839_v19  ;;  %v5244_v16 = vpack.c.bf16 %v4587_v15, %v4586_v26  ;;  %v4593_v8 = vld [vmem:[%s8425_s3 + $0x68] sm:$0xff] }
 0x409   : > { %v3243_v34 = vpop.permute.xlu1 %3242  ;;  %v3660_v18 = vsel %vm1922_vm7, %v3628_v56, %v5843_v37  ;;  %v3661_v3 = vsel %vm1922_vm7, %v3629_v22, %v5844_v55  ;;  %5239 = vmatpush1.bf16.msra.mxu0 %v5238_v21  ;;  %v5247_v37 = vpack.c.bf16 %v4589_v32, %v4588_v61  ;;  %v4590_v56 = vld [vmem:[%s8425_s3 + $0x50] sm:$0xff] }
 0x40a   : > { %v3371_v28 = vpop.permute.xlu0 %3370  ;;  %v3693_v0 = vsel %vm3662_vm9, %v3660_v18, %v3243_v34  ;;  %5240 = vmatprep.subr.bf16.mxu0 %v5987_v40  ;;  %v5250_v34 = vpack.c.bf16 %v4591_v30, %v4590_v56  ;;  %v4217_v59 = vld [vmem:[#allocation2 + $0xa7] ss:$2 sm:$0xff]  ;;  %v4230_v51 = vld [vmem:[#allocation2 + $0xa8] ss:$2 sm:$0xff] }
 0x40b   : > { %v3726_v27 = vsel %vm3695_vm10, %v3693_v0, %v3371_v28  ;;  %v4592_v0 = vld [vmem:[%s8425_s3 + $0x60] sm:$0xff]  ;;  %v4273_v32 = vld [vmem:[#allocation2 + $0xc8] ss:$2 sm:$0xff] }
 0x40d   : > { %v3499_v54 = vpop.permute.xlu1 %3498  ;;  %5242 = vmatpush1.bf16.msra.mxu0 %v5241_v48  ;;  %v4241_v48 = vld [vmem:[#allocation2 + $0xa9] ss:$2 sm:$0xff] }
 0x40e   : > { %v3245_v52 = vpop.permute.xlu0 %3244  ;;  %v3759_v31 = vsel %vm3728_vm11, %v3726_v27, %v3499_v54  ;;  %5243 = vmatprep.subr.bf16.mxu0 %v5987_v40  ;;  %v5253_v54 = vpack.c.bf16 %v4593_v8, %v4592_v0 }
 0x40f   : > { %4090 = vmatmul.mubr.f32.gmra.mrb[58].mxu1 %v3759_v31  ;;  %v3694_v35 = vsel %vm3662_vm9, %v3661_v3, %v3245_v52  ;;  %v4594_v3 = vld [vmem:[%s8425_s3 + $0x70] sm:$0xff] }
 0x410   : > { %5040 = vmatprep.mubr.msk.f32.mxu1 %vm225_vm0, %v2637_v1 }
 0x411   : > { %v3373_v38 = vpop.permute.xlu1 %3372  ;;  %5245 = vmatpush1.bf16.msra.mxu0 %v5244_v16 }
 0x412   : > { %v3501_v2 = vpop.permute.xlu0 %3500  ;;  %v3727_v41 = vsel %vm3695_vm10, %v3694_v35, %v3373_v38  ;;  %5246 = vmatprep.subr.bf16.mxu0 %v5987_v40  ;;  %v4595_v35 = vld [vmem:[%s8425_s3 + $0x78] sm:$0xff] }
 0x413   : > { %v3760_v58 = vsel %vm3728_vm11, %v3727_v41, %v3501_v2  ;;  %v5256_v38 = vpack.c.bf16 %v4595_v35, %v4594_v3  ;;  %v4596_v2 = vld [vmem:[%s8425_s3 + $0x80] sm:$0xff]  ;;  %v4597_v41 = vld [vmem:[%s8425_s3 + $0x88] sm:$0xff] }
 0x414   : > { %4095 = vmatmul.mubr.f32.gmra.mrb[60].mxu1 %v3760_v58  ;;  %v5259_v58 = vpack.c.bf16 %v4597_v41, %v4596_v2 }
 0x415   : > { %v4006_v7 = vpop.f32.mrb[24].mxu1  ;;  %5248 = vmatpush1.bf16.msra.mxu0 %v5247_v37 }
 0x416   : > { %v4113_v9 = vmax.f32 %v4006_v7, 0.0  ;;  %v4008_v36 = vpop.f32.mrb[25].mxu1  ;;  %5249 = vmatprep.subr.bf16.mxu0 %v5987_v40 }
 0x417   : > { %v4215_v36 = vld [vmem:[#allocation2 + $0x67] ss:$2 sm:$0xff] }
 0x418   : > { %4145 = vst.msk [vmem:[#allocation2 + $0xf0] sm:$0xff] %vm225_vm0, %v4113_v9  ;;  %v4229_v9 = vld [vmem:[#allocation2 + $0x68] ss:$2 sm:$0xff] }
 0x419   : > { %v4011_v24 = vpop.f32.mrb[26].mxu1  ;;  %5251 = vmatpush1.bf16.msra.mxu0 %v5250_v34 }
 0x41a   : > { %v4114_v13 = vmax.f32 %v4011_v24, 0.0  ;;  %v4013_v5 = vpop.f32.mrb[27].mxu1  ;;  %5252 = vmatprep.subr.bf16.mxu0 %v5987_v40 }
 0x41c   : > { %4146 = vst.msk [vmem:[#allocation2 + $0x108] sm:$0xff] %vm225_vm0, %v4114_v13 }
 0x41d   : > { %5254 = vmatpush1.bf16.msra.mxu0 %v5253_v54 }
 0x41e   : > { %5255 = vmatprep.subr.bf16.mxu0 %v5987_v40 }
 0x41f   : > { %v4219_v14 = vld [vmem:[#allocation2 + $0xe7] ss:$2 sm:$0xff]  ;;  %v4231_v21 = vld [vmem:[#allocation2 + $0xe8] ss:$2 sm:$0xff] }
 0x420   : > { %v5890_v17 = vpack.i.bf16 %v4219_v14, %v4217_v59  ;;  %v4243_v33 = vld [vmem:[#allocation2 + $0xe9] ss:$2 sm:$0xff]  ;;  %v5895_v26 = vpack.i.bf16 %v4231_v21, %v4230_v51 }
 0x421   : > { %5257 = vmatpush1.bf16.msra.mxu0 %v5256_v38  ;;  %v5900_v15 = vpack.i.bf16 %v4243_v33, %v4241_v48 }
 0x422   : > { %5258 = vmatprep.subr.bf16.mxu0 %v5987_v40 }
 0x425   : > { %5260 = vmatpush1.bf16.msra.mxu0 %v5259_v58 }
 0x42e   : > { %v4016_v10 = vpop.f32.mrb[28].mxu1 }
 0x42f   : > { %v4115_v49 = vmax.f32 %v4016_v10, 0.0  ;;  %v4018_v11 = vpop.f32.mrb[29].mxu1 }
 0x431   : > { %4147 = vst.msk [vmem:[#allocation2 + $0x110] sm:$0xff] %vm225_vm0, %v4115_v49 }
 0x432   : > { %v4021_v4 = vpop.f32.mrb[30].mxu1 }
 0x433   : > { %v4116_v62 = vmax.f32 %v4021_v4, 0.0  ;;  %v4023_v39 = vpop.f32.mrb[31].mxu1  ;;  %v4255_v4 = vld [vmem:[#allocation2 + $0x87] ss:$2 sm:$0xff] }
 0x435   : > { %4148 = vst.msk [vmem:[#allocation2 + $0x128] sm:$0xff] %vm225_vm0, %v4116_v62 }
 0x438   : > { %v4275_v16 = vld [vmem:[#allocation2 + $0x108] ss:$2 sm:$0xff]  ;;  %v4259_v61 = vld [vmem:[#allocation2 + $0x107] ss:$2 sm:$0xff] }
 0x439   : > { %v5910_v37 = vpack.i.bf16 %v4275_v16, %v4273_v32  ;;  %v4205_v30 = vld [vmem:[#allocation2 + $0x109] ss:$2 sm:$0xff] }
 0x449   : > { %v4026_v46 = vpop.f32.mrb[32].mxu1 }
 0x44a   : > { %v4117_v47 = vmax.f32 %v4026_v46, 0.0  ;;  %v4028_v23 = vpop.f32.mrb[33].mxu1 }
 0x44b   : > { %v4253_v23 = vld [vmem:[#allocation2 + $0x47] ss:$2 sm:$0xff] }
 0x44c   : > { %4149 = vst.msk [vmem:[#allocation2 + $0x130] sm:$0xff] %vm225_vm0, %v4117_v47  ;;  %v4239_v47 = vld [vmem:[#allocation2 + $0x69] ss:$2 sm:$0xff] }
 0x44d   : > { %v4031_v63 = vpop.f32.mrb[34].mxu1 }
 0x44e   : > { %v4118_v6 = vmax.f32 %v4031_v63, 0.0  ;;  %v4033_v57 = vpop.f32.mrb[35].mxu1 }
 0x44f   : > { %v4271_v57 = vld [vmem:[#allocation2 + $0x88] ss:$2 sm:$0xff] }
 0x450   : > { %4150 = vst.msk [vmem:[#allocation2 + $0x148] sm:$0xff] %vm225_vm0, %v4118_v6  ;;  %v5870_v6 = vpack.i.bf16 %v4255_v4, %v4253_v23 }
 0x453   : > { %v4232_v54 = vld [vmem:[#allocation2 + $0x128] ss:$2 sm:$0xff]  ;;  %v4245_v41 = vld [vmem:[#allocation2 + $0x129] ss:$2 sm:$0xff] }
 0x466   : > { %v4036_v20 = vpop.f32.mrb[36].mxu1 }
 0x467   : > { %v4119_v25 = vmax.f32 %v4036_v20, 0.0  ;;  %v4038_v45 = vpop.f32.mrb[37].mxu1  ;;  %v4187_v20 = vld [vmem:[#allocation2 + $0xc8] ss:$2 sm:$0xff] }
 0x468   : > { %v4185_v45 = vld [vmem:[#allocation2 + $0x88] ss:$2 sm:$0xff] }
 0x469   : > { %4151 = vst.msk [vmem:[#allocation2 + $0x150] sm:$0xff] %vm225_vm0, %v4119_v25  ;;  %v4269_v25 = vld [vmem:[#allocation2 + $0x48] ss:$2 sm:$0xff] }
 0x46a   : > { %v4041_v60 = vpop.f32.mrb[38].mxu1 }
 0x46b   : > { %v4120_v50 = vmax.f32 %v4041_v60, 0.0  ;;  %v4043_v43 = vpop.f32.mrb[39].mxu1  ;;  %v5875_v60 = vpack.i.bf16 %v4271_v57, %v4269_v25 }
 0x46c   : > { %v4203_v43 = vld [vmem:[#allocation2 + $0xc9] ss:$2 sm:$0xff] }
 0x46d   : > { %4152 = vst.msk [vmem:[#allocation2 + $0x168] sm:$0xff] %vm225_vm0, %v4120_v50  ;;  %v5880_v50 = vpack.i.bf16 %v4187_v20, %v4185_v45  ;;  %v5885_v42 = vpack.i.bf16 %v4203_v43, %v4201_v29 }
 0x470   : > { %v4191_v56 = vld [vmem:[#allocation2 + $0x148] ss:$2 sm:$0xff]  ;;  %v4261_v58 = vld [vmem:[#allocation2 + $0x147] ss:$2 sm:$0xff] }
 0x481   : > { %v4046_v12 = vpop.f32.mrb[40].mxu1 }
 0x482   : > { %v4121_v53 = vmax.f32 %v4046_v12, 0.0  ;;  %v4048_v44 = vpop.f32.mrb[41].mxu1  ;;  %v4257_v12 = vld [vmem:[#allocation2 + $0xc7] ss:$2 sm:$0xff] }
 0x483   : > { %v4207_v44 = vld [vmem:[#allocation2 + $0x149] ss:$2 sm:$0xff] }
 0x484   : > { %4153 = vst.msk [vmem:[#allocation2 + $0x170] sm:$0xff] %vm225_vm0, %v4121_v53  ;;  %v5905_v53 = vpack.i.bf16 %v4259_v61, %v4257_v12  ;;  %v5920_v34 = vpack.i.bf16 %v4207_v44, %v4205_v30  ;;  %v5852_v30 = vpop.permute.xlu0 %5851 }
 0x485   : > { %v4051_v19 = vpop.f32.mrb[42].mxu1 }
 0x486   : > { %v4122_v18 = vmax.f32 %v4051_v19, 0.0  ;;  %v4053_v28 = vpop.f32.mrb[43].mxu1  ;;  %v4189_v19 = vld [vmem:[#allocation2 + $0x108] ss:$2 sm:$0xff] }
 0x488   : > { %4154 = vst.msk [vmem:[#allocation2 + $0x188] sm:$0xff] %vm225_vm0, %v4122_v18  ;;  %v5915_v18 = vpack.i.bf16 %v4191_v56, %v4189_v19  ;;  %v5847_v56 = vpop.permute.xlu1 %5846 }
 0x489   : > { %v5848_v19 = vunpack.i.l.bf16 %v5847_v56 }
 0x48b   : > { %v4233_v28 = vld [vmem:[#allocation2 + $0x168] ss:$2 sm:$0xff]  ;;  %v4223_v0 = vld [vmem:[#allocation2 + $0x167] ss:$2 sm:$0xff] }
 0x495   : > { %v3941_v55 = vpop.f32.mrb[32].mxu0  ;;  %v4056_v27 = vpop.f32.mrb[44].mxu1 }
 0x496   : > { %v4100_v52 = vmax.f32 %v3941_v55, 0.0  ;;  %v4123_v22 = vmax.f32 %v4056_v27, 0.0  ;;  %v3943_v1 = vpop.f32.mrb[33].mxu0  ;;  %v4058_v31 = vpop.f32.mrb[45].mxu1 }
 0x497   : > { %v4247_v31 = vld [vmem:[#allocation2 + $0x169] ss:$2 sm:$0xff] }
 0x498   : > { %4132 = vst.msk [vmem:[#allocation2 + $0x28] sm:$0xff] %vm225_vm0, %v4100_v52  ;;  %4155 = vst.msk [vmem:[#allocation2 + $0x190] sm:$0xff] %vm225_vm0, %v4123_v22  ;;  %v4221_v52 = vld [vmem:[#allocation2 + $0x127] ss:$2 sm:$0xff]  ;;  %v5930_v22 = vpack.i.bf16 %v4233_v28, %v4232_v54  ;;  %v5849_v28 = vunpack.i.h.bf16 %v5847_v56  ;;  %v5854_v54 = vunpack.i.h.bf16 %v5852_v30 }
 0x499   : > { %v5925_v1 = vpack.i.bf16 %v4223_v0, %v4221_v52  ;;  %v4167_v52 = vld [vmem:[#allocation2 + $0x47] ss:$2 sm:$0xff] }
 0x49d   : > { %v4061_v7 = vpop.f32.mrb[46].mxu1 }
 0x49e   : > { %v4124_v24 = vmax.f32 %v4061_v7, 0.0  ;;  %v4063_v13 = vpop.f32.mrb[47].mxu1  ;;  %v5935_v7 = vpack.i.bf16 %v4247_v31, %v4245_v41  ;;  %v4525_v31 = vsel %vm225_vm0, %v4167_v52, %v5849_v28 }
 0x49f   : > { %v4228_v5 = vld [vmem:[#allocation2 + $0x28] ss:$2 sm:$0xff]  ;;  %v4213_v10 = vld [vmem:[#allocation2 + $0x27] ss:$2 sm:$0xff] }
 0x4a0   : > { %v5860_v49 = vpack.i.bf16 %v4229_v9, %v4228_v5  ;;  %v5855_v11 = vpack.i.bf16 %v4215_v36, %v4213_v10  ;;  %4156 = vst.msk [vmem:[#allocation2 + $0x1a8] sm:$0xff] %vm225_vm0, %v4124_v24  ;;  %v4237_v40 = vld [vmem:[#allocation2 + $0x29] ss:$2 sm:$0xff]  ;;  %v4279_v36 = vld [vmem:[#allocation2 + $0x188] ss:$2 sm:$0xff] }
 0x4a1   : > { %v4066_v62 = vpop.f32.mrb[48].mxu1  ;;  %v5865_v63 = vpack.i.bf16 %v4239_v47, %v4237_v40  ;;  %v4263_v3 = vld [vmem:[#allocation2 + $0x187] ss:$2 sm:$0xff]  ;;  %v4277_v24 = vld [vmem:[#allocation2 + $0x148] ss:$2 sm:$0xff] }
 0x4a2   : > { %5861 = vrot.lane.b32.xlu0 %v5860_v49, %s5986_s29  ;;  %5856 = vrot.lane.b32.xlu1 %v5855_v11, %s5984_s23  ;;  %v4125_v39 = vmax.f32 %v4066_v62, 0.0  ;;  %v4068_v46 = vpop.f32.mrb[49].mxu1  ;;  %v5940_v9 = vpack.i.bf16 %v4263_v3, %v4261_v58  ;;  %v5945_v13 = vpack.i.bf16 %v4279_v36, %v4277_v24  ;;  %v4209_v10 = vld [vmem:[#allocation2 + $0x189] ss:$2 sm:$0xff]  ;;  %v4193_v11 = vld [vmem:[#allocation2 + $0x188] ss:$2 sm:$0xff] }
 0x4a4   : > { %4157 = vst.msk [vmem:[#allocation2 + $0x1b0] sm:$0xff] %vm225_vm0, %v4125_v39 }
 0x4a6   : > { %5866 = vrot.lane.b32.xlu1 %v5865_v63, %s5988_s30  ;;  %5871 = vrot.lane.b32.xlu0 %v5870_v6, %s5990_s8 }
 0x4aa   : > { %5876 = vrot.lane.b32.xlu1 %v5875_v60, %s5989_s7  ;;  %5881 = vrot.lane.b32.xlu0 %v5880_v50, %s5980_s26 }
 0x4ab   : > { %v4249_v5 = vld [vmem:[#allocation2 + $0x1a9] ss:$2 sm:$0xff]  ;;  %v4234_v25 = vld [vmem:[#allocation2 + $0x1a8] ss:$2 sm:$0xff] }
 0x4ac   : > { %v4225_v45 = vld [vmem:[#allocation2 + $0x1a7] ss:$2 sm:$0xff] }
 0x4ae   : > { %5886 = vrot.lane.b32.xlu1 %v5885_v42, %s5982_s11  ;;  %5891 = vrot.lane.b32.xlu0 %v5890_v17, %s5984_s23  ;;  %v8305_v17 = vpop.f32.mrb[34].mxu0 }
 0x4af   : > { %v8307_v51 = vpop.f32.mrb[35].mxu0 }
 0x4b2   : > { %5896 = vrot.lane.b32.xlu1 %v5895_v26, %s5986_s29  ;;  %5901 = vrot.lane.b32.xlu0 %v5900_v15, %s5988_s30  ;;  %v8309_v15 = vpop.f32.mrb[36].mxu0 }
 0x4b3   : > { %v8314_v16 = vpop.f32.mrb[37].mxu0 }
 0x4b4   : > { %v8316_v61 = vpop.f32.mrb[38].mxu0 }
 0x4b5   : > { %v8318_v32 = vpop.f32.mrb[39].mxu0 }
 0x4b6   : > { %5911 = vrot.lane.b32.xlu0 %v5910_v37, %s5989_s7  ;;  %5906 = vrot.lane.b32.xlu1 %v5905_v53, %s5990_s8  ;;  %v8320_v12 = vpop.f32.mrb[40].mxu0 }
 0x4b7   : > { %v8322_v37 = vpop.f32.mrb[41].mxu0 }
 0x4ba   : > { %5921 = vrot.lane.b32.xlu0 %v5920_v34, %s5982_s11  ;;  %5916 = vrot.lane.b32.xlu1 %v5915_v18, %s5980_s26  ;;  %v4071_v8 = vpop.f32.mrb[50].mxu1  ;;  %v4165_v34 = vld [vmem:[#allocation2 + $0x7] ss:$2 sm:$0xff]  ;;  %v5853_v18 = vunpack.i.l.bf16 %v5852_v30 }
 0x4bb   : > { %v4126_v55 = vmax.f32 %v4071_v8, 0.0  ;;  %v4073_v27 = vpop.f32.mrb[51].mxu1  ;;  %v4524_v0 = vsel %vm225_vm0, %v4165_v34, %v5848_v19 }
 0x4bd   : > { %4158 = vst.msk [vmem:[#allocation2 + $0x1c8] sm:$0xff] %vm225_vm0, %v4126_v55 }
 0x4be   : > { %5931 = vrot.lane.b32.xlu0 %v5930_v22, %s5986_s29  ;;  %5926 = vrot.lane.b32.xlu1 %v5925_v1, %s5984_s23  ;;  %v4076_v35 = vpop.f32.mrb[52].mxu1  ;;  %v4532_v1 = vsel %vm1790_vm3, %v4524_v0, %v5853_v18 }
 0x4bf   : > { %v4127_v38 = vmax.f32 %v4076_v35, 0.0  ;;  %v4078_v2 = vpop.f32.mrb[53].mxu1 }
 0x4c1   : > { %4159 = vst.msk [vmem:[#allocation2 + $0x1d0] sm:$0xff] %vm225_vm0, %v4127_v38 }
 0x4c2   : > { %5936 = vrot.lane.b32.xlu1 %v5935_v7, %s5988_s30  ;;  %5941 = vrot.lane.b32.xlu0 %v5940_v9, %s5990_s8  ;;  %v4533_v7 = vsel %vm1790_vm3, %v4525_v31, %v5854_v54 }
 0x4c6   : > { %5946 = vrot.lane.b32.xlu1 %v5945_v13, %s5989_s7  ;;  %4448 = vrot.lane.b32.xlu0 %v4249_v5, %s5988_s30 }
 0x4c8   : > { %v4211_v49 = vld [vmem:[#allocation2 + $0x1c9] ss:$2 sm:$0xff]  ;;  %v4195_v40 = vld [vmem:[#allocation2 + $0x1c8] ss:$2 sm:$0xff] }
 0x4c9   : > { %v5955_v4 = vpack.i.bf16 %v4211_v49, %v4209_v10  ;;  %v5950_v62 = vpack.i.bf16 %v4195_v40, %v4193_v11  ;;  %v4265_v39 = vld [vmem:[#allocation2 + $0x1c7] ss:$2 sm:$0xff]  ;;  %v4281_v26 = vld [vmem:[#allocation2 + $0x1c8] ss:$2 sm:$0xff] }
 0x4cb   : > { %5956 = vrot.lane.b32.xlu1 %v5955_v4, %s5982_s11  ;;  %5951 = vrot.lane.b32.xlu0 %v5950_v62, %s5980_s26  ;;  %s5060_s26 = sshll.u32 %s8497_s19, 6 }
 0x4cf   : > { %4480 = vrot.lane.b32.xlu1 %v4265_v39, %s5990_s8 }
 0x4d5   : > { %v4081_v46 = vpop.f32.mrb[54].mxu1 }
 0x4d6   : > { %v4128_v47 = vmax.f32 %v4081_v46, 0.0  ;;  %v4083_v23 = vpop.f32.mrb[55].mxu1 }
 0x4d8   : > { %4160 = vst.msk [vmem:[#allocation2 + $0x1e8] sm:$0xff] %vm225_vm0, %v4128_v47 }
 0x4d9   : > { %v4086_v63 = vpop.f32.mrb[56].mxu1 }
 0x4da   : > { %v4129_v6 = vmax.f32 %v4086_v63, 0.0  ;;  %v4088_v57 = vpop.f32.mrb[57].mxu1 }
 0x4dc   : > { %4161 = vst.msk [vmem:[#allocation2 + $0x1f0] sm:$0xff] %vm225_vm0, %v4129_v6 }
 0x4e2   : > { %v4091_v20 = vpop.f32.mrb[58].mxu1 }
 0x4e3   : > { %v4130_v60 = vmax.f32 %v4091_v20, 0.0  ;;  %v4093_v50 = vpop.f32.mrb[59].mxu1  ;;  %v4235_v43 = vld [vmem:[#allocation2 + $0x1e8] ss:$2 sm:$0xff]  ;;  %v4227_v14 = vld [vmem:[#allocation2 + $0x1e7] ss:$2 sm:$0xff] }
 0x4e4   : > { %v5965_v29 = vpack.i.bf16 %v4235_v43, %v4234_v25  ;;  %v5960_v59 = vpack.i.bf16 %v4227_v14, %v4225_v45  ;;  %v4251_v48 = vld [vmem:[#allocation2 + $0x1e9] ss:$2 sm:$0xff] }
 0x4e5   : > { %4162 = vst.msk [vmem:[#allocation2 + $0x208] sm:$0xff] %vm225_vm0, %v4130_v60  ;;  %v4287_v20 = vld [vmem:[#allocation2 + $0x89] ss:$2 sm:$0xff] }
 0x4e6   : > { %5966 = vrot.lane.b32.xlu1 %v5965_v29, %s5986_s29  ;;  %5961 = vrot.lane.b32.xlu0 %v5960_v59, %s5984_s23  ;;  %v4169_v25 = vld [vmem:[#allocation2 + $0x87] ss:$2 sm:$0xff]  ;;  %s8393_s29 = scalar_lea.vmem %s8427_s5, %s5060_s26 }
 0x4e7   : > { %v4096_v42 = vpop.f32.mrb[60].mxu1  ;;  %v4171_v29 = vld [vmem:[#allocation2 + $0xc7] ss:$2 sm:$0xff] }
 0x4e8   : > { %v4131_v21 = vmax.f32 %v4096_v42, 0.0  ;;  %v4098_v33 = vpop.f32.mrb[61].mxu1 }
 0x4ea   : > { %4163 = vst.msk [vmem:[#allocation2 + $0x210] sm:$0xff] %vm225_vm0, %v4131_v21  ;;  %4450 = vrot.lane.b32.xlu1 %v4251_v48, %s5988_s30  ;;  %4512 = vrot.lane.b32.xlu0 %v4281_v26, %s5989_s7 }
 0x4f1   : > { %v4283_v53 = vld [vmem:[#allocation2 + $0x208] ss:$2 sm:$0xff]  ;;  %v4267_v44 = vld [vmem:[#allocation2 + $0x207] ss:$2 sm:$0xff] }
 0x4f2   : > { %4514 = vrot.lane.b32.xlu1 %v4283_v53, %s5989_s7  ;;  %4482 = vrot.lane.b32.xlu0 %v4267_v44, %s5990_s8  ;;  %v4289_v53 = vld [vmem:[#allocation2 + $0xc9] ss:$2 sm:$0xff] }
 0x514   : > { %v5862_v8 = vpop.permute.xlu0 %5861  ;;  %v5857_v55 = vpop.permute.xlu1 %5856 }
 0x515   : > { %v5858_v27 = vunpack.i.l.bf16 %v5857_v55  ;;  %v5863_v22 = vunpack.i.l.bf16 %v5862_v8  ;;  %v5859_v3 = vunpack.i.h.bf16 %v5857_v55  ;;  %v5864_v58 = vunpack.i.h.bf16 %v5862_v8 }
 0x517   : > { %v4540_v35 = vsel %vm1856_vm5, %v4532_v1, %v5858_v27  ;;  %v4541_v24 = vsel %vm1856_vm5, %v4533_v7, %v5859_v3  ;;  %v4291_v7 = vld [vmem:[#allocation2 + $0x109] ss:$2 sm:$0xff] }
 0x518   : > { %v5867_v38 = vpop.permute.xlu1 %5866  ;;  %v5872_v2 = vpop.permute.xlu0 %5871  ;;  %v4548_v9 = vsel %vm1922_vm7, %v4540_v35, %v5863_v22  ;;  %v4549_v39 = vsel %vm1922_vm7, %v4541_v24, %v5864_v58  ;;  %v4173_v24 = vld [vmem:[#allocation2 + $0x107] ss:$2 sm:$0xff] }
 0x519   : > { %v5868_v41 = vunpack.i.l.bf16 %v5867_v38  ;;  %v5873_v36 = vunpack.i.l.bf16 %v5872_v2  ;;  %v5869_v13 = vunpack.i.h.bf16 %v5867_v38  ;;  %v5874_v40 = vunpack.i.h.bf16 %v5872_v2 }
 0x51b   : > { %v4556_v5 = vsel %vm3662_vm9, %v4548_v9, %v5868_v41  ;;  %v4557_v23 = vsel %vm3662_vm9, %v4549_v39, %v5869_v13  ;;  %v4175_v39 = vld [vmem:[#allocation2 + $0x147] ss:$2 sm:$0xff] }
 0x51c   : > { %v5877_v10 = vpop.permute.xlu1 %5876  ;;  %v5882_v49 = vpop.permute.xlu0 %5881  ;;  %v4564_v4 = vsel %vm3695_vm10, %v4556_v5, %v5873_v36  ;;  %v4565_v14 = vsel %vm3695_vm10, %v4557_v23, %v5874_v40 }
 0x51d   : > { %v5878_v11 = vunpack.i.l.bf16 %v5877_v10  ;;  %v5883_v62 = vunpack.i.l.bf16 %v5882_v49  ;;  %v5879_v46 = vunpack.i.h.bf16 %v5877_v10  ;;  %v5884_v63 = vunpack.i.h.bf16 %v5882_v49 }
 0x51f   : > { %v4572_v47 = vsel %vm3728_vm11, %v4564_v4, %v5878_v11  ;;  %v4526_v50 = vsel %vm225_vm0, %v4169_v25, %v5883_v62  ;;  %v4573_v42 = vsel %vm3728_vm11, %v4565_v14, %v5879_v46  ;;  %v4527_v21 = vsel %vm225_vm0, %v4171_v29, %v5884_v63  ;;  %v4293_v4 = vld [vmem:[#allocation2 + $0x149] ss:$2 sm:$0xff] }
 0x520   : > { %4817 = vmatmul.mubr.f32.vlgmr.msra.gmra.mrb[42].mxu0 %v4572_v47  ;;  %v5887_v6 = vpop.permute.xlu1 %5886  ;;  %v5892_v57 = vpop.permute.xlu0 %5891 }
 0x521   : > { %v5889_v45 = vunpack.i.h.bf16 %v5887_v6  ;;  %v5888_v60 = vunpack.i.l.bf16 %v5887_v6  ;;  %5050 = vmatprep.mubr.msk.f32.mxu0 %vm225_vm0, %v4287_v20  ;;  %v5893_v43 = vunpack.i.l.bf16 %v5892_v57  ;;  %v5894_v33 = vunpack.i.h.bf16 %v5892_v57 }
 0x523   : > { %v4534_v59 = vsel %vm1790_vm3, %v4526_v50, %v5888_v60  ;;  %v4535_v44 = vsel %vm1790_vm3, %v4527_v21, %v5889_v45 }
 0x524   : > { %4822 = vmatmul.mubr.f32.gmra.mrb[44].mxu0 %v4573_v42  ;;  %v5897_v48 = vpop.permute.xlu1 %5896  ;;  %v5902_v26 = vpop.permute.xlu0 %5901  ;;  %v4542_v19 = vsel %vm1856_vm5, %v4534_v59, %v5893_v43  ;;  %v4543_v28 = vsel %vm1856_vm5, %v4535_v44, %v5894_v33 }
 0x525   : > { %v5899_v56 = vunpack.i.h.bf16 %v5897_v48  ;;  %v5898_v30 = vunpack.i.l.bf16 %v5897_v48  ;;  %5051 = vmatprep.mubr.msk.f32.mxu0 %vm225_vm0, %v4289_v53  ;;  %v5903_v34 = vunpack.i.l.bf16 %v5902_v26  ;;  %v5904_v0 = vunpack.i.h.bf16 %v5902_v26 }
 0x527   : > { %v4550_v18 = vsel %vm1922_vm7, %v4542_v19, %v5898_v30  ;;  %v4551_v27 = vsel %vm1922_vm7, %v4543_v28, %v5899_v56  ;;  %v4295_v30 = vld [vmem:[#allocation2 + $0x189] ss:$2 sm:$0xff] }
 0x528   : > { %v5912_v8 = vpop.permute.xlu0 %5911  ;;  %v5907_v55 = vpop.permute.xlu1 %5906  ;;  %v4558_v1 = vsel %vm3662_vm9, %v4550_v18, %v5903_v34  ;;  %v4559_v41 = vsel %vm3662_vm9, %v4551_v27, %v5904_v0  ;;  %v4297_v18 = vld [vmem:[#allocation2 + $0x1c9] ss:$2 sm:$0xff] }
 0x529   : > { %v5913_v54 = vunpack.i.l.bf16 %v5912_v8  ;;  %v5909_v52 = vunpack.i.h.bf16 %v5907_v55  ;;  %v5908_v22 = vunpack.i.l.bf16 %v5907_v55  ;;  %v5914_v3 = vunpack.i.h.bf16 %v5912_v8 }
 0x52b   : > { %v4566_v31 = vsel %vm3695_vm10, %v4558_v1, %v5908_v22  ;;  %v4567_v9 = vsel %vm3695_vm10, %v4559_v41, %v5909_v52  ;;  %v4177_v52 = vld [vmem:[#allocation2 + $0x187] ss:$2 sm:$0xff] }
 0x52c   : > { %v5922_v35 = vpop.permute.xlu0 %5921  ;;  %v5917_v38 = vpop.permute.xlu1 %5916  ;;  %v4574_v2 = vsel %vm3728_vm11, %v4566_v31, %v5913_v54  ;;  %v4575_v11 = vsel %vm3728_vm11, %v4567_v9, %v5914_v3 }
 0x52d   : > { %v5918_v58 = vunpack.i.l.bf16 %v5917_v38  ;;  %4827 = vmatmul.mubr.f32.gmra.mrb[46].mxu0 %v4574_v2  ;;  %v5923_v36 = vunpack.i.l.bf16 %v5922_v35  ;;  %v5919_v13 = vunpack.i.h.bf16 %v5917_v38  ;;  %v5924_v62 = vunpack.i.h.bf16 %v5922_v35  ;;  %v4179_v38 = vld [vmem:[#allocation2 + $0x1c7] ss:$2 sm:$0xff] }
 0x52e   : > { %5052 = vmatprep.mubr.msk.f32.mxu0 %vm225_vm0, %v4291_v7 }
 0x52f   : > { %v4528_v5 = vsel %vm225_vm0, %v4173_v24, %v5918_v58  ;;  %v4529_v23 = vsel %vm225_vm0, %v4175_v39, %v5919_v13  ;;  %v4299_v39 = vld [vmem:[#allocation2 + $0x209] ss:$2 sm:$0xff] }
 0x530   : > { %v5932_v10 = vpop.permute.xlu0 %5931  ;;  %v5927_v49 = vpop.permute.xlu1 %5926  ;;  %v4536_v47 = vsel %vm1790_vm3, %v4528_v5, %v5923_v36  ;;  %v4537_v60 = vsel %vm1790_vm3, %v4529_v23, %v5924_v62 }
 0x531   : > { %v5928_v40 = vunpack.i.l.bf16 %v5927_v49  ;;  %4832 = vmatmul.mubr.f32.gmra.mrb[48].mxu0 %v4575_v11  ;;  %v5933_v46 = vunpack.i.l.bf16 %v5932_v10  ;;  %v5929_v63 = vunpack.i.h.bf16 %v5927_v49  ;;  %v5934_v45 = vunpack.i.h.bf16 %v5932_v10 }
 0x532   : > { %5053 = vmatprep.mubr.msk.f32.mxu0 %vm225_vm0, %v4293_v4 }
 0x533   : > { %v4544_v6 = vsel %vm1856_vm5, %v4536_v47, %v5928_v40  ;;  %v4545_v14 = vsel %vm1856_vm5, %v4537_v60, %v5929_v63 }
 0x534   : > { %v5937_v57 = vpop.permute.xlu1 %5936  ;;  %v5942_v20 = vpop.permute.xlu0 %5941  ;;  %v4552_v43 = vsel %vm1922_vm7, %v4544_v6, %v5933_v46  ;;  %v4553_v26 = vsel %vm1922_vm7, %v4545_v14, %v5934_v45 }
 0x535   : > { %v5938_v25 = vunpack.i.l.bf16 %v5937_v57  ;;  %v5943_v50 = vunpack.i.l.bf16 %v5942_v20  ;;  %v5939_v29 = vunpack.i.h.bf16 %v5937_v57  ;;  %v5944_v33 = vunpack.i.h.bf16 %v5942_v20 }
 0x537   : > { %v4560_v59 = vsel %vm3662_vm9, %v4552_v43, %v5938_v25  ;;  %v4561_v56 = vsel %vm3662_vm9, %v4553_v26, %v5939_v29 }
 0x538   : > { %v5947_v42 = vpop.permute.xlu1 %5946  ;;  %v4568_v48 = vsel %vm3695_vm10, %v4560_v59, %v5943_v50  ;;  %v4569_v19 = vsel %vm3695_vm10, %v4561_v56, %v5944_v33  ;;  %v4449_v28 = vpop.permute.xlu0 %4448 }
 0x539   : > { %v5948_v21 = vunpack.i.l.bf16 %v5947_v42  ;;  %v5949_v53 = vunpack.i.h.bf16 %v5947_v42 }
 0x53b   : > { %v4576_v44 = vsel %vm3728_vm11, %v4568_v48, %v5948_v21  ;;  %v4577_v34 = vsel %vm3728_vm11, %v4569_v19, %v5949_v53 }
 0x53c   : > { %4837 = vmatmul.mubr.f32.gmra.mrb[50].mxu0 %v4576_v44 }
 0x53d   : > { %5054 = vmatprep.mubr.msk.f32.mxu0 %vm225_vm0, %v4295_v30  ;;  %v5957_v0 = vpop.permute.xlu1 %5956  ;;  %v5952_v8 = vpop.permute.xlu0 %5951 }
 0x53e   : > { %v5953_v55 = vunpack.i.l.bf16 %v5952_v8  ;;  %v5958_v54 = vunpack.i.l.bf16 %v5957_v0  ;;  %v5954_v22 = vunpack.i.h.bf16 %v5952_v8  ;;  %v5959_v35 = vunpack.i.h.bf16 %v5957_v0 }
 0x540   : > { %4842 = vmatmul.mubr.f32.gmra.mrb[52].mxu0 %v4577_v34  ;;  %v4530_v1 = vsel %vm225_vm0, %v4177_v52, %v5953_v55  ;;  %v4531_v58 = vsel %vm225_vm0, %v4179_v38, %v5954_v22 }
 0x541   : > { %5055 = vmatprep.mubr.msk.f32.mxu0 %vm225_vm0, %v4297_v18  ;;  %v4481_v27 = vpop.permute.xlu1 %4480  ;;  %v4538_v7 = vsel %vm1790_vm3, %v4530_v1, %v5958_v54  ;;  %v4539_v5 = vsel %vm1790_vm3, %v4531_v58, %v5959_v35 }
 0x558   : > { %v5967_v31 = vpop.permute.xlu1 %5966  ;;  %v5962_v3 = vpop.permute.xlu0 %5961 }
 0x559   : > { %v5968_v2 = vunpack.i.l.bf16 %v5967_v31  ;;  %v5963_v41 = vunpack.i.l.bf16 %v5962_v3  ;;  %v5964_v9 = vunpack.i.h.bf16 %v5962_v3  ;;  %v5969_v13 = vunpack.i.h.bf16 %v5967_v31 }
 0x55b   : > { %v4546_v36 = vsel %vm1856_vm5, %v4538_v7, %v5963_v41  ;;  %v4547_v49 = vsel %vm1856_vm5, %v4539_v5, %v5964_v9 }
 0x55c   : > { %v4554_v24 = vsel %vm1922_vm7, %v4546_v36, %v5968_v2  ;;  %v4513_v11 = vpop.permute.xlu0 %4512  ;;  %v4451_v62 = vpop.permute.xlu1 %4450  ;;  %v4555_v46 = vsel %vm1922_vm7, %v4547_v49, %v5969_v13 }
 0x55d   : > { %v4562_v10 = vsel %vm3662_vm9, %v4554_v24, %v4449_v28  ;;  %v4563_v47 = vsel %vm3662_vm9, %v4555_v46, %v4451_v62 }
 0x55e   : > { %v4570_v40 = vsel %vm3695_vm10, %v4562_v10, %v4481_v27 }
 0x55f   : > { %v4578_v4 = vsel %vm3728_vm11, %v4570_v40, %v4513_v11 }
 0x560   : > { %4847 = vmatmul.mubr.f32.gmra.mrb[54].mxu0 %v4578_v4 }
 0x561   : > { %5056 = vmatprep.mubr.msk.f32.mxu0 %vm225_vm0, %v4299_v39 }
 0x564   : > { %v4515_v23 = vpop.permute.xlu1 %4514  ;;  %v4483_v63 = vpop.permute.xlu0 %4482 }
 0x565   : > { %v4571_v6 = vsel %vm3695_vm10, %v4563_v47, %v4483_v63 }
 0x566   : > { %v4579_v57 = vsel %vm3728_vm11, %v4571_v6, %v4515_v23 }
 0x567   : > { %4852 = vmatmul.mubr.f32.gmra.mrb[56].mxu0 %v4579_v57 }
 0x5f3   : > { %v4818_v20 = vpop.f32.mrb[42].mxu0 }
 0x5f4   : > { %v4819_v25 = vadd.f32 %v4818_v20, %v8307_v51  ;;  %v4820_v45 = vpop.f32.mrb[43].mxu0 }
 0x5f6   : > { %4857 = vst.msk [vmem:[%s8393_s29] sm:$0xff] %vm225_vm0, %v4819_v25 }
 0x5f7   : > { %v4823_v60 = vpop.f32.mrb[44].mxu0 }
 0x5f8   : > { %v4824_v50 = vadd.f32 %v8305_v17, %v4823_v60  ;;  %v4825_v43 = vpop.f32.mrb[45].mxu0 }
 0x5fa   : > { %4858 = vst.msk [vmem:[%s8393_s29 + $0x8] sm:$0xff] %vm225_vm0, %v4824_v50 }
 0x600   : > { %v4828_v14 = vpop.f32.mrb[46].mxu0 }
 0x601   : > { %v4829_v29 = vadd.f32 %v4828_v14, %v8314_v16  ;;  %v4830_v59 = vpop.f32.mrb[47].mxu0 }
 0x603   : > { %4859 = vst.msk [vmem:[%s8393_s29 + $0x10] sm:$0xff] %vm225_vm0, %v4829_v29 }
 0x604   : > { %v4833_v42 = vpop.f32.mrb[48].mxu0 }
 0x605   : > { %v4834_v51 = vadd.f32 %v8309_v15, %v4833_v42  ;;  %v4835_v21 = vpop.f32.mrb[49].mxu0 }
 0x607   : > { %4860 = vst.msk [vmem:[%s8393_s29 + $0x18] sm:$0xff] %vm225_vm0, %v4834_v51 }
 0x60f   : > { %v4838_v33 = vpop.f32.mrb[50].mxu0 }
 0x610   : > { %v4839_v17 = vadd.f32 %v4838_v33, %v8318_v32  ;;  %v4840_v48 = vpop.f32.mrb[51].mxu0 }
 0x612   : > { %4861 = vst.msk [vmem:[%s8393_s29 + $0x20] sm:$0xff] %vm225_vm0, %v4839_v17 }
 0x613   : > { %v4843_v26 = vpop.f32.mrb[52].mxu0 }
 0x614   : > { %v4844_v16 = vadd.f32 %v8316_v61, %v4843_v26  ;;  %v4845_v53 = vpop.f32.mrb[53].mxu0 }
 0x616   : > { %4862 = vst.msk [vmem:[%s8393_s29 + $0x28] sm:$0xff] %vm225_vm0, %v4844_v16 }
 0x633   : > { %v4848_v44 = vpop.f32.mrb[54].mxu0 }
 0x634   : > { %v4849_v56 = vadd.f32 %v4848_v44, %v8322_v37  ;;  %v4850_v15 = vpop.f32.mrb[55].mxu0 }
 0x636   : > { %4863 = vst.msk [vmem:[%s8393_s29 + $0x30] sm:$0xff] %vm225_vm0, %v4849_v56 }
 0x63a   : > { %v4853_v30 = vpop.f32.mrb[56].mxu0 }
 0x63b   : > { %v4854_v19 = vadd.f32 %v8320_v12, %v4853_v30  ;;  %v4855_v34 = vpop.f32.mrb[57].mxu0 }
 0x63d   : > { %4864 = vst.msk [vmem:[%s8393_s29 + $0x38] sm:$0xff] %vm225_vm0, %v4854_v19 }
 0x63e PF: > { %s15_s18 = sadd.s32 1, %s5976_s18  }
 0x63f   : > { %p12_p4 = scmp.ge.s32.totalorder %s15_s18, 4  }
 0x641   :  { %14 = sbr.rel (!%p12_p4) target bundleno = 1 (0x1), region = 144 }

</bundles_post_ra>
